<compile_context>
chip_gen: v7x
topology: tpu7x:2x2x1
jax: 0.10.0
libtpu: 0.0.40
codegen_flags: <defaults>
</compile_context>

<pallas_src>
import functools

import jax
import jax.numpy as jnp
import numpy as np
from jax import lax
from jax.experimental import pallas as pl
from jax.experimental.pallas import tpu as pltpu

LANE = 128
SUBLANE = 8


def _round_up(x, m):
    return (x + m - 1) // m * m


# -----------------------------------------------------------------------------
# Kernel: entire decoder forward (2-layer LSTM + output projection) in one call
# -----------------------------------------------------------------------------
def decoder_kernel(x_ref, wih1_ref, b1_ref, wbig_ref, b2_ref, wbd_ref, bout_ref,
                   out_ref, *, seq_len):
    # x_ref   : (BP, D)               input, batch zero-padded to a sublane tile
    # wih1_ref: (D, 4*H1P)            LSTM1 input weights (gate blocks 128-padded)
    # b1_ref  : (1, 4*H1P)            LSTM1 combined bias
    # wbig_ref: (H1P+H2P, 4*H2P+4*H1P) fused [[Wih2|Whh1],[Whh2|0]]
    # b2_ref  : (1, 4*H2P)            LSTM2 combined bias
    # wbd_ref : (S*H2P, S*F)          block-diagonal output-projection weights
    # bout_ref: (1, S*F)              output bias tiled over steps
    # out_ref : (B, S*F)              final output (row-major (s, f) in lanes)
    x = x_ref[...]
    wih1 = wih1_ref[...]
    b1 = b1_ref[...]
    wbig = wbig_ref[...]
    b2 = b2_ref[...]
    wbd = wbd_ref[...]
    bout = bout_ref[...]

    BP = x.shape[0]
    H1P = b1.shape[1] // 4
    H2P = b2.shape[1] // 4
    G2 = 4 * H2P
    B = out_ref.shape[0]

    # Time-invariant layer-1 input term (RepeatVector): one dot, off the chain.
    xw1 = jnp.dot(x, wih1, preferred_element_type=jnp.float32) + b1      # (BP, 4*H1P)

    def gates(g, H):
        i = jax.nn.sigmoid(g[:, 0:H])
        f = jax.nn.sigmoid(g[:, H:2 * H])
        c_hat = jnp.tanh(g[:, 2 * H:3 * H])
        o = jax.nn.sigmoid(g[:, 3 * H:4 * H])
        return i, f, c_hat, o

    # PyTorch default: h0 = c0 = 0; recurrent part of g1 at t=0 is therefore 0.
    c1 = jnp.zeros((BP, H1P), jnp.float32)
    h2 = jnp.zeros((BP, H2P), jnp.float32)
    c2 = jnp.zeros((BP, H2P), jnp.float32)
    g1rec = jnp.zeros((BP, 4 * H1P), jnp.float32)

    h2_seq = []
    # seq_len is static -> fully unrolled; all states stay in vregs across steps.
    for _ in range(seq_len):
        # ---- layer 1: its recurrent matmul was produced by last step's fused dot.
        i1, f1, ch1, o1 = gates(xw1 + g1rec, H1P)
        c1 = f1 * c1 + i1 * ch1
        h1 = o1 * jnp.tanh(c1)

        # ---- single fused MXU dot per step:
        #      [h1(t), h2(t-1)] @ [[Wih2|Whh1],[Whh2|0]] = [g2(t) | h1(t)@Whh1]
        z = jnp.concatenate([h1, h2], axis=1)                            # (BP, H1P+H2P)
        big = jnp.dot(z, wbig, preferred_element_type=jnp.float32)       # (BP, G2+4*H1P)
        g1rec = big[:, G2:]                                              # for step t+1

        # ---- layer 2 gates / state update.
        i2, f2, ch2, o2 = gates(big[:, :G2] + b2, H2P)
        c2 = f2 * c2 + i2 * ch2
        h2 = o2 * jnp.tanh(c2)
        h2_seq.append(h2)

    # Lane-concat the trajectory (aligned 128-lane pieces -> cheap placement), then
    # one block-diagonal matmul performs the per-step Linear(H2 -> F) projection:
    #   y[b, s*F + f] = sum_h h2_s[b, h] * Wout[f, h] + bout[f]
    hs_wide = jnp.concatenate(h2_seq, axis=1)                            # (BP, S*H2P)
    y = jnp.dot(hs_wide, wbd, preferred_element_type=jnp.float32) + bout  # (BP, S*F)

    # Single dense store; drop the zero-padded batch rows.
    out_ref[...] = y[:B, :]


# -----------------------------------------------------------------------------
# Parameters: PyTorch layout (for the reference) + packed kernel layout
# -----------------------------------------------------------------------------
def init_params(key, input_dim, n_features):
    """PyTorch-layout parameters (nn.LSTM / nn.Linear default init)."""
    D, H1, H2, F = input_dim, input_dim, 2 * input_dim, n_features

    def uni(k, shape, fan):
        b = 1.0 / np.sqrt(fan)
        return jax.random.uniform(k, shape, jnp.float32, -b, b)

    ks = jax.random.split(key, 10)
    return {
        "wih1": uni(ks[0], (4 * H1, D), H1), "whh1": uni(ks[1], (4 * H1, H1), H1),
        "bih1": uni(ks[2], (4 * H1,), H1),   "bhh1": uni(ks[3], (4 * H1,), H1),
        "wih2": uni(ks[4], (4 * H2, H1), H2), "whh2": uni(ks[5], (4 * H2, H2), H2),
        "bih2": uni(ks[6], (4 * H2,), H2),    "bhh2": uni(ks[7], (4 * H2,), H2),
        "wout": uni(ks[8], (F, H2), H2),      "bout": uni(ks[9], (F,), H2),
    }


def pack_params(p, seq_len):
    """Kernel layout: transposed, gate blocks zero-padded to 128 lanes, LSTM2
    ih/hh and LSTM1 hh fused into one matrix, output Linear as a block-diagonal
    matrix over the lane-concatenated trajectory. Padding is mathematically exact."""
    four_h1 = p["wih1"].shape[0]
    H1 = four_h1 // 4
    H2 = p["whh2"].shape[1]
    H1P = _round_up(H1, LANE)
    H2P = _round_up(H2, LANE)

    def gate_pad_T(w, hp):
        # (4H, in) -> (in, 4*hp): transpose, each gate block zero-padded to hp lanes.
        fourh, ind = w.shape
        h = fourh // 4
        wt = w.T.reshape(ind, 4, h)
        out = jnp.zeros((ind, 4, hp), jnp.float32).at[:, :, :h].set(wt)
        return out.reshape(ind, 4 * hp)

    def gate_pad_b(b, hp):
        h = b.shape[0] // 4
        out = jnp.zeros((4, hp), jnp.float32).at[:, :h].set(b.reshape(4, h))
        return out.reshape(1, 4 * hp)

    def row_pad(w, rows):
        return jnp.zeros((rows, w.shape[1]), jnp.float32).at[: w.shape[0]].set(w)

    wih1_T = gate_pad_T(p["wih1"], H1P)                        # (D, 4*H1P)
    b1 = gate_pad_b(p["bih1"] + p["bhh1"], H1P)                # (1, 4*H1P)

    wih2_T = row_pad(gate_pad_T(p["wih2"], H2P), H1P)          # (H1P, 4*H2P)
    whh2_T = row_pad(gate_pad_T(p["whh2"], H2P), H2P)          # (H2P, 4*H2P)
    whh1_T = row_pad(gate_pad_T(p["whh1"], H1P), H1P)          # (H1P, 4*H1P)
    b2 = gate_pad_b(p["bih2"] + p["bhh2"], H2P)                # (1, 4*H2P)

    # Fused per-step weight: z=[h1(t), h2(t-1)] @ wbig = [g2(t) | h1(t)@Whh1].
    top = jnp.concatenate([wih2_T, whh1_T], axis=1)                         # (H1P, ·)
    bot = jnp.concatenate([whh2_T, jnp.zeros((H2P, 4 * H1P), jnp.float32)], axis=1)
    wbig = jnp.concatenate([top, bot], axis=0)                 # (H1P+H2P, 4*H2P+4*H1P)

    # Block-diagonal output projection applied to the lane-concatenated trajectory.
    wout_T = row_pad(p["wout"].T.astype(jnp.float32), H2P)     # (H2P, F)
    wbd = jnp.kron(jnp.eye(seq_len, dtype=jnp.float32), wout_T)  # (S*H2P, S*F)
    bout_t = jnp.tile(p["bout"][None, :], (1, seq_len))        # (1, S*F)

    return {"wih1_T": wih1_T, "b1": b1, "wbig": wbig, "b2": b2,
            "wbd": wbd, "bout_t": bout_t}


# -----------------------------------------------------------------------------
# Wrapper: batch pad + one pallas_call + metadata reshape (no extra XLA matmuls)
# -----------------------------------------------------------------------------
@functools.partial(jax.jit, static_argnames=("seq_len", "n_features"))
def decoder_forward(x, kp, *, seq_len, n_features):
    B = x.shape[0]
    BP = _round_up(B, SUBLANE)
    # Pad the batch to a full 8-sublane tile (padded rows are dropped in-kernel).
    xp = jnp.pad(x.astype(jnp.float32), ((0, BP - B), (0, 0)))

    vmem = pl.BlockSpec(memory_space=pltpu.MemorySpace.VMEM)
    y = pl.pallas_call(
        functools.partial(decoder_kernel, seq_len=seq_len),
        out_shape=jax.ShapeDtypeStruct((B, seq_len * n_features), jnp.float32),
        in_specs=[vmem] * 7,
        out_specs=vmem,
    )(xp, kp["wih1_T"], kp["b1"], kp["wbig"], kp["b2"], kp["wbd"], kp["bout_t"])

    # (B, S*F) row-major -> (B, S, F): pure metadata reshape.
    return y.reshape(B, seq_len, n_features)


# -----------------------------------------------------------------------------
# Pure-JAX reference (mirrors PyTorch forward) for correctness check
# -----------------------------------------------------------------------------
def decoder_reference(x, p, seq_len):
    B, D = x.shape
    H1, H2 = D, 2 * D

    def run_lstm(xs, wih, whh, bih, bhh, H):
        def step(carry, xt):
            h, c = carry
            g = (jnp.dot(xt, wih.T, precision=lax.Precision.HIGHEST)
                 + jnp.dot(h, whh.T, precision=lax.Precision.HIGHEST)
                 + bih + bhh)
            i = jax.nn.sigmoid(g[:, :H])
            f = jax.nn.sigmoid(g[:, H:2 * H])
            gg = jnp.tanh(g[:, 2 * H:3 * H])
            o = jax.nn.sigmoid(g[:, 3 * H:])
            c = f * c + i * gg
            h = o * jnp.tanh(c)
            return (h, c), h

        init = (jnp.zeros((B, H), jnp.float32), jnp.zeros((B, H), jnp.float32))
        _, hs = lax.scan(step, init, xs)   # xs: (S, B, in) -> hs: (S, B, H)
        return hs

    x_rep = jnp.broadcast_to(x[None], (seq_len, B, D))
    h1 = run_lstm(x_rep, p["wih1"], p["whh1"], p["bih1"], p["bhh1"], H1)
    h2 = run_lstm(h1, p["wih2"], p["whh2"], p["bih2"], p["bhh2"], H2)
    y = jnp.einsum("sbh,fh->bsf", h2, p["wout"],
                   precision=lax.Precision.HIGHEST) + p["bout"]
    return y


if __name__ == "__main__":
    SEQ_LEN = 8
    INPUT_DIM = 64
    N_FEATURES = 1
    BATCH = 4

    key = jax.random.PRNGKey(0)
    k_param, k_x = jax.random.split(key)
    params = init_params(k_param, INPUT_DIM, N_FEATURES)
    kparams = pack_params(params, SEQ_LEN)
    x = jax.random.normal(k_x, (BATCH, INPUT_DIM), jnp.float32)

    out = decoder_forward(x, kparams, seq_len=SEQ_LEN, n_features=N_FEATURES)
    out = jax.block_until_ready(out)

    ref = decoder_reference(x, params, SEQ_LEN)
    assert out.shape == (BATCH, SEQ_LEN, N_FEATURES), out.shape
    np.testing.assert_allclose(np.asarray(out), np.asarray(ref), rtol=1e-4, atol=1e-4)

    print("KERNEL_OK")
</pallas_src>

<mosaic_0001>
module attributes {stable_mosaic.version = 11 : i64} {
  func.func @decoder_kernel(%arg0: memref<8x64xf32, #tpu.memory_space<vmem>>, %arg1: memref<64x512xf32, #tpu.memory_space<vmem>>, %arg2: memref<1x512xf32, #tpu.memory_space<vmem>>, %arg3: memref<256x1024xf32, #tpu.memory_space<vmem>>, %arg4: memref<1x512xf32, #tpu.memory_space<vmem>>, %arg5: memref<1024x8xf32, #tpu.memory_space<vmem>>, %arg6: memref<1x8xf32, #tpu.memory_space<vmem>>, %arg7: memref<4x8xf32, #tpu.memory_space<vmem>>) attributes {dimension_semantics = [], scalar_prefetch = 0 : i64, scratch_operands = 0 : i64, tpu.core_type = #tpu.core_type<tc>} {
    %c0 = arith.constant 0 : index
    %c0_0 = arith.constant 0 : index
    %0 = vector.load %arg0[%c0, %c0_0] : memref<8x64xf32, #tpu.memory_space<vmem>>, vector<8x64xf32>
    %c0_1 = arith.constant 0 : index
    %c0_2 = arith.constant 0 : index
    %1 = vector.load %arg1[%c0_1, %c0_2] : memref<64x512xf32, #tpu.memory_space<vmem>>, vector<64x512xf32>
    %c0_3 = arith.constant 0 : index
    %c0_4 = arith.constant 0 : index
    %2 = vector.load %arg2[%c0_3, %c0_4] : memref<1x512xf32, #tpu.memory_space<vmem>>, vector<1x512xf32>
    %c0_5 = arith.constant 0 : index
    %c0_6 = arith.constant 0 : index
    %3 = vector.load %arg3[%c0_5, %c0_6] : memref<256x1024xf32, #tpu.memory_space<vmem>>, vector<256x1024xf32>
    %c0_7 = arith.constant 0 : index
    %c0_8 = arith.constant 0 : index
    %4 = vector.load %arg4[%c0_7, %c0_8] : memref<1x512xf32, #tpu.memory_space<vmem>>, vector<1x512xf32>
    %c0_9 = arith.constant 0 : index
    %c0_10 = arith.constant 0 : index
    %5 = vector.load %arg5[%c0_9, %c0_10] : memref<1024x8xf32, #tpu.memory_space<vmem>>, vector<1024x8xf32>
    %c0_11 = arith.constant 0 : index
    %c0_12 = arith.constant 0 : index
    %6 = vector.load %arg6[%c0_11, %c0_12] : memref<1x8xf32, #tpu.memory_space<vmem>>, vector<1x8xf32>
    %cst = arith.constant dense<0.000000e+00> : vector<8x512xf32>
    %7 = tpu.matmul %0, %1, %cst {dimension_numbers = #tpu.dot_dimension_numbers<[1], [0], [0], [1], [0, 0, 1, 1], [], []>} : vector<8x64xf32>, vector<64x512xf32>, vector<8x512xf32> -> vector<8x512xf32>
    %8 = vector.broadcast %2 : vector<1x512xf32> to vector<8x512xf32>
    %9 = arith.addf %7, %8 : vector<8x512xf32>
    %cst_13 = arith.constant 0.000000e+00 : f32
    %10 = vector.broadcast %cst_13 : f32 to vector<8x128xf32>
    %cst_14 = arith.constant 0.000000e+00 : f32
    %11 = vector.broadcast %cst_14 : f32 to vector<8x128xf32>
    %cst_15 = arith.constant 0.000000e+00 : f32
    %12 = vector.broadcast %cst_15 : f32 to vector<8x128xf32>
    %cst_16 = arith.constant 0.000000e+00 : f32
    %13 = vector.broadcast %cst_16 : f32 to vector<8x512xf32>
    %14 = arith.addf %9, %13 : vector<8x512xf32>
    %15 = vector.extract_strided_slice %14 {offsets = [0, 0], sizes = [8, 128], strides = [1, 1]} : vector<8x512xf32> to vector<8x128xf32>
    %16 = arith.negf %15 : vector<8x128xf32>
    %17 = math.exp %16 : vector<8x128xf32>
    %cst_17 = arith.constant 1.000000e+00 : f32
    %18 = vector.broadcast %cst_17 : f32 to vector<8x128xf32>
    %19 = arith.addf %18, %17 : vector<8x128xf32>
    %20 = arith.divf %18, %19 : vector<8x128xf32>
    %21 = vector.extract_strided_slice %14 {offsets = [0, 128], sizes = [8, 128], strides = [1, 1]} : vector<8x512xf32> to vector<8x128xf32>
    %22 = arith.negf %21 : vector<8x128xf32>
    %23 = math.exp %22 : vector<8x128xf32>
    %cst_18 = arith.constant 1.000000e+00 : f32
    %24 = vector.broadcast %cst_18 : f32 to vector<8x128xf32>
    %25 = arith.addf %24, %23 : vector<8x128xf32>
    %26 = arith.divf %24, %25 : vector<8x128xf32>
    %27 = vector.extract_strided_slice %14 {offsets = [0, 256], sizes = [8, 128], strides = [1, 1]} : vector<8x512xf32> to vector<8x128xf32>
    %28 = math.tanh %27 : vector<8x128xf32>
    %29 = vector.extract_strided_slice %14 {offsets = [0, 384], sizes = [8, 128], strides = [1, 1]} : vector<8x512xf32> to vector<8x128xf32>
    %30 = arith.negf %29 : vector<8x128xf32>
    %31 = math.exp %30 : vector<8x128xf32>
    %cst_19 = arith.constant 1.000000e+00 : f32
    %32 = vector.broadcast %cst_19 : f32 to vector<8x128xf32>
    %33 = arith.addf %32, %31 : vector<8x128xf32>
    %34 = arith.divf %32, %33 : vector<8x128xf32>
    %35 = arith.mulf %26, %10 : vector<8x128xf32>
    %36 = arith.mulf %20, %28 : vector<8x128xf32>
    %37 = arith.addf %35, %36 : vector<8x128xf32>
    %38 = math.tanh %37 : vector<8x128xf32>
    %39 = arith.mulf %34, %38 : vector<8x128xf32>
    %40 = tpu.concatenate %39, %11 in 1 : vector<8x128xf32>, vector<8x128xf32> -> vector<8x256xf32>
    %cst_20 = arith.constant dense<0.000000e+00> : vector<8x1024xf32>
    %41 = tpu.matmul %40, %3, %cst_20 {dimension_numbers = #tpu.dot_dimension_numbers<[1], [0], [0], [1], [0, 0, 1, 1], [], []>} : vector<8x256xf32>, vector<256x1024xf32>, vector<8x1024xf32> -> vector<8x1024xf32>
    %42 = vector.extract_strided_slice %41 {offsets = [0, 512], sizes = [8, 512], strides = [1, 1]} : vector<8x1024xf32> to vector<8x512xf32>
    %43 = vector.extract_strided_slice %41 {offsets = [0, 0], sizes = [8, 512], strides = [1, 1]} : vector<8x1024xf32> to vector<8x512xf32>
    %44 = vector.broadcast %4 : vector<1x512xf32> to vector<8x512xf32>
    %45 = arith.addf %43, %44 : vector<8x512xf32>
    %46 = vector.extract_strided_slice %45 {offsets = [0, 0], sizes = [8, 128], strides = [1, 1]} : vector<8x512xf32> to vector<8x128xf32>
    %47 = arith.negf %46 : vector<8x128xf32>
    %48 = math.exp %47 : vector<8x128xf32>
    %cst_21 = arith.constant 1.000000e+00 : f32
    %49 = vector.broadcast %cst_21 : f32 to vector<8x128xf32>
    %50 = arith.addf %49, %48 : vector<8x128xf32>
    %51 = arith.divf %49, %50 : vector<8x128xf32>
    %52 = vector.extract_strided_slice %45 {offsets = [0, 128], sizes = [8, 128], strides = [1, 1]} : vector<8x512xf32> to vector<8x128xf32>
    %53 = arith.negf %52 : vector<8x128xf32>
    %54 = math.exp %53 : vector<8x128xf32>
    %cst_22 = arith.constant 1.000000e+00 : f32
    %55 = vector.broadcast %cst_22 : f32 to vector<8x128xf32>
    %56 = arith.addf %55, %54 : vector<8x128xf32>
    %57 = arith.divf %55, %56 : vector<8x128xf32>
    %58 = vector.extract_strided_slice %45 {offsets = [0, 256], sizes = [8, 128], strides = [1, 1]} : vector<8x512xf32> to vector<8x128xf32>
    %59 = math.tanh %58 : vector<8x128xf32>
    %60 = vector.extract_strided_slice %45 {offsets = [0, 384], sizes = [8, 128], strides = [1, 1]} : vector<8x512xf32> to vector<8x128xf32>
    %61 = arith.negf %60 : vector<8x128xf32>
    %62 = math.exp %61 : vector<8x128xf32>
    %cst_23 = arith.constant 1.000000e+00 : f32
    %63 = vector.broadcast %cst_23 : f32 to vector<8x128xf32>
    %64 = arith.addf %63, %62 : vector<8x128xf32>
    %65 = arith.divf %63, %64 : vector<8x128xf32>
    %66 = arith.mulf %57, %12 : vector<8x128xf32>
    %67 = arith.mulf %51, %59 : vector<8x128xf32>
    %68 = arith.addf %66, %67 : vector<8x128xf32>
    %69 = math.tanh %68 : vector<8x128xf32>
    %70 = arith.mulf %65, %69 : vector<8x128xf32>
    %71 = arith.addf %9, %42 : vector<8x512xf32>
    %72 = vector.extract_strided_slice %71 {offsets = [0, 0], sizes = [8, 128], strides = [1, 1]} : vector<8x512xf32> to vector<8x128xf32>
    %73 = arith.negf %72 : vector<8x128xf32>
    %74 = math.exp %73 : vector<8x128xf32>
    %cst_24 = arith.constant 1.000000e+00 : f32
    %75 = vector.broadcast %cst_24 : f32 to vector<8x128xf32>
    %76 = arith.addf %75, %74 : vector<8x128xf32>
    %77 = arith.divf %75, %76 : vector<8x128xf32>
    %78 = vector.extract_strided_slice %71 {offsets = [0, 128], sizes = [8, 128], strides = [1, 1]} : vector<8x512xf32> to vector<8x128xf32>
    %79 = arith.negf %78 : vector<8x128xf32>
    %80 = math.exp %79 : vector<8x128xf32>
    %cst_25 = arith.constant 1.000000e+00 : f32
    %81 = vector.broadcast %cst_25 : f32 to vector<8x128xf32>
    %82 = arith.addf %81, %80 : vector<8x128xf32>
    %83 = arith.divf %81, %82 : vector<8x128xf32>
    %84 = vector.extract_strided_slice %71 {offsets = [0, 256], sizes = [8, 128], strides = [1, 1]} : vector<8x512xf32> to vector<8x128xf32>
    %85 = math.tanh %84 : vector<8x128xf32>
    %86 = vector.extract_strided_slice %71 {offsets = [0, 384], sizes = [8, 128], strides = [1, 1]} : vector<8x512xf32> to vector<8x128xf32>
    %87 = arith.negf %86 : vector<8x128xf32>
    %88 = math.exp %87 : vector<8x128xf32>
    %cst_26 = arith.constant 1.000000e+00 : f32
    %89 = vector.broadcast %cst_26 : f32 to vector<8x128xf32>
    %90 = arith.addf %89, %88 : vector<8x128xf32>
    %91 = arith.divf %89, %90 : vector<8x128xf32>
    %92 = arith.mulf %83, %37 : vector<8x128xf32>
    %93 = arith.mulf %77, %85 : vector<8x128xf32>
    %94 = arith.addf %92, %93 : vector<8x128xf32>
    %95 = math.tanh %94 : vector<8x128xf32>
    %96 = arith.mulf %91, %95 : vector<8x128xf32>
    %97 = tpu.concatenate %96, %70 in 1 : vector<8x128xf32>, vector<8x128xf32> -> vector<8x256xf32>
    %cst_27 = arith.constant dense<0.000000e+00> : vector<8x1024xf32>
    %98 = tpu.matmul %97, %3, %cst_27 {dimension_numbers = #tpu.dot_dimension_numbers<[1], [0], [0], [1], [0, 0, 1, 1], [], []>} : vector<8x256xf32>, vector<256x1024xf32>, vector<8x1024xf32> -> vector<8x1024xf32>
    %99 = vector.extract_strided_slice %98 {offsets = [0, 512], sizes = [8, 512], strides = [1, 1]} : vector<8x1024xf32> to vector<8x512xf32>
    %100 = vector.extract_strided_slice %98 {offsets = [0, 0], sizes = [8, 512], strides = [1, 1]} : vector<8x1024xf32> to vector<8x512xf32>
    %101 = vector.broadcast %4 : vector<1x512xf32> to vector<8x512xf32>
    %102 = arith.addf %100, %101 : vector<8x512xf32>
    %103 = vector.extract_strided_slice %102 {offsets = [0, 0], sizes = [8, 128], strides = [1, 1]} : vector<8x512xf32> to vector<8x128xf32>
    %104 = arith.negf %103 : vector<8x128xf32>
    %105 = math.exp %104 : vector<8x128xf32>
    %cst_28 = arith.constant 1.000000e+00 : f32
    %106 = vector.broadcast %cst_28 : f32 to vector<8x128xf32>
    %107 = arith.addf %106, %105 : vector<8x128xf32>
    %108 = arith.divf %106, %107 : vector<8x128xf32>
    %109 = vector.extract_strided_slice %102 {offsets = [0, 128], sizes = [8, 128], strides = [1, 1]} : vector<8x512xf32> to vector<8x128xf32>
    %110 = arith.negf %109 : vector<8x128xf32>
    %111 = math.exp %110 : vector<8x128xf32>
    %cst_29 = arith.constant 1.000000e+00 : f32
    %112 = vector.broadcast %cst_29 : f32 to vector<8x128xf32>
    %113 = arith.addf %112, %111 : vector<8x128xf32>
    %114 = arith.divf %112, %113 : vector<8x128xf32>
    %115 = vector.extract_strided_slice %102 {offsets = [0, 256], sizes = [8, 128], strides = [1, 1]} : vector<8x512xf32> to vector<8x128xf32>
    %116 = math.tanh %115 : vector<8x128xf32>
    %117 = vector.extract_strided_slice %102 {offsets = [0, 384], sizes = [8, 128], strides = [1, 1]} : vector<8x512xf32> to vector<8x128xf32>
    %118 = arith.negf %117 : vector<8x128xf32>
    %119 = math.exp %118 : vector<8x128xf32>
    %cst_30 = arith.constant 1.000000e+00 : f32
    %120 = vector.broadcast %cst_30 : f32 to vector<8x128xf32>
    %121 = arith.addf %120, %119 : vector<8x128xf32>
    %122 = arith.divf %120, %121 : vector<8x128xf32>
    %123 = arith.mulf %114, %68 : vector<8x128xf32>
    %124 = arith.mulf %108, %116 : vector<8x128xf32>
    %125 = arith.addf %123, %124 : vector<8x128xf32>
    %126 = math.tanh %125 : vector<8x128xf32>
    %127 = arith.mulf %122, %126 : vector<8x128xf32>
    %128 = arith.addf %9, %99 : vector<8x512xf32>
    %129 = vector.extract_strided_slice %128 {offsets = [0, 0], sizes = [8, 128], strides = [1, 1]} : vector<8x512xf32> to vector<8x128xf32>
    %130 = arith.negf %129 : vector<8x128xf32>
    %131 = math.exp %130 : vector<8x128xf32>
    %cst_31 = arith.constant 1.000000e+00 : f32
    %132 = vector.broadcast %cst_31 : f32 to vector<8x128xf32>
    %133 = arith.addf %132, %131 : vector<8x128xf32>
    %134 = arith.divf %132, %133 : vector<8x128xf32>
    %135 = vector.extract_strided_slice %128 {offsets = [0, 128], sizes = [8, 128], strides = [1, 1]} : vector<8x512xf32> to vector<8x128xf32>
    %136 = arith.negf %135 : vector<8x128xf32>
    %137 = math.exp %136 : vector<8x128xf32>
    %cst_32 = arith.constant 1.000000e+00 : f32
    %138 = vector.broadcast %cst_32 : f32 to vector<8x128xf32>
    %139 = arith.addf %138, %137 : vector<8x128xf32>
    %140 = arith.divf %138, %139 : vector<8x128xf32>
    %141 = vector.extract_strided_slice %128 {offsets = [0, 256], sizes = [8, 128], strides = [1, 1]} : vector<8x512xf32> to vector<8x128xf32>
    %142 = math.tanh %141 : vector<8x128xf32>
    %143 = vector.extract_strided_slice %128 {offsets = [0, 384], sizes = [8, 128], strides = [1, 1]} : vector<8x512xf32> to vector<8x128xf32>
    %144 = arith.negf %143 : vector<8x128xf32>
    %145 = math.exp %144 : vector<8x128xf32>
    %cst_33 = arith.constant 1.000000e+00 : f32
    %146 = vector.broadcast %cst_33 : f32 to vector<8x128xf32>
    %147 = arith.addf %146, %145 : vector<8x128xf32>
    %148 = arith.divf %146, %147 : vector<8x128xf32>
    %149 = arith.mulf %140, %94 : vector<8x128xf32>
    %150 = arith.mulf %134, %142 : vector<8x128xf32>
    %151 = arith.addf %149, %150 : vector<8x128xf32>
    %152 = math.tanh %151 : vector<8x128xf32>
    %153 = arith.mulf %148, %152 : vector<8x128xf32>
    %154 = tpu.concatenate %153, %127 in 1 : vector<8x128xf32>, vector<8x128xf32> -> vector<8x256xf32>
    %cst_34 = arith.constant dense<0.000000e+00> : vector<8x1024xf32>
    %155 = tpu.matmul %154, %3, %cst_34 {dimension_numbers = #tpu.dot_dimension_numbers<[1], [0], [0], [1], [0, 0, 1, 1], [], []>} : vector<8x256xf32>, vector<256x1024xf32>, vector<8x1024xf32> -> vector<8x1024xf32>
    %156 = vector.extract_strided_slice %155 {offsets = [0, 512], sizes = [8, 512], strides = [1, 1]} : vector<8x1024xf32> to vector<8x512xf32>
    %157 = vector.extract_strided_slice %155 {offsets = [0, 0], sizes = [8, 512], strides = [1, 1]} : vector<8x1024xf32> to vector<8x512xf32>
    %158 = vector.broadcast %4 : vector<1x512xf32> to vector<8x512xf32>
    %159 = arith.addf %157, %158 : vector<8x512xf32>
    %160 = vector.extract_strided_slice %159 {offsets = [0, 0], sizes = [8, 128], strides = [1, 1]} : vector<8x512xf32> to vector<8x128xf32>
    %161 = arith.negf %160 : vector<8x128xf32>
    %162 = math.exp %161 : vector<8x128xf32>
    %cst_35 = arith.constant 1.000000e+00 : f32
    %163 = vector.broadcast %cst_35 : f32 to vector<8x128xf32>
    %164 = arith.addf %163, %162 : vector<8x128xf32>
    %165 = arith.divf %163, %164 : vector<8x128xf32>
    %166 = vector.extract_strided_slice %159 {offsets = [0, 128], sizes = [8, 128], strides = [1, 1]} : vector<8x512xf32> to vector<8x128xf32>
    %167 = arith.negf %166 : vector<8x128xf32>
    %168 = math.exp %167 : vector<8x128xf32>
    %cst_36 = arith.constant 1.000000e+00 : f32
    %169 = vector.broadcast %cst_36 : f32 to vector<8x128xf32>
    %170 = arith.addf %169, %168 : vector<8x128xf32>
    %171 = arith.divf %169, %170 : vector<8x128xf32>
    %172 = vector.extract_strided_slice %159 {offsets = [0, 256], sizes = [8, 128], strides = [1, 1]} : vector<8x512xf32> to vector<8x128xf32>
    %173 = math.tanh %172 : vector<8x128xf32>
    %174 = vector.extract_strided_slice %159 {offsets = [0, 384], sizes = [8, 128], strides = [1, 1]} : vector<8x512xf32> to vector<8x128xf32>
    %175 = arith.negf %174 : vector<8x128xf32>
    %176 = math.exp %175 : vector<8x128xf32>
    %cst_37 = arith.constant 1.000000e+00 : f32
    %177 = vector.broadcast %cst_37 : f32 to vector<8x128xf32>
    %178 = arith.addf %177, %176 : vector<8x128xf32>
    %179 = arith.divf %177, %178 : vector<8x128xf32>
    %180 = arith.mulf %171, %125 : vector<8x128xf32>
    %181 = arith.mulf %165, %173 : vector<8x128xf32>
    %182 = arith.addf %180, %181 : vector<8x128xf32>
    %183 = math.tanh %182 : vector<8x128xf32>
    %184 = arith.mulf %179, %183 : vector<8x128xf32>
    %185 = arith.addf %9, %156 : vector<8x512xf32>
    %186 = vector.extract_strided_slice %185 {offsets = [0, 0], sizes = [8, 128], strides = [1, 1]} : vector<8x512xf32> to vector<8x128xf32>
    %187 = arith.negf %186 : vector<8x128xf32>
    %188 = math.exp %187 : vector<8x128xf32>
    %cst_38 = arith.constant 1.000000e+00 : f32
    %189 = vector.broadcast %cst_38 : f32 to vector<8x128xf32>
    %190 = arith.addf %189, %188 : vector<8x128xf32>
    %191 = arith.divf %189, %190 : vector<8x128xf32>
    %192 = vector.extract_strided_slice %185 {offsets = [0, 128], sizes = [8, 128], strides = [1, 1]} : vector<8x512xf32> to vector<8x128xf32>
    %193 = arith.negf %192 : vector<8x128xf32>
    %194 = math.exp %193 : vector<8x128xf32>
    %cst_39 = arith.constant 1.000000e+00 : f32
    %195 = vector.broadcast %cst_39 : f32 to vector<8x128xf32>
    %196 = arith.addf %195, %194 : vector<8x128xf32>
    %197 = arith.divf %195, %196 : vector<8x128xf32>
    %198 = vector.extract_strided_slice %185 {offsets = [0, 256], sizes = [8, 128], strides = [1, 1]} : vector<8x512xf32> to vector<8x128xf32>
    %199 = math.tanh %198 : vector<8x128xf32>
    %200 = vector.extract_strided_slice %185 {offsets = [0, 384], sizes = [8, 128], strides = [1, 1]} : vector<8x512xf32> to vector<8x128xf32>
    %201 = arith.negf %200 : vector<8x128xf32>
    %202 = math.exp %201 : vector<8x128xf32>
    %cst_40 = arith.constant 1.000000e+00 : f32
    %203 = vector.broadcast %cst_40 : f32 to vector<8x128xf32>
    %204 = arith.addf %203, %202 : vector<8x128xf32>
    %205 = arith.divf %203, %204 : vector<8x128xf32>
    %206 = arith.mulf %197, %151 : vector<8x128xf32>
    %207 = arith.mulf %191, %199 : vector<8x128xf32>
    %208 = arith.addf %206, %207 : vector<8x128xf32>
    %209 = math.tanh %208 : vector<8x128xf32>
    %210 = arith.mulf %205, %209 : vector<8x128xf32>
    %211 = tpu.concatenate %210, %184 in 1 : vector<8x128xf32>, vector<8x128xf32> -> vector<8x256xf32>
    %cst_41 = arith.constant dense<0.000000e+00> : vector<8x1024xf32>
    %212 = tpu.matmul %211, %3, %cst_41 {dimension_numbers = #tpu.dot_dimension_numbers<[1], [0], [0], [1], [0, 0, 1, 1], [], []>} : vector<8x256xf32>, vector<256x1024xf32>, vector<8x1024xf32> -> vector<8x1024xf32>
    %213 = vector.extract_strided_slice %212 {offsets = [0, 512], sizes = [8, 512], strides = [1, 1]} : vector<8x1024xf32> to vector<8x512xf32>
    %214 = vector.extract_strided_slice %212 {offsets = [0, 0], sizes = [8, 512], strides = [1, 1]} : vector<8x1024xf32> to vector<8x512xf32>
    %215 = vector.broadcast %4 : vector<1x512xf32> to vector<8x512xf32>
    %216 = arith.addf %214, %215 : vector<8x512xf32>
    %217 = vector.extract_strided_slice %216 {offsets = [0, 0], sizes = [8, 128], strides = [1, 1]} : vector<8x512xf32> to vector<8x128xf32>
    %218 = arith.negf %217 : vector<8x128xf32>
    %219 = math.exp %218 : vector<8x128xf32>
    %cst_42 = arith.constant 1.000000e+00 : f32
    %220 = vector.broadcast %cst_42 : f32 to vector<8x128xf32>
    %221 = arith.addf %220, %219 : vector<8x128xf32>
    %222 = arith.divf %220, %221 : vector<8x128xf32>
    %223 = vector.extract_strided_slice %216 {offsets = [0, 128], sizes = [8, 128], strides = [1, 1]} : vector<8x512xf32> to vector<8x128xf32>
    %224 = arith.negf %223 : vector<8x128xf32>
    %225 = math.exp %224 : vector<8x128xf32>
    %cst_43 = arith.constant 1.000000e+00 : f32
    %226 = vector.broadcast %cst_43 : f32 to vector<8x128xf32>
    %227 = arith.addf %226, %225 : vector<8x128xf32>
    %228 = arith.divf %226, %227 : vector<8x128xf32>
    %229 = vector.extract_strided_slice %216 {offsets = [0, 256], sizes = [8, 128], strides = [1, 1]} : vector<8x512xf32> to vector<8x128xf32>
    %230 = math.tanh %229 : vector<8x128xf32>
    %231 = vector.extract_strided_slice %216 {offsets = [0, 384], sizes = [8, 128], strides = [1, 1]} : vector<8x512xf32> to vector<8x128xf32>
    %232 = arith.negf %231 : vector<8x128xf32>
    %233 = math.exp %232 : vector<8x128xf32>
    %cst_44 = arith.constant 1.000000e+00 : f32
    %234 = vector.broadcast %cst_44 : f32 to vector<8x128xf32>
    %235 = arith.addf %234, %233 : vector<8x128xf32>
    %236 = arith.divf %234, %235 : vector<8x128xf32>
    %237 = arith.mulf %228, %182 : vector<8x128xf32>
    %238 = arith.mulf %222, %230 : vector<8x128xf32>
    %239 = arith.addf %237, %238 : vector<8x128xf32>
    %240 = math.tanh %239 : vector<8x128xf32>
    %241 = arith.mulf %236, %240 : vector<8x128xf32>
    %242 = arith.addf %9, %213 : vector<8x512xf32>
    %243 = vector.extract_strided_slice %242 {offsets = [0, 0], sizes = [8, 128], strides = [1, 1]} : vector<8x512xf32> to vector<8x128xf32>
    %244 = arith.negf %243 : vector<8x128xf32>
    %245 = math.exp %244 : vector<8x128xf32>
    %cst_45 = arith.constant 1.000000e+00 : f32
    %246 = vector.broadcast %cst_45 : f32 to vector<8x128xf32>
    %247 = arith.addf %246, %245 : vector<8x128xf32>
    %248 = arith.divf %246, %247 : vector<8x128xf32>
    %249 = vector.extract_strided_slice %242 {offsets = [0, 128], sizes = [8, 128], strides = [1, 1]} : vector<8x512xf32> to vector<8x128xf32>
    %250 = arith.negf %249 : vector<8x128xf32>
    %251 = math.exp %250 : vector<8x128xf32>
    %cst_46 = arith.constant 1.000000e+00 : f32
    %252 = vector.broadcast %cst_46 : f32 to vector<8x128xf32>
    %253 = arith.addf %252, %251 : vector<8x128xf32>
    %254 = arith.divf %252, %253 : vector<8x128xf32>
    %255 = vector.extract_strided_slice %242 {offsets = [0, 256], sizes = [8, 128], strides = [1, 1]} : vector<8x512xf32> to vector<8x128xf32>
    %256 = math.tanh %255 : vector<8x128xf32>
    %257 = vector.extract_strided_slice %242 {offsets = [0, 384], sizes = [8, 128], strides = [1, 1]} : vector<8x512xf32> to vector<8x128xf32>
    %258 = arith.negf %257 : vector<8x128xf32>
    %259 = math.exp %258 : vector<8x128xf32>
    %cst_47 = arith.constant 1.000000e+00 : f32
    %260 = vector.broadcast %cst_47 : f32 to vector<8x128xf32>
    %261 = arith.addf %260, %259 : vector<8x128xf32>
    %262 = arith.divf %260, %261 : vector<8x128xf32>
    %263 = arith.mulf %254, %208 : vector<8x128xf32>
    %264 = arith.mulf %248, %256 : vector<8x128xf32>
    %265 = arith.addf %263, %264 : vector<8x128xf32>
    %266 = math.tanh %265 : vector<8x128xf32>
    %267 = arith.mulf %262, %266 : vector<8x128xf32>
    %268 = tpu.concatenate %267, %241 in 1 : vector<8x128xf32>, vector<8x128xf32> -> vector<8x256xf32>
    %cst_48 = arith.constant dense<0.000000e+00> : vector<8x1024xf32>
    %269 = tpu.matmul %268, %3, %cst_48 {dimension_numbers = #tpu.dot_dimension_numbers<[1], [0], [0], [1], [0, 0, 1, 1], [], []>} : vector<8x256xf32>, vector<256x1024xf32>, vector<8x1024xf32> -> vector<8x1024xf32>
    %270 = vector.extract_strided_slice %269 {offsets = [0, 512], sizes = [8, 512], strides = [1, 1]} : vector<8x1024xf32> to vector<8x512xf32>
    %271 = vector.extract_strided_slice %269 {offsets = [0, 0], sizes = [8, 512], strides = [1, 1]} : vector<8x1024xf32> to vector<8x512xf32>
    %272 = vector.broadcast %4 : vector<1x512xf32> to vector<8x512xf32>
    %273 = arith.addf %271, %272 : vector<8x512xf32>
    %274 = vector.extract_strided_slice %273 {offsets = [0, 0], sizes = [8, 128], strides = [1, 1]} : vector<8x512xf32> to vector<8x128xf32>
    %275 = arith.negf %274 : vector<8x128xf32>
    %276 = math.exp %275 : vector<8x128xf32>
    %cst_49 = arith.constant 1.000000e+00 : f32
    %277 = vector.broadcast %cst_49 : f32 to vector<8x128xf32>
    %278 = arith.addf %277, %276 : vector<8x128xf32>
    %279 = arith.divf %277, %278 : vector<8x128xf32>
    %280 = vector.extract_strided_slice %273 {offsets = [0, 128], sizes = [8, 128], strides = [1, 1]} : vector<8x512xf32> to vector<8x128xf32>
    %281 = arith.negf %280 : vector<8x128xf32>
    %282 = math.exp %281 : vector<8x128xf32>
    %cst_50 = arith.constant 1.000000e+00 : f32
    %283 = vector.broadcast %cst_50 : f32 to vector<8x128xf32>
    %284 = arith.addf %283, %282 : vector<8x128xf32>
    %285 = arith.divf %283, %284 : vector<8x128xf32>
    %286 = vector.extract_strided_slice %273 {offsets = [0, 256], sizes = [8, 128], strides = [1, 1]} : vector<8x512xf32> to vector<8x128xf32>
    %287 = math.tanh %286 : vector<8x128xf32>
    %288 = vector.extract_strided_slice %273 {offsets = [0, 384], sizes = [8, 128], strides = [1, 1]} : vector<8x512xf32> to vector<8x128xf32>
    %289 = arith.negf %288 : vector<8x128xf32>
    %290 = math.exp %289 : vector<8x128xf32>
    %cst_51 = arith.constant 1.000000e+00 : f32
    %291 = vector.broadcast %cst_51 : f32 to vector<8x128xf32>
    %292 = arith.addf %291, %290 : vector<8x128xf32>
    %293 = arith.divf %291, %292 : vector<8x128xf32>
    %294 = arith.mulf %285, %239 : vector<8x128xf32>
    %295 = arith.mulf %279, %287 : vector<8x128xf32>
    %296 = arith.addf %294, %295 : vector<8x128xf32>
    %297 = math.tanh %296 : vector<8x128xf32>
    %298 = arith.mulf %293, %297 : vector<8x128xf32>
    %299 = arith.addf %9, %270 : vector<8x512xf32>
    %300 = vector.extract_strided_slice %299 {offsets = [0, 0], sizes = [8, 128], strides = [1, 1]} : vector<8x512xf32> to vector<8x128xf32>
    %301 = arith.negf %300 : vector<8x128xf32>
    %302 = math.exp %301 : vector<8x128xf32>
    %cst_52 = arith.constant 1.000000e+00 : f32
    %303 = vector.broadcast %cst_52 : f32 to vector<8x128xf32>
    %304 = arith.addf %303, %302 : vector<8x128xf32>
    %305 = arith.divf %303, %304 : vector<8x128xf32>
    %306 = vector.extract_strided_slice %299 {offsets = [0, 128], sizes = [8, 128], strides = [1, 1]} : vector<8x512xf32> to vector<8x128xf32>
    %307 = arith.negf %306 : vector<8x128xf32>
    %308 = math.exp %307 : vector<8x128xf32>
    %cst_53 = arith.constant 1.000000e+00 : f32
    %309 = vector.broadcast %cst_53 : f32 to vector<8x128xf32>
    %310 = arith.addf %309, %308 : vector<8x128xf32>
    %311 = arith.divf %309, %310 : vector<8x128xf32>
    %312 = vector.extract_strided_slice %299 {offsets = [0, 256], sizes = [8, 128], strides = [1, 1]} : vector<8x512xf32> to vector<8x128xf32>
    %313 = math.tanh %312 : vector<8x128xf32>
    %314 = vector.extract_strided_slice %299 {offsets = [0, 384], sizes = [8, 128], strides = [1, 1]} : vector<8x512xf32> to vector<8x128xf32>
    %315 = arith.negf %314 : vector<8x128xf32>
    %316 = math.exp %315 : vector<8x128xf32>
    %cst_54 = arith.constant 1.000000e+00 : f32
    %317 = vector.broadcast %cst_54 : f32 to vector<8x128xf32>
    %318 = arith.addf %317, %316 : vector<8x128xf32>
    %319 = arith.divf %317, %318 : vector<8x128xf32>
    %320 = arith.mulf %311, %265 : vector<8x128xf32>
    %321 = arith.mulf %305, %313 : vector<8x128xf32>
    %322 = arith.addf %320, %321 : vector<8x128xf32>
    %323 = math.tanh %322 : vector<8x128xf32>
    %324 = arith.mulf %319, %323 : vector<8x128xf32>
    %325 = tpu.concatenate %324, %298 in 1 : vector<8x128xf32>, vector<8x128xf32> -> vector<8x256xf32>
    %cst_55 = arith.constant dense<0.000000e+00> : vector<8x1024xf32>
    %326 = tpu.matmul %325, %3, %cst_55 {dimension_numbers = #tpu.dot_dimension_numbers<[1], [0], [0], [1], [0, 0, 1, 1], [], []>} : vector<8x256xf32>, vector<256x1024xf32>, vector<8x1024xf32> -> vector<8x1024xf32>
    %327 = vector.extract_strided_slice %326 {offsets = [0, 512], sizes = [8, 512], strides = [1, 1]} : vector<8x1024xf32> to vector<8x512xf32>
    %328 = vector.extract_strided_slice %326 {offsets = [0, 0], sizes = [8, 512], strides = [1, 1]} : vector<8x1024xf32> to vector<8x512xf32>
    %329 = vector.broadcast %4 : vector<1x512xf32> to vector<8x512xf32>
    %330 = arith.addf %328, %329 : vector<8x512xf32>
    %331 = vector.extract_strided_slice %330 {offsets = [0, 0], sizes = [8, 128], strides = [1, 1]} : vector<8x512xf32> to vector<8x128xf32>
    %332 = arith.negf %331 : vector<8x128xf32>
    %333 = math.exp %332 : vector<8x128xf32>
    %cst_56 = arith.constant 1.000000e+00 : f32
    %334 = vector.broadcast %cst_56 : f32 to vector<8x128xf32>
    %335 = arith.addf %334, %333 : vector<8x128xf32>
    %336 = arith.divf %334, %335 : vector<8x128xf32>
    %337 = vector.extract_strided_slice %330 {offsets = [0, 128], sizes = [8, 128], strides = [1, 1]} : vector<8x512xf32> to vector<8x128xf32>
    %338 = arith.negf %337 : vector<8x128xf32>
    %339 = math.exp %338 : vector<8x128xf32>
    %cst_57 = arith.constant 1.000000e+00 : f32
    %340 = vector.broadcast %cst_57 : f32 to vector<8x128xf32>
    %341 = arith.addf %340, %339 : vector<8x128xf32>
    %342 = arith.divf %340, %341 : vector<8x128xf32>
    %343 = vector.extract_strided_slice %330 {offsets = [0, 256], sizes = [8, 128], strides = [1, 1]} : vector<8x512xf32> to vector<8x128xf32>
    %344 = math.tanh %343 : vector<8x128xf32>
    %345 = vector.extract_strided_slice %330 {offsets = [0, 384], sizes = [8, 128], strides = [1, 1]} : vector<8x512xf32> to vector<8x128xf32>
    %346 = arith.negf %345 : vector<8x128xf32>
    %347 = math.exp %346 : vector<8x128xf32>
    %cst_58 = arith.constant 1.000000e+00 : f32
    %348 = vector.broadcast %cst_58 : f32 to vector<8x128xf32>
    %349 = arith.addf %348, %347 : vector<8x128xf32>
    %350 = arith.divf %348, %349 : vector<8x128xf32>
    %351 = arith.mulf %342, %296 : vector<8x128xf32>
    %352 = arith.mulf %336, %344 : vector<8x128xf32>
    %353 = arith.addf %351, %352 : vector<8x128xf32>
    %354 = math.tanh %353 : vector<8x128xf32>
    %355 = arith.mulf %350, %354 : vector<8x128xf32>
    %356 = arith.addf %9, %327 : vector<8x512xf32>
    %357 = vector.extract_strided_slice %356 {offsets = [0, 0], sizes = [8, 128], strides = [1, 1]} : vector<8x512xf32> to vector<8x128xf32>
    %358 = arith.negf %357 : vector<8x128xf32>
    %359 = math.exp %358 : vector<8x128xf32>
    %cst_59 = arith.constant 1.000000e+00 : f32
    %360 = vector.broadcast %cst_59 : f32 to vector<8x128xf32>
    %361 = arith.addf %360, %359 : vector<8x128xf32>
    %362 = arith.divf %360, %361 : vector<8x128xf32>
    %363 = vector.extract_strided_slice %356 {offsets = [0, 128], sizes = [8, 128], strides = [1, 1]} : vector<8x512xf32> to vector<8x128xf32>
    %364 = arith.negf %363 : vector<8x128xf32>
    %365 = math.exp %364 : vector<8x128xf32>
    %cst_60 = arith.constant 1.000000e+00 : f32
    %366 = vector.broadcast %cst_60 : f32 to vector<8x128xf32>
    %367 = arith.addf %366, %365 : vector<8x128xf32>
    %368 = arith.divf %366, %367 : vector<8x128xf32>
    %369 = vector.extract_strided_slice %356 {offsets = [0, 256], sizes = [8, 128], strides = [1, 1]} : vector<8x512xf32> to vector<8x128xf32>
    %370 = math.tanh %369 : vector<8x128xf32>
    %371 = vector.extract_strided_slice %356 {offsets = [0, 384], sizes = [8, 128], strides = [1, 1]} : vector<8x512xf32> to vector<8x128xf32>
    %372 = arith.negf %371 : vector<8x128xf32>
    %373 = math.exp %372 : vector<8x128xf32>
    %cst_61 = arith.constant 1.000000e+00 : f32
    %374 = vector.broadcast %cst_61 : f32 to vector<8x128xf32>
    %375 = arith.addf %374, %373 : vector<8x128xf32>
    %376 = arith.divf %374, %375 : vector<8x128xf32>
    %377 = arith.mulf %368, %322 : vector<8x128xf32>
    %378 = arith.mulf %362, %370 : vector<8x128xf32>
    %379 = arith.addf %377, %378 : vector<8x128xf32>
    %380 = math.tanh %379 : vector<8x128xf32>
    %381 = arith.mulf %376, %380 : vector<8x128xf32>
    %382 = tpu.concatenate %381, %355 in 1 : vector<8x128xf32>, vector<8x128xf32> -> vector<8x256xf32>
    %cst_62 = arith.constant dense<0.000000e+00> : vector<8x1024xf32>
    %383 = tpu.matmul %382, %3, %cst_62 {dimension_numbers = #tpu.dot_dimension_numbers<[1], [0], [0], [1], [0, 0, 1, 1], [], []>} : vector<8x256xf32>, vector<256x1024xf32>, vector<8x1024xf32> -> vector<8x1024xf32>
    %384 = vector.extract_strided_slice %383 {offsets = [0, 512], sizes = [8, 512], strides = [1, 1]} : vector<8x1024xf32> to vector<8x512xf32>
    %385 = vector.extract_strided_slice %383 {offsets = [0, 0], sizes = [8, 512], strides = [1, 1]} : vector<8x1024xf32> to vector<8x512xf32>
    %386 = vector.broadcast %4 : vector<1x512xf32> to vector<8x512xf32>
    %387 = arith.addf %385, %386 : vector<8x512xf32>
    %388 = vector.extract_strided_slice %387 {offsets = [0, 0], sizes = [8, 128], strides = [1, 1]} : vector<8x512xf32> to vector<8x128xf32>
    %389 = arith.negf %388 : vector<8x128xf32>
    %390 = math.exp %389 : vector<8x128xf32>
    %cst_63 = arith.constant 1.000000e+00 : f32
    %391 = vector.broadcast %cst_63 : f32 to vector<8x128xf32>
    %392 = arith.addf %391, %390 : vector<8x128xf32>
    %393 = arith.divf %391, %392 : vector<8x128xf32>
    %394 = vector.extract_strided_slice %387 {offsets = [0, 128], sizes = [8, 128], strides = [1, 1]} : vector<8x512xf32> to vector<8x128xf32>
    %395 = arith.negf %394 : vector<8x128xf32>
    %396 = math.exp %395 : vector<8x128xf32>
    %cst_64 = arith.constant 1.000000e+00 : f32
    %397 = vector.broadcast %cst_64 : f32 to vector<8x128xf32>
    %398 = arith.addf %397, %396 : vector<8x128xf32>
    %399 = arith.divf %397, %398 : vector<8x128xf32>
    %400 = vector.extract_strided_slice %387 {offsets = [0, 256], sizes = [8, 128], strides = [1, 1]} : vector<8x512xf32> to vector<8x128xf32>
    %401 = math.tanh %400 : vector<8x128xf32>
    %402 = vector.extract_strided_slice %387 {offsets = [0, 384], sizes = [8, 128], strides = [1, 1]} : vector<8x512xf32> to vector<8x128xf32>
    %403 = arith.negf %402 : vector<8x128xf32>
    %404 = math.exp %403 : vector<8x128xf32>
    %cst_65 = arith.constant 1.000000e+00 : f32
    %405 = vector.broadcast %cst_65 : f32 to vector<8x128xf32>
    %406 = arith.addf %405, %404 : vector<8x128xf32>
    %407 = arith.divf %405, %406 : vector<8x128xf32>
    %408 = arith.mulf %399, %353 : vector<8x128xf32>
    %409 = arith.mulf %393, %401 : vector<8x128xf32>
    %410 = arith.addf %408, %409 : vector<8x128xf32>
    %411 = math.tanh %410 : vector<8x128xf32>
    %412 = arith.mulf %407, %411 : vector<8x128xf32>
    %413 = arith.addf %9, %384 : vector<8x512xf32>
    %414 = vector.extract_strided_slice %413 {offsets = [0, 0], sizes = [8, 128], strides = [1, 1]} : vector<8x512xf32> to vector<8x128xf32>
    %415 = arith.negf %414 : vector<8x128xf32>
    %416 = math.exp %415 : vector<8x128xf32>
    %cst_66 = arith.constant 1.000000e+00 : f32
    %417 = vector.broadcast %cst_66 : f32 to vector<8x128xf32>
    %418 = arith.addf %417, %416 : vector<8x128xf32>
    %419 = arith.divf %417, %418 : vector<8x128xf32>
    %420 = vector.extract_strided_slice %413 {offsets = [0, 128], sizes = [8, 128], strides = [1, 1]} : vector<8x512xf32> to vector<8x128xf32>
    %421 = arith.negf %420 : vector<8x128xf32>
    %422 = math.exp %421 : vector<8x128xf32>
    %cst_67 = arith.constant 1.000000e+00 : f32
    %423 = vector.broadcast %cst_67 : f32 to vector<8x128xf32>
    %424 = arith.addf %423, %422 : vector<8x128xf32>
    %425 = arith.divf %423, %424 : vector<8x128xf32>
    %426 = vector.extract_strided_slice %413 {offsets = [0, 256], sizes = [8, 128], strides = [1, 1]} : vector<8x512xf32> to vector<8x128xf32>
    %427 = math.tanh %426 : vector<8x128xf32>
    %428 = vector.extract_strided_slice %413 {offsets = [0, 384], sizes = [8, 128], strides = [1, 1]} : vector<8x512xf32> to vector<8x128xf32>
    %429 = arith.negf %428 : vector<8x128xf32>
    %430 = math.exp %429 : vector<8x128xf32>
    %cst_68 = arith.constant 1.000000e+00 : f32
    %431 = vector.broadcast %cst_68 : f32 to vector<8x128xf32>
    %432 = arith.addf %431, %430 : vector<8x128xf32>
    %433 = arith.divf %431, %432 : vector<8x128xf32>
    %434 = arith.mulf %425, %379 : vector<8x128xf32>
    %435 = arith.mulf %419, %427 : vector<8x128xf32>
    %436 = arith.addf %434, %435 : vector<8x128xf32>
    %437 = math.tanh %436 : vector<8x128xf32>
    %438 = arith.mulf %433, %437 : vector<8x128xf32>
    %439 = tpu.concatenate %438, %412 in 1 : vector<8x128xf32>, vector<8x128xf32> -> vector<8x256xf32>
    %cst_69 = arith.constant dense<0.000000e+00> : vector<8x1024xf32>
    %440 = tpu.matmul %439, %3, %cst_69 {dimension_numbers = #tpu.dot_dimension_numbers<[1], [0], [0], [1], [0, 0, 1, 1], [], []>} : vector<8x256xf32>, vector<256x1024xf32>, vector<8x1024xf32> -> vector<8x1024xf32>
    %441 = vector.extract_strided_slice %440 {offsets = [0, 0], sizes = [8, 512], strides = [1, 1]} : vector<8x1024xf32> to vector<8x512xf32>
    %442 = vector.broadcast %4 : vector<1x512xf32> to vector<8x512xf32>
    %443 = arith.addf %441, %442 : vector<8x512xf32>
    %444 = vector.extract_strided_slice %443 {offsets = [0, 0], sizes = [8, 128], strides = [1, 1]} : vector<8x512xf32> to vector<8x128xf32>
    %445 = arith.negf %444 : vector<8x128xf32>
    %446 = math.exp %445 : vector<8x128xf32>
    %cst_70 = arith.constant 1.000000e+00 : f32
    %447 = vector.broadcast %cst_70 : f32 to vector<8x128xf32>
    %448 = arith.addf %447, %446 : vector<8x128xf32>
    %449 = arith.divf %447, %448 : vector<8x128xf32>
    %450 = vector.extract_strided_slice %443 {offsets = [0, 128], sizes = [8, 128], strides = [1, 1]} : vector<8x512xf32> to vector<8x128xf32>
    %451 = arith.negf %450 : vector<8x128xf32>
    %452 = math.exp %451 : vector<8x128xf32>
    %cst_71 = arith.constant 1.000000e+00 : f32
    %453 = vector.broadcast %cst_71 : f32 to vector<8x128xf32>
    %454 = arith.addf %453, %452 : vector<8x128xf32>
    %455 = arith.divf %453, %454 : vector<8x128xf32>
    %456 = vector.extract_strided_slice %443 {offsets = [0, 256], sizes = [8, 128], strides = [1, 1]} : vector<8x512xf32> to vector<8x128xf32>
    %457 = math.tanh %456 : vector<8x128xf32>
    %458 = vector.extract_strided_slice %443 {offsets = [0, 384], sizes = [8, 128], strides = [1, 1]} : vector<8x512xf32> to vector<8x128xf32>
    %459 = arith.negf %458 : vector<8x128xf32>
    %460 = math.exp %459 : vector<8x128xf32>
    %cst_72 = arith.constant 1.000000e+00 : f32
    %461 = vector.broadcast %cst_72 : f32 to vector<8x128xf32>
    %462 = arith.addf %461, %460 : vector<8x128xf32>
    %463 = arith.divf %461, %462 : vector<8x128xf32>
    %464 = arith.mulf %455, %410 : vector<8x128xf32>
    %465 = arith.mulf %449, %457 : vector<8x128xf32>
    %466 = arith.addf %464, %465 : vector<8x128xf32>
    %467 = math.tanh %466 : vector<8x128xf32>
    %468 = arith.mulf %463, %467 : vector<8x128xf32>
    %469 = tpu.concatenate %70, %127, %184, %241, %298, %355, %412, %468 in 1 : vector<8x128xf32>, vector<8x128xf32>, vector<8x128xf32>, vector<8x128xf32>, vector<8x128xf32>, vector<8x128xf32>, vector<8x128xf32>, vector<8x128xf32> -> vector<8x1024xf32>
    %cst_73 = arith.constant dense<0.000000e+00> : vector<8x8xf32>
    %470 = tpu.matmul %469, %5, %cst_73 {dimension_numbers = #tpu.dot_dimension_numbers<[1], [0], [0], [1], [0, 0, 1, 1], [], []>} : vector<8x1024xf32>, vector<1024x8xf32>, vector<8x8xf32> -> vector<8x8xf32>
    %471 = vector.broadcast %6 : vector<1x8xf32> to vector<8x8xf32>
    %472 = arith.addf %470, %471 : vector<8x8xf32>
    %473 = vector.extract_strided_slice %472 {offsets = [0, 0], sizes = [4, 8], strides = [1, 1]} : vector<8x8xf32> to vector<4x8xf32>
    %c0_74 = arith.constant 0 : index
    %c0_75 = arith.constant 0 : index
    %474 = vector.load %arg7[%c0_74, %c0_75] : memref<4x8xf32, #tpu.memory_space<vmem>>, vector<4x8xf32>
    tpu.vector_store %arg7[%c0_74, %c0_75], %473 {strides = array<i32>} : memref<4x8xf32, #tpu.memory_space<vmem>>, vector<4x8xf32>,
    return
  }
}

</mosaic_0001>

<bundles_post_ra>
// kernel: decoder_forward.1
= control target key start
LH: loop header
LB: loop body
LE: loop exit
PB: predicated region body
PF: predicated region fallthrough
CT: control target
= control target key end

     0   :  { %12 = vsyncpa [#allocation3], 0  ;;  %s8142_s0 = inlined_call_operand.vmem [shape: f32[8,64], index: 0, kind: input, shape index: {}]   ;;  %s8143_s1 = inlined_call_operand.vmem [shape: f32[64,512], index: 1, kind: input, shape index: {}]   ;;  %s8144_s2 = inlined_call_operand.vmem [shape: f32[1,512], index: 2, kind: input, shape index: {}]   ;;  %s8145_s3 = inlined_call_operand.hbm [shape: f32[256,1024], index: 3, kind: input, shape index: {}]   ;;  %s8146_s4 = inlined_call_operand.vmem [shape: f32[1,512], index: 4, kind: input, shape index: {}]   ;;  %s8147_s5 = inlined_call_operand.vmem [shape: f32[1024,8], index: 5, kind: input, shape index: {}]   ;;  %s8148_s6 = inlined_call_operand.vmem [shape: f32[1,8], index: 6, kind: input, shape index: {}]   ;;  %s8149_s7 = inlined_call_operand.hbm [shape: f32[4,8], index: 7, kind: output, shape index: {}]  }
   0x1   :  { %13 = vsyncpa [#allocation4], 0  ;;  %s6110_s24 = smov [#allocation2]   ;;  %s6062_s28 = scalar_lea.hbm %s8145_s3, 32768 }
   0x2   :  { %s25_s25 = sshll.u32 %s6110_s24, 4  ;;  %p6063_p0 = scmp.ne.s32.totalorder %s8145_s3, %s6062_s28  ;;  %s26_s25 = int_to_ptr.vmem [resolvable:$true] %s25_s25 }
   0x3   :  { %p6066_p1 = scmp.lt.u32.totalorder %s6062_s28, %s8145_s3 }
   0x5   :  { %p6068_p2 = pnand %p6066_p1, %p6063_p0 }
   0x7   :  { %6071 = shalt.err (!%p6068_p2)
}
   0x8   :  { %s6072_s10 = scalar_lea.vmem %s26_s25, 32768  ;;  %p6077_p4 = scmp.lt.s32.totalorder %s26_s25, %s26_s25 }
   0x9   :  { %p6073_p3 = scmp.ne.s32.totalorder %s26_s25, %s6072_s10  ;;  %p6078_p5 = scmp.lt.s32.totalorder %s6072_s10, %s6072_s10 }
   0xb   :  { %p6079_p6 = por %p6078_p5, %p6077_p4 }
   0xd   :  { %p6080_p7 = pnand %p6079_p6, %p6073_p3 }
   0xf   :  { %6083 = shalt.err (!%p6080_p7)
}
  0x10   :  { %s6111_s11 = smov 1024   ;;  %s6112_s12 = smov 64  }
  0x11   :  { %31 = dma.hbm_to_vmem [thread:$0]  %s8145_s3, 32768, %s26_s25, [#allocation3], %s6111_s11, %s6111_s11, %s6112_s12  }
  0x12   :  { %6106 = dma.done.wait [#allocation3], 32768  }
  0x13   :  { %6107 = vsyncadd [#allocation3], 4294934528  ;;  %v8150_v0 = vmov 0.0   ;;  %v43_v1 = vld [vmem:[%s8143_s1 + $0x8] sm:$0xff]  ;;  %v42_v3 = vld [vmem:[%s8143_s1] sm:$0xff]  ;;  %vm482_vm0 = vcmask 523264  }
  0x14   :  { %550 = vmatprep.mubr.f32.mxu0 %v8150_v0  ;;  %621 = vmatprep.mubr.f32.mxu1 %v8150_v0  ;;  %v47_v2 = vld [vmem:[%s8143_s1 + $0x28] sm:$0xff]  ;;  %v46_v5 = vld [vmem:[%s8143_s1 + $0x20] sm:$0xff]  ;;  %v45_v19 = vld [vmem:[%s8143_s1 + $0x18] sm:$0xff]  ;;  %vm3513_vm1 = vcmask 60416  }
  0x15   :  { %v3721_v4 = vpack.c.bf16 %v47_v2, %v43_v1  ;;  %v51_v6 = vld [vmem:[%s8143_s1 + $0x48] sm:$0xff]  ;;  %v3723_v8 = vpack.c.bf16 %v46_v5, %v42_v3  ;;  %v50_v10 = vld [vmem:[%s8143_s1 + $0x40] sm:$0xff]  ;;  %v49_v20 = vld [vmem:[%s8143_s1 + $0x38] sm:$0xff] }
  0x16   :  { %v55_v7 = vld [vmem:[%s8143_s1 + $0x68] sm:$0xff]  ;;  %v54_v11 = vld [vmem:[%s8143_s1 + $0x60] sm:$0xff]  ;;  %v3737_v22 = vpack.c.bf16 %v49_v20, %v45_v19  ;;  %v44_v23 = vld [vmem:[%s8143_s1 + $0x10] sm:$0xff] }
  0x17   :  { %v3725_v9 = vpack.c.bf16 %v55_v7, %v51_v6  ;;  %v59_v12 = vld [vmem:[%s8143_s1 + $0x88] sm:$0xff]  ;;  %3722 = vmatprep.subr.bf16.mxu0 %v3721_v4  ;;  %v3727_v14 = vpack.c.bf16 %v54_v11, %v50_v10  ;;  %v58_v15 = vld [vmem:[%s8143_s1 + $0x80] sm:$0xff]  ;;  %v48_v24 = vld [vmem:[%s8143_s1 + $0x30] sm:$0xff] }
  0x18   :  { %v63_v13 = vld [vmem:[%s8143_s1 + $0xa8] sm:$0xff]  ;;  %3724 = vmatpush1.bf16.msra.mxu0 %v3723_v8  ;;  %v62_v16 = vld [vmem:[%s8143_s1 + $0xa0] sm:$0xff]  ;;  %v3739_v25 = vpack.c.bf16 %v48_v24, %v44_v23  ;;  %v53_v26 = vld [vmem:[%s8143_s1 + $0x58] sm:$0xff]  ;;  %3738 = vmatprep.subr.bf16.mxu1 %v3737_v22 }
  0x19   :  { %3726 = vmatprep.subr.bf16.mxu0 %v3725_v9  ;;  %v3729_v17 = vpack.c.bf16 %v63_v13, %v59_v12  ;;  %v67_v18 = vld [vmem:[%s8143_s1 + $0xc8] sm:$0xff]  ;;  %v57_v27 = vld [vmem:[%s8143_s1 + $0x78] sm:$0xff]  ;;  %v52_v28 = vld [vmem:[%s8143_s1 + $0x50] sm:$0xff]  ;;  %v3731_v29 = vpack.c.bf16 %v62_v16, %v58_v15 }
  0x1a   :  { %v71_v21 = vld [vmem:[%s8143_s1 + $0xe8] sm:$0xff]  ;;  %v3741_v30 = vpack.c.bf16 %v57_v27, %v53_v26  ;;  %v56_v31 = vld [vmem:[%s8143_s1 + $0x70] sm:$0xff]  ;;  %v61_v32 = vld [vmem:[%s8143_s1 + $0x98] sm:$0xff]  ;;  %3740 = vmatpush1.bf16.msra.mxu1 %v3739_v25 }
  0x1b   :  { %v65_v33 = vld [vmem:[%s8143_s1 + $0xb8] sm:$0xff]  ;;  %v3733_v34 = vpack.c.bf16 %v71_v21, %v67_v18  ;;  %v66_v35 = vld [vmem:[%s8143_s1 + $0xc0] sm:$0xff]  ;;  %v3743_v37 = vpack.c.bf16 %v56_v31, %v52_v28  ;;  %v60_v39 = vld [vmem:[%s8143_s1 + $0x90] sm:$0xff] }
  0x1c   :  { %3728 = vmatpush1.bf16.msra.mxu0 %v3727_v14  ;;  %v70_v36 = vld [vmem:[%s8143_s1 + $0xe0] sm:$0xff]  ;;  %3742 = vmatprep.subr.bf16.mxu1 %v3741_v30  ;;  %v3745_v38 = vpack.c.bf16 %v65_v33, %v61_v32  ;;  %v64_v40 = vld [vmem:[%s8143_s1 + $0xb0] sm:$0xff]  ;;  %v69_v41 = vld [vmem:[%s8143_s1 + $0xd8] sm:$0xff] }
  0x1d   :  { %3730 = vmatprep.subr.bf16.mxu0 %v3729_v17  ;;  %v73_v42 = vld [vmem:[%s8143_s1 + $0xf8] sm:$0xff]  ;;  %v76_v43 = vld [vmem:[#allocation2 + $0x8] sm:$0xff]  ;;  %v3735_v45 = vpack.c.bf16 %v70_v36, %v66_v35  ;;  %v3747_v46 = vpack.c.bf16 %v64_v40, %v60_v39  ;;  %v75_v49 = vld [vmem:[#allocation2] sm:$0xff] }
  0x1e   :  { %v84_v44 = vld [vmem:[#allocation2 + $0x48] sm:$0xff]  ;;  %3744 = vmatpush1.bf16.msra.mxu1 %v3743_v37  ;;  %v83_v50 = vld [vmem:[#allocation2 + $0x40] sm:$0xff]  ;;  %v3749_v51 = vpack.c.bf16 %v73_v42, %v69_v41  ;;  %v78_v55 = vld [vmem:[#allocation2 + $0x18] sm:$0xff] }
  0x1f   :  { %v68_v47 = vld [vmem:[%s8143_s1 + $0xd0] sm:$0xff]  ;;  %v6262_v48 = vpack.c.bf16 %v84_v44, %v76_v43  ;;  %3746 = vmatprep.subr.bf16.mxu1 %v3745_v38  ;;  %v86_v56 = vld [vmem:[#allocation2 + $0x58] sm:$0xff]  ;;  %v6270_v58 = vpack.c.bf16 %v83_v50, %v75_v49  ;;  %v77_v60 = vld [vmem:[#allocation2 + $0x10] sm:$0xff] }
  0x20   :  { %3732 = vmatpush1.bf16.msra.mxu0 %v3731_v29  ;;  %v72_v52 = vld [vmem:[%s8143_s1 + $0xf0] sm:$0xff]  ;;  %v41_v57 = vld [vmem:[%s8142_s0] sm:$0xff]  ;;  %v91_v62 = vld [vmem:[#allocation2 + $0x80] sm:$0xff]  ;;  %v6275_v1 = vpack.c.bf16 %v86_v56, %v78_v55 }
  0x21   :  { %3734 = vmatprep.subr.bf16.mxu0 %v3733_v34  ;;  %8451 = vst [vmem:[#allocation8_spill] sm:$0xff] %v6262_v48  ;;  %v92_v53 = vld [vmem:[#allocation2 + $0x88] sm:$0xff]  ;;  %8452 = vst [vmem:[#allocation9_spill] sm:$0xff] %v6270_v58  ;;  %v3751_v59 = vpack.c.bf16 %v72_v52, %v68_v47  ;;  %v99_v63 = vld [vmem:[#allocation2 + $0xc0] sm:$0xff] }
  0x22   :  { %v100_v54 = vld [vmem:[#allocation2 + $0xc8] sm:$0xff]  ;;  %3748 = vmatpush1.bf16.msra.mxu1 %v3747_v46  ;;  %8454 = vst [vmem:[#allocation11_spill] sm:$0xff] %v6275_v1  ;;  %v85_v2 = vld [vmem:[#allocation2 + $0x50] sm:$0xff]  ;;  %v94_v5 = vld [vmem:[#allocation2 + $0x98] sm:$0xff]  ;;  %v6279_v7 = vpack.c.bf16 %v99_v63, %v91_v62 }
  0x23   :  { %v6273_v61 = vpack.c.bf16 %v100_v54, %v92_v53  ;;  %3750 = vmatprep.subr.bf16.mxu1 %v3749_v51  ;;  %v108_v3 = vld [vmem:[#allocation2 + $0x108] sm:$0xff]  ;;  %v102_v6 = vld [vmem:[#allocation2 + $0xd8] sm:$0xff]  ;;  %v6282_v8 = vpack.c.bf16 %v85_v2, %v77_v60  ;;  %v93_v9 = vld [vmem:[#allocation2 + $0x90] sm:$0xff] }
  0x24   :  { %3736 = vmatpush1.bf16.msra.mxu0 %v3735_v45  ;;  %v116_v4 = vld [vmem:[#allocation2 + $0x148] sm:$0xff]  ;;  %8455 = vst [vmem:[#allocation12_spill] sm:$0xff] %v6279_v7  ;;  %v107_v11 = vld [vmem:[#allocation2 + $0x100] sm:$0xff]  ;;  %v6288_v13 = vpack.c.bf16 %v102_v6, %v94_v5  ;;  %v101_v14 = vld [vmem:[#allocation2 + $0xd0] sm:$0xff] }
  0x25   :  { %3754 = vmatprep.subr.bf16.mxu0 %v6262_v48  ;;  %8453 = vst [vmem:[#allocation10_spill] sm:$0xff] %v6273_v61  ;;  %8456 = vst [vmem:[#allocation13_spill] sm:$0xff] %v6282_v8  ;;  %v6285_v10 = vpack.c.bf16 %v116_v4, %v108_v3  ;;  %v115_v12 = vld [vmem:[#allocation2 + $0x140] sm:$0xff]  ;;  %v124_v15 = vld [vmem:[#allocation2 + $0x188] sm:$0xff]  ;;  %v6295_v20 = vpack.c.bf16 %v101_v14, %v93_v9 }
  0x26   :  { %3752 = vmatpush1.bf16.msra.mxu1 %v3751_v59  ;;  %8458 = vst [vmem:[#allocation15_spill] sm:$0xff] %v6288_v13  ;;  %v132_v16 = vld [vmem:[#allocation2 + $0x1c8] sm:$0xff]  ;;  %v110_v17 = vld [vmem:[#allocation2 + $0x118] sm:$0xff]  ;;  %v6292_v19 = vpack.c.bf16 %v115_v12, %v107_v11  ;;  %v109_v21 = vld [vmem:[#allocation2 + $0x110] sm:$0xff] }
  0x27   :  { %3530 = vmatmul.mubr.msk.f32.vlgmr.msra.gmra.mrb[0].mxu0 %vm482_vm0, %v41_v57  ;;  %8457 = vst [vmem:[#allocation14_spill] sm:$0xff] %v6285_v10  ;;  %3818 = vmatprep.subr.bf16.mxu1 %v6275_v1  ;;  %v118_v18 = vld [vmem:[#allocation2 + $0x158] sm:$0xff]  ;;  %8460 = vst [vmem:[#allocation17_spill] sm:$0xff] %v6295_v20  ;;  %v6298_v22 = vpack.c.bf16 %v132_v16, %v124_v15  ;;  %v123_v23 = vld [vmem:[#allocation2 + $0x180] sm:$0xff] }
  0x28   :  { %3756 = vmatpush1.bf16.msra.mxu0 %v6270_v58  ;;  %720 = vmatprep.mubr.f32.mxu0 %v8150_v0  ;;  %8459 = vst [vmem:[#allocation16_spill] sm:$0xff] %v6292_v19  ;;  %v131_v24 = vld [vmem:[#allocation2 + $0x1c0] sm:$0xff]  ;;  %v6301_v25 = vpack.c.bf16 %v118_v18, %v110_v17  ;;  %v117_v26 = vld [vmem:[#allocation2 + $0x150] sm:$0xff]  ;;  %v140_v27 = vld [vmem:[#allocation2 + $0x208] sm:$0xff] }
  0x29   :  { %3758 = vmatprep.subr.bf16.mxu0 %v6273_v61  ;;  %3531 = vmatmul.mubr.msk.f32.vlgmr.msra.gmra.mrb[0].mxu1 %vm482_vm0, %v41_v57  ;;  %8461 = vst [vmem:[#allocation18_spill] sm:$0xff] %v6298_v22  ;;  %v148_v28 = vld [vmem:[#allocation2 + $0x248] sm:$0xff]  ;;  %v126_v29 = vld [vmem:[#allocation2 + $0x198] sm:$0xff]  ;;  %v6305_v31 = vpack.c.bf16 %v131_v24, %v123_v23  ;;  %v6308_v32 = vpack.c.bf16 %v117_v26, %v109_v21  ;;  %v139_v34 = vld [vmem:[#allocation2 + $0x200] sm:$0xff] }
  0x2a   :  { %3820 = vmatpush1.bf16.msra.mxu1 %v6282_v8  ;;  %8462 = vst [vmem:[#allocation19_spill] sm:$0xff] %v6301_v25  ;;  %791 = vmatprep.mubr.f32.mxu1 %v8150_v0  ;;  %v134_v30 = vld [vmem:[#allocation2 + $0x1d8] sm:$0xff]  ;;  %v6311_v33 = vpack.c.bf16 %v148_v28, %v140_v27  ;;  %v147_v35 = vld [vmem:[#allocation2 + $0x240] sm:$0xff]  ;;  %v125_v37 = vld [vmem:[#allocation2 + $0x190] sm:$0xff] }
  0x2b   :  { %3822 = vmatprep.subr.bf16.mxu1 %v6288_v13  ;;  %8463 = vst [vmem:[#allocation20_spill] sm:$0xff] %v6305_v31  ;;  %8464 = vst [vmem:[#allocation21_spill] sm:$0xff] %v6308_v32  ;;  %v6314_v36 = vpack.c.bf16 %v134_v30, %v126_v29  ;;  %v133_v38 = vld [vmem:[#allocation2 + $0x1d0] sm:$0xff]  ;;  %v142_v39 = vld [vmem:[#allocation2 + $0x218] sm:$0xff]  ;;  %v6317_v41 = vpack.c.bf16 %v147_v35, %v139_v34 }
  0x2c   :  { %3760 = vmatpush1.bf16.msra.mxu0 %v6279_v7  ;;  %8465 = vst [vmem:[#allocation22_spill] sm:$0xff] %v6311_v33  ;;  %v150_v40 = vld [vmem:[#allocation2 + $0x258] sm:$0xff]  ;;  %v6320_v42 = vpack.c.bf16 %v133_v38, %v125_v37  ;;  %v141_v44 = vld [vmem:[#allocation2 + $0x210] sm:$0xff]  ;;  %v156_v47 = vld [vmem:[#allocation2 + $0x288] sm:$0xff] }
  0x2d   :  { %3762 = vmatprep.subr.bf16.mxu0 %v6285_v10  ;;  %8466 = vst [vmem:[#allocation23_spill] sm:$0xff] %v6314_v36  ;;  %8467 = vst [vmem:[#allocation24_spill] sm:$0xff] %v6317_v41  ;;  %v6324_v43 = vpack.c.bf16 %v150_v40, %v142_v39  ;;  %v149_v45 = vld [vmem:[#allocation2 + $0x250] sm:$0xff]  ;;  %v164_v49 = vld [vmem:[#allocation2 + $0x2c8] sm:$0xff] }
  0x2e   :  { %3824 = vmatpush1.bf16.msra.mxu1 %v6295_v20  ;;  %8468 = vst [vmem:[#allocation25_spill] sm:$0xff] %v6320_v42  ;;  %v6328_v46 = vpack.c.bf16 %v149_v45, %v141_v44  ;;  %v158_v50 = vld [vmem:[#allocation2 + $0x298] sm:$0xff]  ;;  %v6332_v51 = vpack.c.bf16 %v164_v49, %v156_v47  ;;  %v155_v53 = vld [vmem:[#allocation2 + $0x280] sm:$0xff]  ;;  %v157_v57 = vld [vmem:[#allocation2 + $0x290] sm:$0xff] }
  0x2f   :  { %3826 = vmatprep.subr.bf16.mxu1 %v6301_v25  ;;  %8469 = vst [vmem:[#allocation26_spill] sm:$0xff] %v6324_v43  ;;  %v166_v52 = vld [vmem:[#allocation2 + $0x2d8] sm:$0xff]  ;;  %v163_v54 = vld [vmem:[#allocation2 + $0x2c0] sm:$0xff]  ;;  %v165_v59 = vld [vmem:[#allocation2 + $0x2d0] sm:$0xff] }
  0x30   :  { %3764 = vmatpush1.bf16.msra.mxu0 %v6292_v19  ;;  %8470 = vst [vmem:[#allocation27_spill] sm:$0xff] %v6328_v46  ;;  %8471 = vst [vmem:[#allocation28_spill] sm:$0xff] %v6332_v51  ;;  %v6334_v55 = vpack.c.bf16 %v166_v52, %v158_v50  ;;  %v6336_v56 = vpack.c.bf16 %v163_v54, %v155_v53  ;;  %v6339_v60 = vpack.c.bf16 %v165_v59, %v157_v57  ;;  %v172_v62 = vld [vmem:[#allocation2 + $0x308] sm:$0xff]  ;;  %v174_v2 = vld [vmem:[#allocation2 + $0x318] sm:$0xff] }
  0x31   :  { %3766 = vmatprep.subr.bf16.mxu0 %v6298_v22  ;;  %v180_v63 = vld [vmem:[#allocation2 + $0x348] sm:$0xff]  ;;  %v182_v4 = vld [vmem:[#allocation2 + $0x358] sm:$0xff]  ;;  %v171_v5 = vld [vmem:[#allocation2 + $0x300] sm:$0xff] }
  0x32   :  { %3828 = vmatpush1.bf16.msra.mxu1 %v6308_v32  ;;  %8472 = vst [vmem:[#allocation29_spill] sm:$0xff] %v6334_v55  ;;  %8473 = vst [vmem:[#allocation30_spill] sm:$0xff] %v6336_v56  ;;  %v6344_v3 = vpack.c.bf16 %v180_v63, %v172_v62  ;;  %v179_v6 = vld [vmem:[#allocation2 + $0x340] sm:$0xff]  ;;  %v6346_v9 = vpack.c.bf16 %v182_v4, %v174_v2  ;;  %v173_v12 = vld [vmem:[#allocation2 + $0x310] sm:$0xff] }
  0x33   :  { %3830 = vmatprep.subr.bf16.mxu1 %v6314_v36  ;;  %8474 = vst [vmem:[#allocation31_spill] sm:$0xff] %v6339_v60  ;;  %v6348_v11 = vpack.c.bf16 %v179_v6, %v171_v5  ;;  %v181_v14 = vld [vmem:[#allocation2 + $0x350] sm:$0xff]  ;;  %v188_v15 = vld [vmem:[#allocation2 + $0x388] sm:$0xff]  ;;  %v190_v18 = vld [vmem:[#allocation2 + $0x398] sm:$0xff] }
  0x34   :  { %3768 = vmatpush1.bf16.msra.mxu0 %v6305_v31  ;;  %8475 = vst [vmem:[#allocation32_spill] sm:$0xff] %v6344_v3  ;;  %8476 = vst [vmem:[#allocation33_spill] sm:$0xff] %v6346_v9  ;;  %v6351_v16 = vpack.c.bf16 %v181_v14, %v173_v12  ;;  %v196_v17 = vld [vmem:[#allocation2 + $0x3c8] sm:$0xff]  ;;  %v198_v21 = vld [vmem:[#allocation2 + $0x3d8] sm:$0xff] }
  0x35   :  { %3770 = vmatprep.subr.bf16.mxu0 %v6311_v33  ;;  %8477 = vst [vmem:[#allocation34_spill] sm:$0xff] %v6348_v11  ;;  %v6355_v23 = vpack.c.bf16 %v196_v17, %v188_v15  ;;  %v6357_v24 = vpack.c.bf16 %v198_v21, %v190_v18  ;;  %v187_v26 = vld [vmem:[#allocation2 + $0x380] sm:$0xff]  ;;  %v189_v28 = vld [vmem:[#allocation2 + $0x390] sm:$0xff]  ;;  %v204_v34 = vld [vmem:[#allocation2 + $0x408] sm:$0xff] }
  0x36   :  { %3832 = vmatpush1.bf16.msra.mxu1 %v6320_v42  ;;  %8478 = vst [vmem:[#allocation35_spill] sm:$0xff] %v6351_v16  ;;  %v195_v27 = vld [vmem:[#allocation2 + $0x3c0] sm:$0xff]  ;;  %v197_v30 = vld [vmem:[#allocation2 + $0x3d0] sm:$0xff]  ;;  %v212_v35 = vld [vmem:[#allocation2 + $0x448] sm:$0xff] }
  0x37   :  { %3834 = vmatprep.subr.bf16.mxu1 %v6324_v43  ;;  %8479 = vst [vmem:[#allocation36_spill] sm:$0xff] %v6355_v23  ;;  %8480 = vst [vmem:[#allocation37_spill] sm:$0xff] %v6357_v24  ;;  %v6360_v29 = vpack.c.bf16 %v195_v27, %v187_v26  ;;  %v6364_v37 = vpack.c.bf16 %v197_v30, %v189_v28  ;;  %v6366_v38 = vpack.c.bf16 %v212_v35, %v204_v34  ;;  %v206_v39 = vld [vmem:[#allocation2 + $0x418] sm:$0xff]  ;;  %v203_v44 = vld [vmem:[#allocation2 + $0x400] sm:$0xff] }
  0x38   :  { %3772 = vmatpush1.bf16.msra.mxu0 %v6317_v41  ;;  %v214_v40 = vld [vmem:[#allocation2 + $0x458] sm:$0xff]  ;;  %v211_v47 = vld [vmem:[#allocation2 + $0x440] sm:$0xff]  ;;  %v205_v49 = vld [vmem:[#allocation2 + $0x410] sm:$0xff] }
  0x39   :  { %3774 = vmatprep.subr.bf16.mxu0 %v6332_v51  ;;  %8481 = vst [vmem:[#allocation38_spill] sm:$0xff] %v6360_v29  ;;  %8482 = vst [vmem:[#allocation39_spill] sm:$0xff] %v6364_v37  ;;  %v6368_v45 = vpack.c.bf16 %v214_v40, %v206_v39  ;;  %v213_v50 = vld [vmem:[#allocation2 + $0x450] sm:$0xff]  ;;  %v6371_v52 = vpack.c.bf16 %v211_v47, %v203_v44  ;;  %v220_v53 = vld [vmem:[#allocation2 + $0x488] sm:$0xff] }
  0x3a   :  { %3836 = vmatpush1.bf16.msra.mxu1 %v6328_v46  ;;  %8483 = vst [vmem:[#allocation40_spill] sm:$0xff] %v6366_v38  ;;  %v228_v54 = vld [vmem:[#allocation2 + $0x4c8] sm:$0xff]  ;;  %v222_v57 = vld [vmem:[#allocation2 + $0x498] sm:$0xff]  ;;  %v6375_v59 = vpack.c.bf16 %v213_v50, %v205_v49  ;;  %v219_v2 = vld [vmem:[#allocation2 + $0x480] sm:$0xff] }
  0x3b   :  { %3838 = vmatprep.subr.bf16.mxu1 %v6334_v55  ;;  %8484 = vst [vmem:[#allocation41_spill] sm:$0xff] %v6368_v45  ;;  %8485 = vst [vmem:[#allocation42_spill] sm:$0xff] %v6371_v52  ;;  %v6377_v62 = vpack.c.bf16 %v228_v54, %v220_v53  ;;  %v230_v63 = vld [vmem:[#allocation2 + $0x4d8] sm:$0xff]  ;;  %v227_v4 = vld [vmem:[#allocation2 + $0x4c0] sm:$0xff] }
  0x3c   :  { %3776 = vmatpush1.bf16.msra.mxu0 %v6336_v56  ;;  %8486 = vst [vmem:[#allocation43_spill] sm:$0xff] %v6375_v59  ;;  %v6380_v5 = vpack.c.bf16 %v230_v63, %v222_v57  ;;  %v221_v6 = vld [vmem:[#allocation2 + $0x490] sm:$0xff]  ;;  %v236_v14 = vld [vmem:[#allocation2 + $0x508] sm:$0xff]  ;;  %v238_v17 = vld [vmem:[#allocation2 + $0x518] sm:$0xff]  ;;  %v6383_v21 = vpack.c.bf16 %v227_v4, %v219_v2 }
  0x3d   :  { %3778 = vmatprep.subr.bf16.mxu0 %v6344_v3  ;;  %8487 = vst [vmem:[#allocation44_spill] sm:$0xff] %v6377_v62  ;;  %v229_v12 = vld [vmem:[#allocation2 + $0x4d0] sm:$0xff]  ;;  %v244_v15 = vld [vmem:[#allocation2 + $0x548] sm:$0xff]  ;;  %v246_v18 = vld [vmem:[#allocation2 + $0x558] sm:$0xff] }
  0x3e   :  { %3840 = vmatpush1.bf16.msra.mxu1 %v6339_v60  ;;  %8488 = vst [vmem:[#allocation45_spill] sm:$0xff] %v6380_v5  ;;  %8489 = vst [vmem:[#allocation46_spill] sm:$0xff] %v6383_v21  ;;  %v6387_v26 = vpack.c.bf16 %v229_v12, %v221_v6  ;;  %v6389_v27 = vpack.c.bf16 %v244_v15, %v236_v14  ;;  %v235_v28 = vld [vmem:[#allocation2 + $0x500] sm:$0xff]  ;;  %v237_v34 = vld [vmem:[#allocation2 + $0x510] sm:$0xff]  ;;  %v6392_v35 = vpack.c.bf16 %v246_v18, %v238_v17 }
  0x3f   :  { %3842 = vmatprep.subr.bf16.mxu1 %v6346_v9  ;;  %v243_v30 = vld [vmem:[#allocation2 + $0x540] sm:$0xff]  ;;  %v245_v39 = vld [vmem:[#allocation2 + $0x550] sm:$0xff]  ;;  %v252_v40 = vld [vmem:[#allocation2 + $0x588] sm:$0xff] }
  0x40   :  { %3780 = vmatpush1.bf16.msra.mxu0 %v6348_v11  ;;  %8490 = vst [vmem:[#allocation47_spill] sm:$0xff] %v6387_v26  ;;  %8491 = vst [vmem:[#allocation48_spill] sm:$0xff] %v6389_v27  ;;  %v260_v44 = vld [vmem:[#allocation2 + $0x5c8] sm:$0xff]  ;;  %v254_v47 = vld [vmem:[#allocation2 + $0x598] sm:$0xff]  ;;  %v6395_v50 = vpack.c.bf16 %v243_v30, %v235_v28  ;;  %v6399_v53 = vpack.c.bf16 %v245_v39, %v237_v34 }
  0x41   :  { %3782 = vmatprep.subr.bf16.mxu0 %v6355_v23  ;;  %8492 = vst [vmem:[#allocation49_spill] sm:$0xff] %v6392_v35  ;;  %v262_v49 = vld [vmem:[#allocation2 + $0x5d8] sm:$0xff]  ;;  %v6401_v54 = vpack.c.bf16 %v260_v44, %v252_v40  ;;  %v251_v57 = vld [vmem:[#allocation2 + $0x580] sm:$0xff]  ;;  %v253_v2 = vld [vmem:[#allocation2 + $0x590] sm:$0xff] }
  0x42   :  { %3844 = vmatpush1.bf16.msra.mxu1 %v6351_v16  ;;  %8493 = vst [vmem:[#allocation50_spill] sm:$0xff] %v6395_v50  ;;  %8494 = vst [vmem:[#allocation51_spill] sm:$0xff] %v6399_v53  ;;  %v259_v63 = vld [vmem:[#allocation2 + $0x5c0] sm:$0xff]  ;;  %v6404_v4 = vpack.c.bf16 %v262_v49, %v254_v47  ;;  %v261_v6 = vld [vmem:[#allocation2 + $0x5d0] sm:$0xff] }
  0x43   :  { %3846 = vmatprep.subr.bf16.mxu1 %v6357_v24  ;;  %8495 = vst [vmem:[#allocation52_spill] sm:$0xff] %v6401_v54  ;;  %v268_v12 = vld [vmem:[#allocation2 + $0x608] sm:$0xff]  ;;  %v270_v15 = vld [vmem:[#allocation2 + $0x618] sm:$0xff]  ;;  %v6407_v18 = vpack.c.bf16 %v259_v63, %v251_v57  ;;  %v6411_v28 = vpack.c.bf16 %v261_v6, %v253_v2  ;;  %v267_v34 = vld [vmem:[#allocation2 + $0x600] sm:$0xff] }
  0x44   :  { %3784 = vmatpush1.bf16.msra.mxu0 %v6360_v29  ;;  %8496 = vst [vmem:[#allocation53_spill] sm:$0xff] %v6404_v4  ;;  %v276_v14 = vld [vmem:[#allocation2 + $0x648] sm:$0xff]  ;;  %v278_v17 = vld [vmem:[#allocation2 + $0x658] sm:$0xff]  ;;  %v275_v39 = vld [vmem:[#allocation2 + $0x640] sm:$0xff] }
  0x45   :  { %3786 = vmatprep.subr.bf16.mxu0 %v6366_v38  ;;  %8497 = vst [vmem:[#allocation54_spill] sm:$0xff] %v6407_v18  ;;  %8498 = vst [vmem:[#allocation55_spill] sm:$0xff] %v6411_v28  ;;  %v6413_v30 = vpack.c.bf16 %v276_v14, %v268_v12  ;;  %v269_v40 = vld [vmem:[#allocation2 + $0x610] sm:$0xff]  ;;  %v6416_v44 = vpack.c.bf16 %v278_v17, %v270_v15  ;;  %v284_v49 = vld [vmem:[#allocation2 + $0x688] sm:$0xff] }
  0x46   :  { %3848 = vmatpush1.bf16.msra.mxu1 %v6364_v37  ;;  %v277_v47 = vld [vmem:[#allocation2 + $0x650] sm:$0xff]  ;;  %v292_v0 = vld [vmem:[#allocation2 + $0x6c8] sm:$0xff]  ;;  %v286_v57 = vld [vmem:[#allocation2 + $0x698] sm:$0xff] }
  0x47   :  { %3850 = vmatprep.subr.bf16.mxu1 %v6368_v45  ;;  %8499 = vst [vmem:[#allocation56_spill] sm:$0xff] %v6413_v30  ;;  %8500 = vst [vmem:[#allocation57_spill] sm:$0xff] %v6416_v44  ;;  %v294_v63 = vld [vmem:[#allocation2 + $0x6d8] sm:$0xff]  ;;  %v6423_v2 = vpack.c.bf16 %v277_v47, %v269_v40  ;;  %v6425_v6 = vpack.c.bf16 %v292_v0, %v284_v49  ;;  %v283_v12 = vld [vmem:[#allocation2 + $0x680] sm:$0xff] }
  0x48   :  { %3788 = vmatpush1.bf16.msra.mxu0 %v6371_v52  ;;  %v291_v14 = vld [vmem:[#allocation2 + $0x6c0] sm:$0xff]  ;;  %v285_v15 = vld [vmem:[#allocation2 + $0x690] sm:$0xff]  ;;  %v6428_v17 = vpack.c.bf16 %v294_v63, %v286_v57 }
  0x49   :  { %3790 = vmatprep.subr.bf16.mxu0 %v6377_v62  ;;  %8502 = vst [vmem:[#allocation59_spill] sm:$0xff] %v6423_v2  ;;  %8503 = vst [vmem:[#allocation60_spill] sm:$0xff] %v6425_v6  ;;  %v299_v47 = vld [vmem:[#allocation2 + $0x700] sm:$0xff]  ;;  %v301_v57 = vld [vmem:[#allocation2 + $0x710] sm:$0xff] }
  0x4a   :  { %3852 = vmatpush1.bf16.msra.mxu1 %v6375_v59  ;;  %8504 = vst [vmem:[#allocation61_spill] sm:$0xff] %v6428_v17  ;;  %v307_v49 = vld [vmem:[#allocation2 + $0x740] sm:$0xff] }
  0x4b   :  { %3854 = vmatprep.subr.bf16.mxu1 %v6380_v5 }
  0x4c   :  { %3792 = vmatpush1.bf16.msra.mxu0 %v6383_v21 }
  0x4d   :  { %3794 = vmatprep.subr.bf16.mxu0 %v6389_v27 }
  0x4e   :  { %3856 = vmatpush1.bf16.msra.mxu1 %v6387_v26 }
  0x4f   :  { %3858 = vmatprep.subr.bf16.mxu1 %v6392_v35  ;;  %v122_v35 = vld [vmem:[#allocation2 + $0x178] sm:$0xff] }
  0x50   :  { %3796 = vmatpush1.bf16.msra.mxu0 %v6395_v50  ;;  %v114_v50 = vld [vmem:[#allocation2 + $0x138] sm:$0xff] }
  0x51   :  { %3798 = vmatprep.subr.bf16.mxu0 %v6401_v54  ;;  %v300_v54 = vld [vmem:[#allocation2 + $0x708] sm:$0xff] }
  0x52   :  { %3860 = vmatpush1.bf16.msra.mxu1 %v6399_v53  ;;  %v6419_v53 = vpack.c.bf16 %v275_v39, %v267_v34  ;;  %v302_v34 = vld [vmem:[#allocation2 + $0x718] sm:$0xff] }
  0x53   :  { %3862 = vmatprep.subr.bf16.mxu1 %v6404_v4  ;;  %v293_v4 = vld [vmem:[#allocation2 + $0x6d0] sm:$0xff]  ;;  %v310_v39 = vld [vmem:[#allocation2 + $0x758] sm:$0xff] }
  0x54   :  { %3800 = vmatpush1.bf16.msra.mxu0 %v6407_v18  ;;  %8501 = vst [vmem:[#allocation58_spill] sm:$0xff] %v6419_v53  ;;  %v308_v18 = vld [vmem:[#allocation2 + $0x748] sm:$0xff]  ;;  %v6435_v0 = vpack.c.bf16 %v293_v4, %v285_v15  ;;  %v6440_v63 = vpack.c.bf16 %v310_v39, %v302_v34  ;;  %v323_v15 = vld [vmem:[#allocation2 + $0x7c0] sm:$0xff]  ;;  %v317_v34 = vld [vmem:[#allocation2 + $0x790] sm:$0xff] }
  0x55   :  { %3802 = vmatprep.subr.bf16.mxu0 %v6413_v30  ;;  %v6437_v40 = vpack.c.bf16 %v308_v18, %v300_v54  ;;  %v316_v30 = vld [vmem:[#allocation2 + $0x788] sm:$0xff]  ;;  %v315_v18 = vld [vmem:[#allocation2 + $0x780] sm:$0xff] }
  0x56   :  { %3864 = vmatpush1.bf16.msra.mxu1 %v6411_v28  ;;  %v6431_v28 = vpack.c.bf16 %v291_v14, %v283_v12  ;;  %8506 = vst [vmem:[#allocation63_spill] sm:$0xff] %v6435_v0  ;;  %8508 = vst [vmem:[#allocation65_spill] sm:$0xff] %v6440_v63  ;;  %v318_v12 = vld [vmem:[#allocation2 + $0x798] sm:$0xff] }
  0x57   :  { %3866 = vmatprep.subr.bf16.mxu1 %v6416_v44  ;;  %8507 = vst [vmem:[#allocation64_spill] sm:$0xff] %v6437_v40  ;;  %v309_v44 = vld [vmem:[#allocation2 + $0x750] sm:$0xff]  ;;  %v326_v14 = vld [vmem:[#allocation2 + $0x7d8] sm:$0xff] }
  0x58   :  { %3804 = vmatpush1.bf16.msra.mxu0 %v6419_v53  ;;  %8505 = vst [vmem:[#allocation62_spill] sm:$0xff] %v6431_v28  ;;  %v324_v53 = vld [vmem:[#allocation2 + $0x7c8] sm:$0xff]  ;;  %v6447_v54 = vpack.c.bf16 %v309_v44, %v301_v57  ;;  %v6452_v39 = vpack.c.bf16 %v326_v14, %v318_v12  ;;  %v462_v57 = vlaneseq }
  0x59   :  { %3806 = vmatprep.subr.bf16.mxu0 %v6425_v6  ;;  %v6449_v4 = vpack.c.bf16 %v324_v53, %v316_v30  ;;  %v80_v6 = vld [vmem:[#allocation2 + $0x28] sm:$0xff] }
  0x5a   :  { %3868 = vmatpush1.bf16.msra.mxu1 %v6423_v2  ;;  %v6443_v2 = vpack.c.bf16 %v307_v49, %v299_v47  ;;  %8510 = vst [vmem:[#allocation67_spill] sm:$0xff] %v6447_v54  ;;  %8512 = vst [vmem:[#allocation69_spill] sm:$0xff] %v6452_v39  ;;  %v82_v47 = vld [vmem:[#allocation2 + $0x38] sm:$0xff]  ;;  %v6470_v12 = vshrl.u32 %v462_v57, 7 }
  0x5b   :  { %3870 = vmatprep.subr.bf16.mxu1 %v6428_v17  ;;  %8511 = vst [vmem:[#allocation68_spill] sm:$0xff] %v6449_v4  ;;  %v325_v17 = vld [vmem:[#allocation2 + $0x7d0] sm:$0xff]  ;;  %v90_v49 = vld [vmem:[#allocation2 + $0x78] sm:$0xff] }
  0x5c   :  { %3808 = vmatpush1.bf16.msra.mxu0 %v6431_v28  ;;  %8509 = vst [vmem:[#allocation66_spill] sm:$0xff] %v6443_v2  ;;  %v88_v28 = vld [vmem:[#allocation2 + $0x68] sm:$0xff]  ;;  %v6459_v53 = vpack.c.bf16 %v325_v17, %v317_v34  ;;  %v6464_v44 = vpack.c.bf16 %v90_v49, %v82_v47  ;;  %8517 = vst [vmem:[#allocation74_spill] sm:$0xff] %v6470_v12  ;;  %v8184_v17 = vsub.s32 0, %v6470_v12 }
  0x5d   :  { %3810 = vmatprep.subr.bf16.mxu0 %v6437_v40  ;;  %v6461_v30 = vpack.c.bf16 %v88_v28, %v80_v6  ;;  %v74_v28 = vld [vmem:[%s8144_s2] sm:$0xf]  ;;  %v8187_v6 = vsub.s32 1, %v6470_v12  ;;  %v120_v40 = vld [vmem:[#allocation2 + $0x168] sm:$0xff] }
  0x5e   :  { %3872 = vmatpush1.bf16.msra.mxu1 %v6435_v0  ;;  %v6455_v0 = vpack.c.bf16 %v323_v15, %v315_v18  ;;  %8514 = vst [vmem:[#allocation71_spill] sm:$0xff] %v6459_v53  ;;  %8516 = vst [vmem:[#allocation73_spill] sm:$0xff] %v6464_v44  ;;  %v465_v14 = vrot.slane %v74_v28, %v8184_v17  ;;  %v8190_v15 = vsub.s32 3, %v6470_v12 }
  0x5f   :  { %3874 = vmatprep.subr.bf16.mxu1 %v6440_v63  ;;  %8515 = vst [vmem:[#allocation72_spill] sm:$0xff] %v6461_v30  ;;  %v469_v18 = vrot.slane %v74_v28, %v8187_v6  ;;  %v112_v63 = vld [vmem:[#allocation2 + $0x128] sm:$0xff] }
  0x60   :  { %3812 = vmatpush1.bf16.msra.mxu0 %v6443_v2  ;;  %8513 = vst [vmem:[#allocation70_spill] sm:$0xff] %v6455_v0 }
  0x61   :  { %3814 = vmatprep.subr.bf16.mxu0 %v6449_v4 }
  0x62   :  { %3876 = vmatpush1.bf16.msra.mxu1 %v6447_v54 }
  0x63   :  { %3878 = vmatprep.subr.bf16.mxu1 %v6452_v39 }
  0x64   :  { %3816 = vmatpush1.bf16.msra.mxu0 %v6455_v0 }
  0x65   :  { %3882 = vmatprep.subr.bf16.mxu0 %v6461_v30  ;;  %v477_v30 = vrot.slane %v74_v28, %v8190_v15 }
  0x66   :  { %3880 = vmatpush1.bf16.msra.mxu1 %v6459_v53  ;;  %v8199_v53 = vsub.s32 2, %v6470_v12 }
  0x67   :  { %3946 = vmatprep.subr.bf16.mxu1 %v6464_v44 }
  0xfa   :  { %v552_v34 = vpop.f32.mrb[0].mxu0 }
  0xfb   :  { %v6482_v47 = vadd.f32 %v552_v34, %v465_v14  ;;  %v554_v49 = vpop.f32.mrb[1].mxu0  ;;  %v473_v14 = vrot.slane %v74_v28, %v8199_v53 }
  0xfc   :  { %v6484_v57 = vadd.f32 %v554_v49, %v469_v18  ;;  %v623_v0 = vpop.f32.mrb[0].mxu1 }
  0xfd   :  { %8518 = vst [vmem:[#allocation75_spill] sm:$0xff] %v6482_v47  ;;  %v3532_v44 = vmul.f32 -1.442695, %v6482_v47  ;;  %v625_v6 = vpop.f32.mrb[1].mxu1  ;;  %v6496_v34 = vadd.f32 %v623_v0, %v473_v14  ;;  %v79_v0 = vld [vmem:[#allocation2 + $0x20] sm:$0xff] }
  0xfe   :  { %8519 = vst [vmem:[#allocation76_spill] sm:$0xff] %v6484_v57  ;;  %v3533_v17 = vmul.f32 -1.442695, %v6484_v57  ;;  %v6491_v39 = vadd.f32 %v625_v6, %v477_v30  ;;  %v87_v14 = vld [vmem:[#allocation2 + $0x60] sm:$0xff] }
  0xff   :  { %5806 = vpow2.f32 %v3532_v44  ;;  %8521 = vst [vmem:[#allocation78_spill] sm:$0xff] %v6496_v34  ;;  %v6502_v2 = vpack.c.bf16 %v87_v14, %v79_v0  ;;  %v119_v0 = vld [vmem:[#allocation2 + $0x160] sm:$0xff]  ;;  %v6522_v14 = vpack.c.bf16 %v120_v40, %v112_v63 }
 0x100   :  { %5808 = vpow2.f32 %v3533_v17  ;;  %8520 = vst [vmem:[#allocation77_spill] sm:$0xff] %v6491_v39  ;;  %v3534_v18 = vmul.f32 -1.442695, %v6491_v39  ;;  %v106_v39 = vld [vmem:[#allocation2 + $0xf8] sm:$0xff] }
 0x101   :  { %8523 = vst [vmem:[#allocation80_spill] sm:$0xff] %v6502_v2  ;;  %8529 = vst [vmem:[#allocation86_spill] sm:$0xff] %v6522_v14 }
 0x102   :  { %5810 = vpow2.f32 %v3534_v18  ;;  %v81_v18 = vld [vmem:[#allocation2 + $0x30] sm:$0xff] }
 0x103   :  { %5812 = vtanh.f32 %v6496_v34  ;;  %v89_v34 = vld [vmem:[#allocation2 + $0x70] sm:$0xff] }
 0x109   :  { %v5807_v49 = vpop.eup %5806 }
 0x10a   :  { %v5809_v15 = vpop.eup %5808  ;;  %v635_v47 = vadd.f32 1.0, %v5807_v49  ;;  %v96_v49 = vld [vmem:[#allocation2 + $0xa8] sm:$0xff] }
 0x10b   :  { %v641_v57 = vadd.f32 1.0, %v5809_v15 }
 0x10c   :  { %5814 = vrcp.f32 %v635_v47  ;;  %v5811_v44 = vpop.eup %5810  ;;  %v104_v47 = vld [vmem:[#allocation2 + $0xe8] sm:$0xff] }
 0x10d   :  { %5816 = vrcp.f32 %v641_v57  ;;  %v5813_v17 = vpop.eup %5812  ;;  %v648_v6 = vadd.f32 1.0, %v5811_v44  ;;  %v98_v57 = vld [vmem:[#allocation2 + $0xb8] sm:$0xff]  ;;  %v6504_v44 = vpack.c.bf16 %v89_v34, %v81_v18  ;;  %v6524_v18 = vpack.c.bf16 %v122_v35, %v114_v50  ;;  %v127_v35 = vld [vmem:[#allocation2 + $0x1a0] sm:$0xff] }
 0x10e   :  { %v135_v50 = vld [vmem:[#allocation2 + $0x1e0] sm:$0xff] }
 0x10f   :  { %5818 = vrcp.f32 %v648_v6  ;;  %8524 = vst [vmem:[#allocation81_spill] sm:$0xff] %v6504_v44  ;;  %v6510_v6 = vpack.c.bf16 %v106_v39, %v98_v57  ;;  %v111_v39 = vld [vmem:[#allocation2 + $0x120] sm:$0xff]  ;;  %8530 = vst [vmem:[#allocation87_spill] sm:$0xff] %v6524_v18  ;;  %v136_v57 = vld [vmem:[#allocation2 + $0x1e8] sm:$0xff] }
 0x111   :  { %8526 = vst [vmem:[#allocation83_spill] sm:$0xff] %v6510_v6 }
 0x116   :  { %v5815_v30 = vpop.eup %5814 }
 0x117   :  { %v5817_v4 = vpop.eup %5816  ;;  %v652_v12 = vmul.f32 %v5815_v30, %v5813_v17  ;;  %v103_v17 = vld [vmem:[#allocation2 + $0xe0] sm:$0xff]  ;;  %v6508_v30 = vpack.c.bf16 %v104_v47, %v96_v49  ;;  %v113_v49 = vld [vmem:[#allocation2 + $0x130] sm:$0xff]  ;;  %v128_v47 = vld [vmem:[#allocation2 + $0x1a8] sm:$0xff] }
 0x118   :  { %v651_v28 = vmul.f32 0.0, %v5817_v4  ;;  %v95_v4 = vld [vmem:[#allocation2 + $0xa0] sm:$0xff]  ;;  %v6536_v63 = vpack.c.bf16 %v136_v57, %v128_v47  ;;  %v145_v47 = vld [vmem:[#allocation2 + $0x230] sm:$0xff] }
 0x119   :  { %v5819_v15 = vpop.eup %5818  ;;  %8525 = vst [vmem:[#allocation82_spill] sm:$0xff] %v6508_v30  ;;  %v153_v57 = vld [vmem:[#allocation2 + $0x270] sm:$0xff] }
 0x11a   :  { %v6499_v53 = vadd.f32 %v652_v12, %v651_v28  ;;  %v97_v28 = vld [vmem:[#allocation2 + $0xb0] sm:$0xff]  ;;  %8534 = vst [vmem:[#allocation90_spill] sm:$0xff] %v6536_v63 }
 0x11c   :  { %8522 = vst [vmem:[#allocation79_spill] sm:$0xff] %v6499_v53  ;;  %5820 = vtanh.f32 %v6499_v53  ;;  %v105_v53 = vld [vmem:[#allocation2 + $0xf0] sm:$0xff] }
 0x11d   :  { %v6518_v34 = vpack.c.bf16 %v105_v53, %v97_v28  ;;  %v6530_v53 = vpack.c.bf16 %v119_v0, %v111_v39  ;;  %v129_v28 = vld [vmem:[#allocation2 + $0x1b0] sm:$0xff]  ;;  %v6542_v39 = vpack.c.bf16 %v135_v50, %v127_v35  ;;  %v6556_v50 = vpack.c.bf16 %v153_v57, %v145_v47  ;;  %v175_v47 = vld [vmem:[#allocation2 + $0x320] sm:$0xff] }
 0x11e   :  { %v183_v57 = vld [vmem:[#allocation2 + $0x360] sm:$0xff] }
 0x11f   :  { %8528 = vst [vmem:[#allocation85_spill] sm:$0xff] %v6518_v34  ;;  %8532 = vst [vmem:[#allocation88_spill] sm:$0xff] %v6530_v53 }
 0x120   :  { %8536 = vst [vmem:[#allocation92_spill] sm:$0xff] %v6542_v39  ;;  %8541 = vst [vmem:[#allocation97_spill] sm:$0xff] %v6556_v50 }
 0x126   :  { %v5821_v54 = vpop.eup %5820 }
 0x127   :  { %v6506_v12 = vmul.f32 %v5821_v54, %v5819_v15  ;;  %v6516_v54 = vpack.c.bf16 %v103_v17, %v95_v4  ;;  %v121_v15 = vld [vmem:[#allocation2 + $0x170] sm:$0xff]  ;;  %v8531_v4 = vmov 0.0  }
 0x128   :  { %v6532_v40 = vpack.c.bf16 %v121_v15, %v113_v49  ;;  %v143_v49 = vld [vmem:[#allocation2 + $0x220] sm:$0xff] }
 0x129   :  { %721 = vmatmul.mubr.f32.vlgmr.msra.gmra.mrb[2].mxu0 %v6506_v12  ;;  %792 = vmatmul.mubr.f32.vlgmr.msra.gmra.mrb[2].mxu1 %v6506_v12  ;;  %8527 = vst [vmem:[#allocation84_spill] sm:$0xff] %v6516_v54  ;;  %v151_v15 = vld [vmem:[#allocation2 + $0x260] sm:$0xff] }
 0x12a   :  { %3884 = vmatpush1.bf16.msra.mxu0 %v6502_v2  ;;  %3948 = vmatpush1.bf16.msra.mxu1 %v6504_v44  ;;  %v130_v2 = vld [vmem:[#allocation2 + $0x1b8] sm:$0xff]  ;;  %8533 = vst [vmem:[#allocation89_spill] sm:$0xff] %v6532_v40  ;;  %v6554_v35 = vpack.c.bf16 %v151_v15, %v143_v49 }
 0x12b   :  { %3886 = vmatprep.subr.bf16.mxu0 %v6508_v30  ;;  %3950 = vmatprep.subr.bf16.mxu1 %v6510_v6  ;;  %v138_v44 = vld [vmem:[#allocation2 + $0x1f8] sm:$0xff]  ;;  %v144_v6 = vld [vmem:[#allocation2 + $0x228] sm:$0xff] }
 0x12c   :  { %862 = vmatprep.mubr.f32.mxu0 %v8531_v4  ;;  %933 = vmatprep.mubr.f32.mxu1 %v8531_v4  ;;  %v6538_v17 = vpack.c.bf16 %v138_v44, %v130_v2  ;;  %v137_v4 = vld [vmem:[#allocation2 + $0x1f0] sm:$0xff]  ;;  %v146_v30 = vld [vmem:[#allocation2 + $0x238] sm:$0xff]  ;;  %8540 = vst [vmem:[#allocation96_spill] sm:$0xff] %v6554_v35 }
 0x12d   :  { %v6544_v0 = vpack.c.bf16 %v137_v4, %v129_v28  ;;  %v159_v28 = vld [vmem:[#allocation2 + $0x2a0] sm:$0xff] }
 0x12e   :  { %3888 = vmatpush1.bf16.msra.mxu0 %v6516_v54  ;;  %3952 = vmatpush1.bf16.msra.mxu1 %v6518_v34  ;;  %8535 = vst [vmem:[#allocation91_spill] sm:$0xff] %v6538_v17  ;;  %v152_v54 = vld [vmem:[#allocation2 + $0x268] sm:$0xff]  ;;  %v154_v34 = vld [vmem:[#allocation2 + $0x278] sm:$0xff]  ;;  %v167_v4 = vld [vmem:[#allocation2 + $0x2e0] sm:$0xff] }
 0x12f   :  { %3890 = vmatprep.subr.bf16.mxu0 %v6522_v14  ;;  %3954 = vmatprep.subr.bf16.mxu1 %v6524_v18  ;;  %8537 = vst [vmem:[#allocation93_spill] sm:$0xff] %v6544_v0  ;;  %v6548_v2 = vpack.c.bf16 %v152_v54, %v144_v6  ;;  %v6550_v44 = vpack.c.bf16 %v154_v34, %v146_v30  ;;  %v160_v18 = vld [vmem:[#allocation2 + $0x2a8] sm:$0xff]  ;;  %v162_v14 = vld [vmem:[#allocation2 + $0x2b8] sm:$0xff]  ;;  %v161_v54 = vld [vmem:[#allocation2 + $0x2b0] sm:$0xff] }
 0x130   :  { %v169_v34 = vld [vmem:[#allocation2 + $0x2f0] sm:$0xff]  ;;  %v6566_v49 = vpack.c.bf16 %v167_v4, %v159_v28  ;;  %v6578_v28 = vpack.c.bf16 %v183_v57, %v175_v47 }
 0x131   :  { %8538 = vst [vmem:[#allocation94_spill] sm:$0xff] %v6548_v2  ;;  %8539 = vst [vmem:[#allocation95_spill] sm:$0xff] %v6550_v44  ;;  %v6568_v15 = vpack.c.bf16 %v169_v34, %v161_v54  ;;  %v191_v54 = vld [vmem:[#allocation2 + $0x3a0] sm:$0xff] }
 0x132   :  { %3892 = vmatpush1.bf16.msra.mxu0 %v6530_v53  ;;  %3956 = vmatpush1.bf16.msra.mxu1 %v6532_v40  ;;  %v168_v53 = vld [vmem:[#allocation2 + $0x2e8] sm:$0xff]  ;;  %v170_v40 = vld [vmem:[#allocation2 + $0x2f8] sm:$0xff]  ;;  %8544 = vst [vmem:[#allocation100_spill] sm:$0xff] %v6566_v49  ;;  %8548 = vst [vmem:[#allocation104_spill] sm:$0xff] %v6578_v28 }
 0x133   :  { %3894 = vmatprep.subr.bf16.mxu0 %v6536_v63  ;;  %3958 = vmatprep.subr.bf16.mxu1 %v6538_v17  ;;  %v6560_v30 = vpack.c.bf16 %v168_v53, %v160_v18  ;;  %v6562_v6 = vpack.c.bf16 %v170_v40, %v162_v14  ;;  %v176_v17 = vld [vmem:[#allocation2 + $0x328] sm:$0xff]  ;;  %v178_v63 = vld [vmem:[#allocation2 + $0x338] sm:$0xff]  ;;  %8545 = vst [vmem:[#allocation101_spill] sm:$0xff] %v6568_v15  ;;  %v177_v53 = vld [vmem:[#allocation2 + $0x330] sm:$0xff] }
 0x134   :  { %v185_v40 = vld [vmem:[#allocation2 + $0x370] sm:$0xff]  ;;  %v199_v34 = vld [vmem:[#allocation2 + $0x3e0] sm:$0xff] }
 0x135   :  { %8542 = vst [vmem:[#allocation98_spill] sm:$0xff] %v6560_v30  ;;  %8543 = vst [vmem:[#allocation99_spill] sm:$0xff] %v6562_v6  ;;  %v6580_v4 = vpack.c.bf16 %v185_v40, %v177_v53  ;;  %v6590_v47 = vpack.c.bf16 %v199_v34, %v191_v54  ;;  %v207_v53 = vld [vmem:[#allocation2 + $0x420] sm:$0xff] }
 0x136   :  { %3896 = vmatpush1.bf16.msra.mxu0 %v6542_v39  ;;  %3960 = vmatpush1.bf16.msra.mxu1 %v6544_v0  ;;  %v184_v39 = vld [vmem:[#allocation2 + $0x368] sm:$0xff]  ;;  %v186_v0 = vld [vmem:[#allocation2 + $0x378] sm:$0xff]  ;;  %v215_v40 = vld [vmem:[#allocation2 + $0x460] sm:$0xff] }
 0x137   :  { %3898 = vmatprep.subr.bf16.mxu0 %v6548_v2  ;;  %3962 = vmatprep.subr.bf16.mxu1 %v6550_v44  ;;  %v6572_v14 = vpack.c.bf16 %v184_v39, %v176_v17  ;;  %v6574_v18 = vpack.c.bf16 %v186_v0, %v178_v63  ;;  %v192_v44 = vld [vmem:[#allocation2 + $0x3a8] sm:$0xff]  ;;  %v194_v2 = vld [vmem:[#allocation2 + $0x3b8] sm:$0xff]  ;;  %8549 = vst [vmem:[#allocation105_spill] sm:$0xff] %v6580_v4  ;;  %v193_v39 = vld [vmem:[#allocation2 + $0x3b0] sm:$0xff] }
 0x138   :  { %v201_v0 = vld [vmem:[#allocation2 + $0x3f0] sm:$0xff]  ;;  %8552 = vst [vmem:[#allocation108_spill] sm:$0xff] %v6590_v47  ;;  %v6602_v54 = vpack.c.bf16 %v215_v40, %v207_v53 }
 0x139   :  { %8546 = vst [vmem:[#allocation102_spill] sm:$0xff] %v6572_v14  ;;  %8547 = vst [vmem:[#allocation103_spill] sm:$0xff] %v6574_v18  ;;  %v6592_v57 = vpack.c.bf16 %v201_v0, %v193_v39  ;;  %v223_v39 = vld [vmem:[#allocation2 + $0x4a0] sm:$0xff] }
 0x13a   :  { %3900 = vmatpush1.bf16.msra.mxu0 %v6554_v35  ;;  %3964 = vmatpush1.bf16.msra.mxu1 %v6556_v50  ;;  %v200_v35 = vld [vmem:[#allocation2 + $0x3e8] sm:$0xff]  ;;  %v202_v50 = vld [vmem:[#allocation2 + $0x3f8] sm:$0xff]  ;;  %8556 = vst [vmem:[#allocation112_spill] sm:$0xff] %v6602_v54  ;;  %v231_v0 = vld [vmem:[#allocation2 + $0x4e0] sm:$0xff] }
 0x13b   :  { %3902 = vmatprep.subr.bf16.mxu0 %v6560_v30  ;;  %3966 = vmatprep.subr.bf16.mxu1 %v6562_v6  ;;  %v6584_v63 = vpack.c.bf16 %v200_v35, %v192_v44  ;;  %v6586_v17 = vpack.c.bf16 %v202_v50, %v194_v2  ;;  %v208_v6 = vld [vmem:[#allocation2 + $0x428] sm:$0xff]  ;;  %v210_v30 = vld [vmem:[#allocation2 + $0x438] sm:$0xff]  ;;  %8553 = vst [vmem:[#allocation109_spill] sm:$0xff] %v6592_v57  ;;  %v209_v35 = vld [vmem:[#allocation2 + $0x430] sm:$0xff] }
 0x13c   :  { %v217_v50 = vld [vmem:[#allocation2 + $0x470] sm:$0xff]  ;;  %v6614_v53 = vpack.c.bf16 %v231_v0, %v223_v39 }
 0x13d   :  { %8550 = vst [vmem:[#allocation106_spill] sm:$0xff] %v6584_v63  ;;  %8551 = vst [vmem:[#allocation107_spill] sm:$0xff] %v6586_v17  ;;  %v6604_v34 = vpack.c.bf16 %v217_v50, %v209_v35  ;;  %v239_v35 = vld [vmem:[#allocation2 + $0x520] sm:$0xff] }
 0x13e   :  { %3904 = vmatpush1.bf16.msra.mxu0 %v6566_v49  ;;  %3968 = vmatpush1.bf16.msra.mxu1 %v6568_v15  ;;  %v216_v49 = vld [vmem:[#allocation2 + $0x468] sm:$0xff]  ;;  %v218_v15 = vld [vmem:[#allocation2 + $0x478] sm:$0xff]  ;;  %8560 = vst [vmem:[#allocation116_spill] sm:$0xff] %v6614_v53  ;;  %v247_v50 = vld [vmem:[#allocation2 + $0x560] sm:$0xff] }
 0x13f   :  { %3906 = vmatprep.subr.bf16.mxu0 %v6572_v14  ;;  %3970 = vmatprep.subr.bf16.mxu1 %v6574_v18  ;;  %v6596_v2 = vpack.c.bf16 %v216_v49, %v208_v6  ;;  %v6598_v44 = vpack.c.bf16 %v218_v15, %v210_v30  ;;  %v224_v18 = vld [vmem:[#allocation2 + $0x4a8] sm:$0xff]  ;;  %v226_v14 = vld [vmem:[#allocation2 + $0x4b8] sm:$0xff]  ;;  %8557 = vst [vmem:[#allocation113_spill] sm:$0xff] %v6604_v34  ;;  %v225_v49 = vld [vmem:[#allocation2 + $0x4b0] sm:$0xff] }
 0x140   :  { %v233_v15 = vld [vmem:[#allocation2 + $0x4f0] sm:$0xff]  ;;  %v6626_v39 = vpack.c.bf16 %v247_v50, %v239_v35 }
 0x141   :  { %8554 = vst [vmem:[#allocation110_spill] sm:$0xff] %v6596_v2  ;;  %8555 = vst [vmem:[#allocation111_spill] sm:$0xff] %v6598_v44  ;;  %v6616_v40 = vpack.c.bf16 %v233_v15, %v225_v49  ;;  %v255_v49 = vld [vmem:[#allocation2 + $0x5a0] sm:$0xff] }
 0x142   :  { %3908 = vmatpush1.bf16.msra.mxu0 %v6578_v28  ;;  %3972 = vmatpush1.bf16.msra.mxu1 %v6580_v4  ;;  %v232_v28 = vld [vmem:[#allocation2 + $0x4e8] sm:$0xff]  ;;  %v234_v4 = vld [vmem:[#allocation2 + $0x4f8] sm:$0xff]  ;;  %8564 = vst [vmem:[#allocation120_spill] sm:$0xff] %v6626_v39  ;;  %v263_v15 = vld [vmem:[#allocation2 + $0x5e0] sm:$0xff] }
 0x143   :  { %3910 = vmatprep.subr.bf16.mxu0 %v6584_v63  ;;  %3974 = vmatprep.subr.bf16.mxu1 %v6586_v17  ;;  %v6608_v30 = vpack.c.bf16 %v232_v28, %v224_v18  ;;  %v6610_v6 = vpack.c.bf16 %v234_v4, %v226_v14  ;;  %v240_v17 = vld [vmem:[#allocation2 + $0x528] sm:$0xff]  ;;  %v242_v63 = vld [vmem:[#allocation2 + $0x538] sm:$0xff]  ;;  %8561 = vst [vmem:[#allocation117_spill] sm:$0xff] %v6616_v40  ;;  %v241_v28 = vld [vmem:[#allocation2 + $0x530] sm:$0xff] }
 0x144   :  { %v249_v4 = vld [vmem:[#allocation2 + $0x570] sm:$0xff]  ;;  %v6638_v35 = vpack.c.bf16 %v263_v15, %v255_v49 }
 0x145   :  { %8558 = vst [vmem:[#allocation114_spill] sm:$0xff] %v6608_v30  ;;  %8559 = vst [vmem:[#allocation115_spill] sm:$0xff] %v6610_v6  ;;  %v6628_v0 = vpack.c.bf16 %v249_v4, %v241_v28  ;;  %v271_v28 = vld [vmem:[#allocation2 + $0x620] sm:$0xff] }
 0x146   :  { %3912 = vmatpush1.bf16.msra.mxu0 %v6590_v47  ;;  %3976 = vmatpush1.bf16.msra.mxu1 %v6592_v57  ;;  %v248_v47 = vld [vmem:[#allocation2 + $0x568] sm:$0xff]  ;;  %v250_v57 = vld [vmem:[#allocation2 + $0x578] sm:$0xff]  ;;  %8568 = vst [vmem:[#allocation124_spill] sm:$0xff] %v6638_v35  ;;  %v279_v4 = vld [vmem:[#allocation2 + $0x660] sm:$0xff] }
 0x147   :  { %3914 = vmatprep.subr.bf16.mxu0 %v6596_v2  ;;  %3978 = vmatprep.subr.bf16.mxu1 %v6598_v44  ;;  %v6620_v14 = vpack.c.bf16 %v248_v47, %v240_v17  ;;  %v6622_v18 = vpack.c.bf16 %v250_v57, %v242_v63  ;;  %v256_v44 = vld [vmem:[#allocation2 + $0x5a8] sm:$0xff]  ;;  %v258_v2 = vld [vmem:[#allocation2 + $0x5b8] sm:$0xff]  ;;  %8565 = vst [vmem:[#allocation121_spill] sm:$0xff] %v6628_v0  ;;  %v257_v47 = vld [vmem:[#allocation2 + $0x5b0] sm:$0xff] }
 0x148   :  { %v265_v57 = vld [vmem:[#allocation2 + $0x5f0] sm:$0xff]  ;;  %v6650_v49 = vpack.c.bf16 %v279_v4, %v271_v28 }
 0x149   :  { %8562 = vst [vmem:[#allocation118_spill] sm:$0xff] %v6620_v14  ;;  %8563 = vst [vmem:[#allocation119_spill] sm:$0xff] %v6622_v18  ;;  %v6640_v50 = vpack.c.bf16 %v265_v57, %v257_v47  ;;  %v287_v47 = vld [vmem:[#allocation2 + $0x6a0] sm:$0xff] }
 0x14a   :  { %3916 = vmatpush1.bf16.msra.mxu0 %v6602_v54  ;;  %3980 = vmatpush1.bf16.msra.mxu1 %v6604_v34  ;;  %v264_v54 = vld [vmem:[#allocation2 + $0x5e8] sm:$0xff]  ;;  %v266_v34 = vld [vmem:[#allocation2 + $0x5f8] sm:$0xff]  ;;  %8572 = vst [vmem:[#allocation128_spill] sm:$0xff] %v6650_v49  ;;  %v295_v57 = vld [vmem:[#allocation2 + $0x6e0] sm:$0xff] }
 0x14b   :  { %3918 = vmatprep.subr.bf16.mxu0 %v6608_v30  ;;  %3982 = vmatprep.subr.bf16.mxu1 %v6610_v6  ;;  %v6632_v63 = vpack.c.bf16 %v264_v54, %v256_v44  ;;  %v6634_v17 = vpack.c.bf16 %v266_v34, %v258_v2  ;;  %v272_v6 = vld [vmem:[#allocation2 + $0x628] sm:$0xff]  ;;  %v274_v30 = vld [vmem:[#allocation2 + $0x638] sm:$0xff]  ;;  %8569 = vst [vmem:[#allocation125_spill] sm:$0xff] %v6640_v50  ;;  %v273_v54 = vld [vmem:[#allocation2 + $0x630] sm:$0xff] }
 0x14c   :  { %v281_v34 = vld [vmem:[#allocation2 + $0x670] sm:$0xff]  ;;  %v6662_v28 = vpack.c.bf16 %v295_v57, %v287_v47 }
 0x14d   :  { %8566 = vst [vmem:[#allocation122_spill] sm:$0xff] %v6632_v63  ;;  %8567 = vst [vmem:[#allocation123_spill] sm:$0xff] %v6634_v17  ;;  %v6652_v15 = vpack.c.bf16 %v281_v34, %v273_v54  ;;  %v303_v54 = vld [vmem:[#allocation2 + $0x720] sm:$0xff] }
 0x14e   :  { %3920 = vmatpush1.bf16.msra.mxu0 %v6614_v53  ;;  %3984 = vmatpush1.bf16.msra.mxu1 %v6616_v40  ;;  %v280_v53 = vld [vmem:[#allocation2 + $0x668] sm:$0xff]  ;;  %v282_v40 = vld [vmem:[#allocation2 + $0x678] sm:$0xff]  ;;  %8576 = vst [vmem:[#allocation132_spill] sm:$0xff] %v6662_v28  ;;  %v311_v34 = vld [vmem:[#allocation2 + $0x760] sm:$0xff] }
 0x14f   :  { %3922 = vmatprep.subr.bf16.mxu0 %v6620_v14  ;;  %3986 = vmatprep.subr.bf16.mxu1 %v6622_v18  ;;  %v6644_v2 = vpack.c.bf16 %v280_v53, %v272_v6  ;;  %v6646_v44 = vpack.c.bf16 %v282_v40, %v274_v30  ;;  %v288_v18 = vld [vmem:[#allocation2 + $0x6a8] sm:$0xff]  ;;  %v290_v14 = vld [vmem:[#allocation2 + $0x6b8] sm:$0xff]  ;;  %8573 = vst [vmem:[#allocation129_spill] sm:$0xff] %v6652_v15  ;;  %v289_v53 = vld [vmem:[#allocation2 + $0x6b0] sm:$0xff] }
 0x150   :  { %v297_v40 = vld [vmem:[#allocation2 + $0x6f0] sm:$0xff]  ;;  %v6674_v47 = vpack.c.bf16 %v311_v34, %v303_v54 }
 0x151   :  { %8570 = vst [vmem:[#allocation126_spill] sm:$0xff] %v6644_v2  ;;  %8571 = vst [vmem:[#allocation127_spill] sm:$0xff] %v6646_v44  ;;  %v6664_v4 = vpack.c.bf16 %v297_v40, %v289_v53  ;;  %v319_v53 = vld [vmem:[#allocation2 + $0x7a0] sm:$0xff]  ;;  %v329_v40 = vld [vmem:[#allocation2 + $0x7f0] sm:$0xff] }
 0x152   :  { %3924 = vmatpush1.bf16.msra.mxu0 %v6626_v39  ;;  %3988 = vmatpush1.bf16.msra.mxu1 %v6628_v0  ;;  %v296_v39 = vld [vmem:[#allocation2 + $0x6e8] sm:$0xff]  ;;  %v298_v0 = vld [vmem:[#allocation2 + $0x6f8] sm:$0xff]  ;;  %8580 = vst [vmem:[#allocation136_spill] sm:$0xff] %v6674_v47 }
 0x153   :  { %3926 = vmatprep.subr.bf16.mxu0 %v6632_v63  ;;  %3990 = vmatprep.subr.bf16.mxu1 %v6634_v17  ;;  %v6656_v30 = vpack.c.bf16 %v296_v39, %v288_v18  ;;  %v6658_v6 = vpack.c.bf16 %v298_v0, %v290_v14  ;;  %v304_v17 = vld [vmem:[#allocation2 + $0x728] sm:$0xff]  ;;  %v306_v63 = vld [vmem:[#allocation2 + $0x738] sm:$0xff]  ;;  %8577 = vst [vmem:[#allocation133_spill] sm:$0xff] %v6664_v4  ;;  %v305_v39 = vld [vmem:[#allocation2 + $0x730] sm:$0xff] }
 0x154   :  { %v313_v0 = vld [vmem:[#allocation2 + $0x770] sm:$0xff] }
 0x155   :  { %8574 = vst [vmem:[#allocation130_spill] sm:$0xff] %v6656_v30  ;;  %8575 = vst [vmem:[#allocation131_spill] sm:$0xff] %v6658_v6  ;;  %v6676_v57 = vpack.c.bf16 %v313_v0, %v305_v39  ;;  %v8591_v39 = vld [vmem:[#allocation54_spill] sm:$0xff]  ;;  %v8592_v0 = vld [vmem:[#allocation55_spill] sm:$0xff] }
 0x156   :  { %3928 = vmatpush1.bf16.msra.mxu0 %v6638_v35  ;;  %3992 = vmatpush1.bf16.msra.mxu1 %v6640_v50  ;;  %v312_v35 = vld [vmem:[#allocation2 + $0x768] sm:$0xff]  ;;  %v314_v50 = vld [vmem:[#allocation2 + $0x778] sm:$0xff] }
 0x157   :  { %3930 = vmatprep.subr.bf16.mxu0 %v6644_v2  ;;  %3994 = vmatprep.subr.bf16.mxu1 %v6646_v44  ;;  %v6668_v14 = vpack.c.bf16 %v312_v35, %v304_v17  ;;  %v6670_v18 = vpack.c.bf16 %v314_v50, %v306_v63  ;;  %v320_v44 = vld [vmem:[#allocation2 + $0x7a8] sm:$0xff]  ;;  %v322_v2 = vld [vmem:[#allocation2 + $0x7b8] sm:$0xff]  ;;  %8581 = vst [vmem:[#allocation137_spill] sm:$0xff] %v6676_v57  ;;  %v327_v35 = vld [vmem:[#allocation2 + $0x7e0] sm:$0xff] }
 0x158   :  { %v321_v50 = vld [vmem:[#allocation2 + $0x7b0] sm:$0xff]  ;;  %v6686_v54 = vpack.c.bf16 %v327_v35, %v319_v53  ;;  %v8593_v53 = vld [vmem:[#allocation56_spill] sm:$0xff] }
 0x159   :  { %8578 = vst [vmem:[#allocation134_spill] sm:$0xff] %v6668_v14  ;;  %8579 = vst [vmem:[#allocation135_spill] sm:$0xff] %v6670_v18  ;;  %v6688_v34 = vpack.c.bf16 %v329_v40, %v321_v50  ;;  %v8594_v35 = vld [vmem:[#allocation57_spill] sm:$0xff]  ;;  %v8595_v50 = vld [vmem:[#allocation58_spill] sm:$0xff] }
 0x15a   :  { %3932 = vmatpush1.bf16.msra.mxu0 %v6650_v49  ;;  %3996 = vmatpush1.bf16.msra.mxu1 %v6652_v15  ;;  %v328_v49 = vld [vmem:[#allocation2 + $0x7e8] sm:$0xff]  ;;  %v330_v15 = vld [vmem:[#allocation2 + $0x7f8] sm:$0xff]  ;;  %8584 = vst [vmem:[#allocation140_spill] sm:$0xff] %v6686_v54 }
 0x15b   :  { %3934 = vmatprep.subr.bf16.mxu0 %v6656_v30  ;;  %3998 = vmatprep.subr.bf16.mxu1 %v6658_v6  ;;  %v6680_v63 = vpack.c.bf16 %v328_v49, %v320_v44  ;;  %v6682_v17 = vpack.c.bf16 %v330_v15, %v322_v2  ;;  %8585 = vst [vmem:[#allocation141_spill] sm:$0xff] %v6688_v34  ;;  %v8587_v2 = vld [vmem:[#allocation50_spill] sm:$0xff]  ;;  %v8588_v44 = vld [vmem:[#allocation51_spill] sm:$0xff]  ;;  %v8589_v49 = vld [vmem:[#allocation52_spill] sm:$0xff] }
 0x15c   :  { %v8590_v15 = vld [vmem:[#allocation53_spill] sm:$0xff]  ;;  %v8596_v40 = vld [vmem:[#allocation59_spill] sm:$0xff] }
 0x15d   :  { %8582 = vst [vmem:[#allocation138_spill] sm:$0xff] %v6680_v63  ;;  %8583 = vst [vmem:[#allocation139_spill] sm:$0xff] %v6682_v17 }
 0x15e   :  { %3936 = vmatpush1.bf16.msra.mxu0 %v6662_v28  ;;  %4000 = vmatpush1.bf16.msra.mxu1 %v6664_v4 }
 0x15f   :  { %3938 = vmatprep.subr.bf16.mxu0 %v6668_v14  ;;  %4002 = vmatprep.subr.bf16.mxu1 %v6670_v18 }
 0x162   :  { %3940 = vmatpush1.bf16.msra.mxu0 %v6674_v47  ;;  %4004 = vmatpush1.bf16.msra.mxu1 %v6676_v57 }
 0x163   :  { %3942 = vmatprep.subr.bf16.mxu0 %v6680_v63  ;;  %4006 = vmatprep.subr.bf16.mxu1 %v6682_v17 }
 0x166   :  { %3944 = vmatpush1.bf16.msra.mxu0 %v6686_v54  ;;  %4008 = vmatpush1.bf16.msra.mxu1 %v6688_v34 }
 0x167   :  { %4010 = vmatprep.subr.bf16.mxu0 %v6262_v48  ;;  %4074 = vmatprep.subr.bf16.mxu1 %v6275_v1 }
 0x169   :  { %863 = vmatmul.mubr.f32.vlgmr.msra.gmra.mrb[4].mxu0 %v6506_v12  ;;  %934 = vmatmul.mubr.f32.vlgmr.msra.gmra.mrb[4].mxu1 %v6506_v12  ;;  %v8586_v12 = vld [vmem:[#allocation49_spill] sm:$0xff] }
 0x16a   :  { %4012 = vmatpush1.bf16.msra.mxu0 %v6270_v58  ;;  %4076 = vmatpush1.bf16.msra.mxu1 %v6282_v8 }
 0x16b   :  { %4014 = vmatprep.subr.bf16.mxu0 %v6273_v61  ;;  %4078 = vmatprep.subr.bf16.mxu1 %v6288_v13 }
 0x16e   :  { %4016 = vmatpush1.bf16.msra.mxu0 %v6279_v7  ;;  %4080 = vmatpush1.bf16.msra.mxu1 %v6295_v20 }
 0x16f   :  { %4018 = vmatprep.subr.bf16.mxu0 %v6285_v10  ;;  %4082 = vmatprep.subr.bf16.mxu1 %v6301_v25 }
 0x172   :  { %4020 = vmatpush1.bf16.msra.mxu0 %v6292_v19  ;;  %4084 = vmatpush1.bf16.msra.mxu1 %v6308_v32 }
 0x173   :  { %4022 = vmatprep.subr.bf16.mxu0 %v6298_v22  ;;  %4086 = vmatprep.subr.bf16.mxu1 %v6314_v36 }
 0x176   :  { %4024 = vmatpush1.bf16.msra.mxu0 %v6305_v31  ;;  %4088 = vmatpush1.bf16.msra.mxu1 %v6320_v42 }
 0x177   :  { %4026 = vmatprep.subr.bf16.mxu0 %v6311_v33  ;;  %4090 = vmatprep.subr.bf16.mxu1 %v6324_v43 }
 0x17a   :  { %4028 = vmatpush1.bf16.msra.mxu0 %v6317_v41  ;;  %4092 = vmatpush1.bf16.msra.mxu1 %v6328_v46 }
 0x17b   :  { %4030 = vmatprep.subr.bf16.mxu0 %v6332_v51  ;;  %4094 = vmatprep.subr.bf16.mxu1 %v6334_v55 }
 0x17e   :  { %4032 = vmatpush1.bf16.msra.mxu0 %v6336_v56  ;;  %4096 = vmatpush1.bf16.msra.mxu1 %v6339_v60 }
 0x17f   :  { %4034 = vmatprep.subr.bf16.mxu0 %v6344_v3  ;;  %4098 = vmatprep.subr.bf16.mxu1 %v6346_v9 }
 0x182   :  { %4036 = vmatpush1.bf16.msra.mxu0 %v6348_v11  ;;  %4100 = vmatpush1.bf16.msra.mxu1 %v6351_v16 }
 0x183   :  { %4038 = vmatprep.subr.bf16.mxu0 %v6355_v23  ;;  %4102 = vmatprep.subr.bf16.mxu1 %v6357_v24 }
 0x186   :  { %4040 = vmatpush1.bf16.msra.mxu0 %v6360_v29  ;;  %4104 = vmatpush1.bf16.msra.mxu1 %v6364_v37 }
 0x187   :  { %4042 = vmatprep.subr.bf16.mxu0 %v6366_v38  ;;  %4106 = vmatprep.subr.bf16.mxu1 %v6368_v45 }
 0x18a   :  { %4044 = vmatpush1.bf16.msra.mxu0 %v6371_v52  ;;  %4108 = vmatpush1.bf16.msra.mxu1 %v6375_v59 }
 0x18b   :  { %4046 = vmatprep.subr.bf16.mxu0 %v6377_v62  ;;  %4110 = vmatprep.subr.bf16.mxu1 %v6380_v5 }
 0x18e   :  { %4048 = vmatpush1.bf16.msra.mxu0 %v6383_v21  ;;  %4112 = vmatpush1.bf16.msra.mxu1 %v6387_v26 }
 0x18f   :  { %4050 = vmatprep.subr.bf16.mxu0 %v6389_v27  ;;  %4114 = vmatprep.subr.bf16.mxu1 %v8586_v12  ;;  %v8597_v12 = vld [vmem:[#allocation60_spill] sm:$0xff] }
 0x192   :  { %4052 = vmatpush1.bf16.msra.mxu0 %v8587_v2  ;;  %4116 = vmatpush1.bf16.msra.mxu1 %v8588_v44  ;;  %v8598_v2 = vld [vmem:[#allocation61_spill] sm:$0xff]  ;;  %v8599_v44 = vld [vmem:[#allocation62_spill] sm:$0xff] }
 0x193   :  { %4054 = vmatprep.subr.bf16.mxu0 %v8589_v49  ;;  %4118 = vmatprep.subr.bf16.mxu1 %v8590_v15  ;;  %v8600_v49 = vld [vmem:[#allocation63_spill] sm:$0xff]  ;;  %v8601_v15 = vld [vmem:[#allocation64_spill] sm:$0xff] }
 0x196   :  { %4056 = vmatpush1.bf16.msra.mxu0 %v8591_v39  ;;  %4120 = vmatpush1.bf16.msra.mxu1 %v8592_v0  ;;  %v8602_v39 = vld [vmem:[#allocation65_spill] sm:$0xff]  ;;  %v8603_v0 = vld [vmem:[#allocation66_spill] sm:$0xff] }
 0x197   :  { %4058 = vmatprep.subr.bf16.mxu0 %v8593_v53  ;;  %4122 = vmatprep.subr.bf16.mxu1 %v8594_v35  ;;  %v8604_v53 = vld [vmem:[#allocation67_spill] sm:$0xff]  ;;  %v8605_v35 = vld [vmem:[#allocation68_spill] sm:$0xff] }
 0x19a   :  { %4060 = vmatpush1.bf16.msra.mxu0 %v8595_v50  ;;  %4124 = vmatpush1.bf16.msra.mxu1 %v8596_v40  ;;  %v8606_v50 = vld [vmem:[#allocation69_spill] sm:$0xff]  ;;  %v8607_v40 = vld [vmem:[#allocation70_spill] sm:$0xff] }
 0x19b   :  { %4062 = vmatprep.subr.bf16.mxu0 %v8597_v12  ;;  %4126 = vmatprep.subr.bf16.mxu1 %v8598_v2  ;;  %v8608_v12 = vld [vmem:[#allocation71_spill] sm:$0xff]  ;;  %v8609_v2 = vld [vmem:[#allocation72_spill] sm:$0xff] }
 0x19e   :  { %4064 = vmatpush1.bf16.msra.mxu0 %v8599_v44  ;;  %4128 = vmatpush1.bf16.msra.mxu1 %v8600_v49  ;;  %v8610_v44 = vld [vmem:[#allocation73_spill] sm:$0xff] }
 0x19f   :  { %4066 = vmatprep.subr.bf16.mxu0 %v8601_v15  ;;  %4130 = vmatprep.subr.bf16.mxu1 %v8602_v39  ;;  %v331_v39 = vld [vmem:[%s8146_s4] sm:$0xf] }
 0x1a0   :  { %v8611_v15 = vld [vmem:[#allocation74_spill] sm:$0xff] }
 0x1a1   :  { %v8616_v21 = vsub.s32 3, %v8611_v15 }
 0x1a2   :  { %4068 = vmatpush1.bf16.msra.mxu0 %v8603_v0  ;;  %4132 = vmatpush1.bf16.msra.mxu1 %v8604_v53  ;;  %v8612_v0 = vsub.s32 0, %v8611_v15 }
 0x1a3   :  { %4070 = vmatprep.subr.bf16.mxu0 %v8605_v35  ;;  %4134 = vmatprep.subr.bf16.mxu1 %v8606_v50  ;;  %v8614_v35 = vsub.s32 1, %v8611_v15  ;;  %v6777_v5 = vrot.slane %v331_v39, %v8616_v21 }
 0x1a4   :  { %v6767_v49 = vrot.slane %v331_v39, %v8612_v0 }
 0x1a5   :  { %v6771_v53 = vrot.slane %v331_v39, %v8614_v35  ;;  %8617 = vst [vmem:[#allocation143_spill] sm:$0xff] %v6777_v5  ;;  %v8618_v35 = vsub.s32 2, %v8611_v15 }
 0x1a6   :  { %4072 = vmatpush1.bf16.msra.mxu0 %v8607_v40  ;;  %4136 = vmatpush1.bf16.msra.mxu1 %v8608_v12  ;;  %8613 = vst [vmem:[#allocation74_spill] sm:$0xff] %v6767_v49 }
 0x1a7   :  { %4138 = vmatprep.subr.bf16.mxu0 %v8609_v2  ;;  %4202 = vmatprep.subr.bf16.mxu1 %v8610_v44  ;;  %8615 = vst [vmem:[#allocation142_spill] sm:$0xff] %v6771_v53  ;;  %v6782_v59 = vrot.slane %v331_v39, %v8618_v35  ;;  %v8622_v35 = vld [vmem:[#allocation75_spill] sm:$0xff] }
 0x1a9   :  { %8619 = vst [vmem:[#allocation144_spill] sm:$0xff] %v6782_v59 }
 0x1fc   :  { %v722_v50 = vpop.f32.mrb[2].mxu0  ;;  %v793_v40 = vpop.f32.mrb[2].mxu1 }
 0x1fd   :  { %v961_v12 = vadd.f32 %v6767_v49, %v722_v50  ;;  %v724_v27 = vpop.f32.mrb[3].mxu0  ;;  %v795_v2 = vpop.f32.mrb[3].mxu1  ;;  %v963_v50 = vadd.f32 %v6782_v59, %v793_v40 }
 0x1fe   :  { %v962_v44 = vadd.f32 %v6771_v53, %v724_v27  ;;  %v964_v0 = vadd.f32 %v6777_v5, %v795_v2 }
 0x1ff   :  { %v3535_v26 = vmul.f32 -1.442695, %v961_v12 }
 0x200   :  { %v3536_v62 = vmul.f32 -1.442695, %v962_v44  ;;  %v3537_v52 = vmul.f32 -1.442695, %v964_v0 }
 0x201   :  { %5822 = vpow2.f32 %v3535_v26 }
 0x202   :  { %5824 = vpow2.f32 %v3536_v62 }
 0x203   :  { %5826 = vpow2.f32 %v3537_v52 }
 0x204   :  { %5828 = vtanh.f32 %v963_v50 }
 0x20b   :  { %v5823_v49 = vpop.eup %5822 }
 0x20c   :  { %v5825_v45 = vpop.eup %5824  ;;  %v968_v27 = vadd.f32 1.0, %v5823_v49 }
 0x20d   :  { %v974_v12 = vadd.f32 1.0, %v5825_v45  ;;  %v5827_v21 = vpop.eup %5826 }
 0x20e   :  { %5830 = vrcp.f32 %v968_v27  ;;  %v5829_v26 = vpop.eup %5828  ;;  %v981_v5 = vadd.f32 1.0, %v5827_v21  ;;  %v8623_v21 = vld [vmem:[#allocation76_spill] sm:$0xff] }
 0x20f   :  { %5832 = vrcp.f32 %v974_v12 }
 0x210   :  { %5834 = vrcp.f32 %v981_v5 }
 0x218   :  { %v5831_v62 = vpop.eup %5830 }
 0x219   :  { %v5833_v44 = vpop.eup %5832  ;;  %v985_v2 = vmul.f32 %v5831_v62, %v5829_v26 }
 0x21a   :  { %v984_v15 = vmul.f32 0.0, %v5833_v44  ;;  %v5835_v40 = vpop.eup %5834  ;;  %v8624_v44 = vld [vmem:[#allocation77_spill] sm:$0xff] }
 0x21c   :  { %v6785_v39 = vadd.f32 %v985_v2, %v984_v15 }
 0x21e   :  { %8620 = vst [vmem:[#allocation145_spill] sm:$0xff] %v6785_v39  ;;  %5836 = vtanh.f32 %v6785_v39 }
 0x228   :  { %v5837_v0 = vpop.eup %5836 }
 0x229   :  { %v6788_v49 = vmul.f32 %v5837_v0, %v5835_v40  ;;  %v8625_v40 = vld [vmem:[#allocation78_spill] sm:$0xff] }
 0x22b   :  { %8621 = vst [vmem:[#allocation146_spill] sm:$0xff] %v6788_v49  ;;  %1081 = vmatprep.mubr.f32.mxu0 %v6788_v49  ;;  %1152 = vmatprep.mubr.f32.mxu1 %v6788_v49 }
 0x23c   :  { %v864_v45 = vpop.f32.mrb[4].mxu0  ;;  %v935_v52 = vpop.f32.mrb[4].mxu1 }
 0x23d   :  { %v989_v50 = vadd.f32 %v864_v45, %v8622_v35  ;;  %v866_v27 = vpop.f32.mrb[5].mxu0  ;;  %v937_v12 = vpop.f32.mrb[5].mxu1  ;;  %v991_v0 = vadd.f32 %v935_v52, %v8625_v40 }
 0x23e   :  { %v990_v26 = vadd.f32 %v866_v27, %v8623_v21  ;;  %v992_v2 = vadd.f32 %v937_v12, %v8624_v44 }
 0x23f   :  { %v3538_v62 = vmul.f32 -1.442695, %v989_v50 }
 0x240   :  { %v3539_v5 = vmul.f32 -1.442695, %v990_v26  ;;  %v3540_v15 = vmul.f32 -1.442695, %v992_v2 }
 0x241   :  { %5838 = vpow2.f32 %v3538_v62 }
 0x242   :  { %5840 = vpow2.f32 %v3539_v5  ;;  %v8626_v5 = vld [vmem:[#allocation79_spill] sm:$0xff] }
 0x243   :  { %5842 = vpow2.f32 %v3540_v15  ;;  %v8632_v15 = vld [vmem:[#allocation85_spill] sm:$0xff] }
 0x244   :  { %5844 = vtanh.f32 %v991_v0  ;;  %v8633_v0 = vld [vmem:[#allocation86_spill] sm:$0xff] }
 0x24b   :  { %v5839_v39 = vpop.eup %5838 }
 0x24c   :  { %v5841_v59 = vpop.eup %5840  ;;  %v996_v53 = vadd.f32 1.0, %v5839_v39 }
 0x24d   :  { %v1002_v38 = vadd.f32 1.0, %v5841_v59  ;;  %v5843_v45 = vpop.eup %5842  ;;  %v8628_v59 = vld [vmem:[#allocation81_spill] sm:$0xff] }
 0x24e   :  { %5846 = vrcp.f32 %v996_v53  ;;  %v5845_v35 = vpop.eup %5844  ;;  %v1009_v62 = vadd.f32 1.0, %v5843_v45  ;;  %v8629_v53 = vld [vmem:[#allocation82_spill] sm:$0xff]  ;;  %v8634_v45 = vld [vmem:[#allocation87_spill] sm:$0xff] }
 0x24f   :  { %5848 = vrcp.f32 %v1002_v38  ;;  %v8627_v38 = vld [vmem:[#allocation80_spill] sm:$0xff] }
 0x250   :  { %5850 = vrcp.f32 %v1009_v62  ;;  %v8638_v62 = vld [vmem:[#allocation91_spill] sm:$0xff] }
 0x258   :  { %v5847_v27 = vpop.eup %5846 }
 0x259   :  { %v5849_v50 = vpop.eup %5848  ;;  %v1013_v26 = vmul.f32 %v5847_v27, %v5845_v35  ;;  %v8630_v35 = vld [vmem:[#allocation83_spill] sm:$0xff]  ;;  %v8635_v27 = vld [vmem:[#allocation88_spill] sm:$0xff] }
 0x25a   :  { %v1012_v21 = vmul.f32 %v5849_v50, %v8626_v5  ;;  %v5851_v52 = vpop.eup %5850  ;;  %v8636_v50 = vld [vmem:[#allocation89_spill] sm:$0xff]  ;;  %v8639_v5 = vld [vmem:[#allocation92_spill] sm:$0xff] }
 0x25c   :  { %v6797_v12 = vadd.f32 %v1013_v26, %v1012_v21  ;;  %v8631_v21 = vld [vmem:[#allocation84_spill] sm:$0xff]  ;;  %v8637_v26 = vld [vmem:[#allocation90_spill] sm:$0xff] }
 0x25e   :  { %5852 = vtanh.f32 %v6797_v12 }
 0x268   :  { %v5853_v39 = vpop.eup %5852 }
 0x269   :  { %v6800_v2 = vmul.f32 %v5853_v39, %v5851_v52  ;;  %v8640_v52 = vld [vmem:[#allocation93_spill] sm:$0xff]  ;;  %v8641_v39 = vld [vmem:[#allocation94_spill] sm:$0xff] }
 0x26b   :  { %1082 = vmatmul.mubr.f32.vlgmr.msra.gmra.mrb[6].mxu0 %v6800_v2  ;;  %1153 = vmatmul.mubr.f32.vlgmr.msra.gmra.mrb[6].mxu1 %v6800_v2 }
 0x26c   :  { %4140 = vmatpush1.bf16.msra.mxu0 %v8627_v38  ;;  %4204 = vmatpush1.bf16.msra.mxu1 %v8628_v59 }
 0x26d   :  { %1223 = vmatprep.mubr.f32.mxu0 %v6788_v49  ;;  %1294 = vmatprep.mubr.f32.mxu1 %v6788_v49  ;;  %v8642_v49 = vld [vmem:[#allocation95_spill] sm:$0xff] }
 0x26e   :  { %4142 = vmatprep.subr.bf16.mxu0 %v8629_v53  ;;  %4206 = vmatprep.subr.bf16.mxu1 %v8630_v35 }
 0x270   :  { %4144 = vmatpush1.bf16.msra.mxu0 %v8631_v21  ;;  %4208 = vmatpush1.bf16.msra.mxu1 %v8632_v15  ;;  %v8643_v15 = vld [vmem:[#allocation96_spill] sm:$0xff] }
 0x271   :  { %4146 = vmatprep.subr.bf16.mxu0 %v8633_v0  ;;  %4210 = vmatprep.subr.bf16.mxu1 %v8634_v45  ;;  %v8644_v0 = vld [vmem:[#allocation97_spill] sm:$0xff]  ;;  %v8645_v45 = vld [vmem:[#allocation98_spill] sm:$0xff] }
 0x274   :  { %4148 = vmatpush1.bf16.msra.mxu0 %v8635_v27  ;;  %4212 = vmatpush1.bf16.msra.mxu1 %v8636_v50  ;;  %v8646_v27 = vld [vmem:[#allocation99_spill] sm:$0xff]  ;;  %v8647_v50 = vld [vmem:[#allocation100_spill] sm:$0xff] }
 0x275   :  { %4150 = vmatprep.subr.bf16.mxu0 %v8637_v26  ;;  %4214 = vmatprep.subr.bf16.mxu1 %v8638_v62  ;;  %v8648_v26 = vld [vmem:[#allocation101_spill] sm:$0xff]  ;;  %v8649_v62 = vld [vmem:[#allocation102_spill] sm:$0xff] }
 0x278   :  { %4152 = vmatpush1.bf16.msra.mxu0 %v8639_v5  ;;  %4216 = vmatpush1.bf16.msra.mxu1 %v8640_v52  ;;  %v8650_v5 = vld [vmem:[#allocation103_spill] sm:$0xff]  ;;  %v8651_v52 = vld [vmem:[#allocation104_spill] sm:$0xff] }
 0x279   :  { %4154 = vmatprep.subr.bf16.mxu0 %v8641_v39  ;;  %4218 = vmatprep.subr.bf16.mxu1 %v8642_v49  ;;  %v8652_v39 = vld [vmem:[#allocation105_spill] sm:$0xff]  ;;  %v8653_v49 = vld [vmem:[#allocation106_spill] sm:$0xff] }
 0x27c   :  { %4156 = vmatpush1.bf16.msra.mxu0 %v8643_v15  ;;  %4220 = vmatpush1.bf16.msra.mxu1 %v8644_v0  ;;  %v8654_v15 = vld [vmem:[#allocation107_spill] sm:$0xff]  ;;  %v8655_v0 = vld [vmem:[#allocation108_spill] sm:$0xff] }
 0x27d   :  { %4158 = vmatprep.subr.bf16.mxu0 %v8645_v45  ;;  %4222 = vmatprep.subr.bf16.mxu1 %v8646_v27  ;;  %v8656_v45 = vld [vmem:[#allocation109_spill] sm:$0xff]  ;;  %v8657_v27 = vld [vmem:[#allocation110_spill] sm:$0xff] }
 0x280   :  { %4160 = vmatpush1.bf16.msra.mxu0 %v8647_v50  ;;  %4224 = vmatpush1.bf16.msra.mxu1 %v8648_v26  ;;  %v8658_v50 = vld [vmem:[#allocation111_spill] sm:$0xff]  ;;  %v8659_v26 = vld [vmem:[#allocation112_spill] sm:$0xff] }
 0x281   :  { %4162 = vmatprep.subr.bf16.mxu0 %v8649_v62  ;;  %4226 = vmatprep.subr.bf16.mxu1 %v8650_v5  ;;  %v8660_v62 = vld [vmem:[#allocation113_spill] sm:$0xff]  ;;  %v8661_v5 = vld [vmem:[#allocation114_spill] sm:$0xff] }
 0x284   :  { %4164 = vmatpush1.bf16.msra.mxu0 %v8651_v52  ;;  %4228 = vmatpush1.bf16.msra.mxu1 %v8652_v39  ;;  %v8662_v52 = vld [vmem:[#allocation115_spill] sm:$0xff]  ;;  %v8663_v39 = vld [vmem:[#allocation116_spill] sm:$0xff] }
 0x285   :  { %4166 = vmatprep.subr.bf16.mxu0 %v8653_v49  ;;  %4230 = vmatprep.subr.bf16.mxu1 %v8654_v15  ;;  %v8664_v49 = vld [vmem:[#allocation117_spill] sm:$0xff]  ;;  %v8665_v15 = vld [vmem:[#allocation118_spill] sm:$0xff] }
 0x288   :  { %4168 = vmatpush1.bf16.msra.mxu0 %v8655_v0  ;;  %4232 = vmatpush1.bf16.msra.mxu1 %v8656_v45  ;;  %v8666_v0 = vld [vmem:[#allocation119_spill] sm:$0xff]  ;;  %v8667_v45 = vld [vmem:[#allocation120_spill] sm:$0xff] }
 0x289   :  { %4170 = vmatprep.subr.bf16.mxu0 %v8657_v27  ;;  %4234 = vmatprep.subr.bf16.mxu1 %v8658_v50  ;;  %v8668_v27 = vld [vmem:[#allocation121_spill] sm:$0xff]  ;;  %v8669_v50 = vld [vmem:[#allocation122_spill] sm:$0xff] }
 0x28c   :  { %4172 = vmatpush1.bf16.msra.mxu0 %v8659_v26  ;;  %4236 = vmatpush1.bf16.msra.mxu1 %v8660_v62  ;;  %v8670_v26 = vld [vmem:[#allocation123_spill] sm:$0xff]  ;;  %v8671_v62 = vld [vmem:[#allocation124_spill] sm:$0xff] }
 0x28d   :  { %4174 = vmatprep.subr.bf16.mxu0 %v8661_v5  ;;  %4238 = vmatprep.subr.bf16.mxu1 %v8662_v52  ;;  %v8672_v5 = vld [vmem:[#allocation125_spill] sm:$0xff]  ;;  %v8673_v52 = vld [vmem:[#allocation126_spill] sm:$0xff] }
 0x290   :  { %4176 = vmatpush1.bf16.msra.mxu0 %v8663_v39  ;;  %4240 = vmatpush1.bf16.msra.mxu1 %v8664_v49  ;;  %v8674_v39 = vld [vmem:[#allocation127_spill] sm:$0xff]  ;;  %v8675_v49 = vld [vmem:[#allocation128_spill] sm:$0xff] }
 0x291   :  { %4178 = vmatprep.subr.bf16.mxu0 %v8665_v15  ;;  %4242 = vmatprep.subr.bf16.mxu1 %v8666_v0  ;;  %v8676_v15 = vld [vmem:[#allocation129_spill] sm:$0xff] }
 0x294   :  { %4180 = vmatpush1.bf16.msra.mxu0 %v8667_v45  ;;  %4244 = vmatpush1.bf16.msra.mxu1 %v8668_v27 }
 0x295   :  { %4182 = vmatprep.subr.bf16.mxu0 %v8669_v50  ;;  %4246 = vmatprep.subr.bf16.mxu1 %v8670_v26 }
 0x298   :  { %4184 = vmatpush1.bf16.msra.mxu0 %v8671_v62  ;;  %4248 = vmatpush1.bf16.msra.mxu1 %v8672_v5 }
 0x299   :  { %4186 = vmatprep.subr.bf16.mxu0 %v8673_v52  ;;  %4250 = vmatprep.subr.bf16.mxu1 %v8674_v39 }
 0x29c   :  { %4188 = vmatpush1.bf16.msra.mxu0 %v8675_v49  ;;  %4252 = vmatpush1.bf16.msra.mxu1 %v8676_v15 }
 0x29d   :  { %4190 = vmatprep.subr.bf16.mxu0 %v6656_v30  ;;  %4254 = vmatprep.subr.bf16.mxu1 %v6658_v6 }
 0x2a0   :  { %4192 = vmatpush1.bf16.msra.mxu0 %v6662_v28  ;;  %4256 = vmatpush1.bf16.msra.mxu1 %v6664_v4 }
 0x2a1   :  { %4194 = vmatprep.subr.bf16.mxu0 %v6668_v14  ;;  %4258 = vmatprep.subr.bf16.mxu1 %v6670_v18 }
 0x2a4   :  { %4196 = vmatpush1.bf16.msra.mxu0 %v6674_v47  ;;  %4260 = vmatpush1.bf16.msra.mxu1 %v6676_v57 }
 0x2a5   :  { %4198 = vmatprep.subr.bf16.mxu0 %v6680_v63  ;;  %4262 = vmatprep.subr.bf16.mxu1 %v6682_v17 }
 0x2a8   :  { %4200 = vmatpush1.bf16.msra.mxu0 %v6686_v54  ;;  %4264 = vmatpush1.bf16.msra.mxu1 %v6688_v34 }
 0x2a9   :  { %4266 = vmatprep.subr.bf16.mxu0 %v6262_v48  ;;  %4330 = vmatprep.subr.bf16.mxu1 %v6275_v1 }
 0x2ab   :  { %1224 = vmatmul.mubr.f32.vlgmr.msra.gmra.mrb[8].mxu0 %v6800_v2  ;;  %1295 = vmatmul.mubr.f32.vlgmr.msra.gmra.mrb[8].mxu1 %v6800_v2  ;;  %v8677_v2 = vld [vmem:[#allocation40_spill] sm:$0xff] }
 0x2ac   :  { %4268 = vmatpush1.bf16.msra.mxu0 %v6270_v58  ;;  %4332 = vmatpush1.bf16.msra.mxu1 %v6282_v8 }
 0x2ad   :  { %4270 = vmatprep.subr.bf16.mxu0 %v6273_v61  ;;  %4334 = vmatprep.subr.bf16.mxu1 %v6288_v13 }
 0x2b0   :  { %4272 = vmatpush1.bf16.msra.mxu0 %v6279_v7  ;;  %4336 = vmatpush1.bf16.msra.mxu1 %v6295_v20 }
 0x2b1   :  { %4274 = vmatprep.subr.bf16.mxu0 %v6285_v10  ;;  %4338 = vmatprep.subr.bf16.mxu1 %v6301_v25 }
 0x2b4   :  { %4276 = vmatpush1.bf16.msra.mxu0 %v6292_v19  ;;  %4340 = vmatpush1.bf16.msra.mxu1 %v6308_v32 }
 0x2b5   :  { %4278 = vmatprep.subr.bf16.mxu0 %v6298_v22  ;;  %4342 = vmatprep.subr.bf16.mxu1 %v6314_v36 }
 0x2b8   :  { %4280 = vmatpush1.bf16.msra.mxu0 %v6305_v31  ;;  %4344 = vmatpush1.bf16.msra.mxu1 %v6320_v42 }
 0x2b9   :  { %4282 = vmatprep.subr.bf16.mxu0 %v6311_v33  ;;  %4346 = vmatprep.subr.bf16.mxu1 %v6324_v43 }
 0x2bc   :  { %4284 = vmatpush1.bf16.msra.mxu0 %v6317_v41  ;;  %4348 = vmatpush1.bf16.msra.mxu1 %v6328_v46  ;;  %v8712_v46 = vld [vmem:[#allocation142_spill] sm:$0xff] }
 0x2bd   :  { %4286 = vmatprep.subr.bf16.mxu0 %v6332_v51  ;;  %4350 = vmatprep.subr.bf16.mxu1 %v6334_v55  ;;  %v8711_v55 = vld [vmem:[#allocation74_spill] sm:$0xff] }
 0x2c0   :  { %4288 = vmatpush1.bf16.msra.mxu0 %v6336_v56  ;;  %4352 = vmatpush1.bf16.msra.mxu1 %v6339_v60  ;;  %v8678_v56 = vld [vmem:[#allocation41_spill] sm:$0xff]  ;;  %v8679_v60 = vld [vmem:[#allocation42_spill] sm:$0xff] }
 0x2c1   :  { %4290 = vmatprep.subr.bf16.mxu0 %v6344_v3  ;;  %4354 = vmatprep.subr.bf16.mxu1 %v6346_v9  ;;  %v8680_v3 = vld [vmem:[#allocation43_spill] sm:$0xff]  ;;  %v8681_v9 = vld [vmem:[#allocation44_spill] sm:$0xff] }
 0x2c4   :  { %4292 = vmatpush1.bf16.msra.mxu0 %v6348_v11  ;;  %4356 = vmatpush1.bf16.msra.mxu1 %v6351_v16  ;;  %v8682_v11 = vld [vmem:[#allocation45_spill] sm:$0xff]  ;;  %v8683_v16 = vld [vmem:[#allocation46_spill] sm:$0xff] }
 0x2c5   :  { %4294 = vmatprep.subr.bf16.mxu0 %v6355_v23  ;;  %4358 = vmatprep.subr.bf16.mxu1 %v6357_v24  ;;  %v8684_v23 = vld [vmem:[#allocation47_spill] sm:$0xff]  ;;  %v8685_v24 = vld [vmem:[#allocation48_spill] sm:$0xff] }
 0x2c8   :  { %4296 = vmatpush1.bf16.msra.mxu0 %v6360_v29  ;;  %4360 = vmatpush1.bf16.msra.mxu1 %v6364_v37  ;;  %v8686_v29 = vld [vmem:[#allocation49_spill] sm:$0xff]  ;;  %v8687_v37 = vld [vmem:[#allocation50_spill] sm:$0xff] }
 0x2c9   :  { %4298 = vmatprep.subr.bf16.mxu0 %v8677_v2  ;;  %4362 = vmatprep.subr.bf16.mxu1 %v8678_v56  ;;  %v8688_v2 = vld [vmem:[#allocation51_spill] sm:$0xff]  ;;  %v8689_v56 = vld [vmem:[#allocation52_spill] sm:$0xff] }
 0x2cc   :  { %4300 = vmatpush1.bf16.msra.mxu0 %v8679_v60  ;;  %4364 = vmatpush1.bf16.msra.mxu1 %v8680_v3  ;;  %v8690_v60 = vld [vmem:[#allocation53_spill] sm:$0xff]  ;;  %v8691_v3 = vld [vmem:[#allocation54_spill] sm:$0xff] }
 0x2cd   :  { %4302 = vmatprep.subr.bf16.mxu0 %v8681_v9  ;;  %4366 = vmatprep.subr.bf16.mxu1 %v8682_v11  ;;  %v8692_v9 = vld [vmem:[#allocation55_spill] sm:$0xff]  ;;  %v8693_v11 = vld [vmem:[#allocation56_spill] sm:$0xff] }
 0x2d0   :  { %4304 = vmatpush1.bf16.msra.mxu0 %v8683_v16  ;;  %4368 = vmatpush1.bf16.msra.mxu1 %v8684_v23  ;;  %v8694_v16 = vld [vmem:[#allocation57_spill] sm:$0xff]  ;;  %v8695_v23 = vld [vmem:[#allocation58_spill] sm:$0xff] }
 0x2d1   :  { %4306 = vmatprep.subr.bf16.mxu0 %v8685_v24  ;;  %4370 = vmatprep.subr.bf16.mxu1 %v8686_v29  ;;  %v8696_v24 = vld [vmem:[#allocation59_spill] sm:$0xff]  ;;  %v8697_v29 = vld [vmem:[#allocation60_spill] sm:$0xff] }
 0x2d4   :  { %4308 = vmatpush1.bf16.msra.mxu0 %v8687_v37  ;;  %4372 = vmatpush1.bf16.msra.mxu1 %v8688_v2  ;;  %v8698_v37 = vld [vmem:[#allocation61_spill] sm:$0xff]  ;;  %v8699_v2 = vld [vmem:[#allocation62_spill] sm:$0xff] }
 0x2d5   :  { %4310 = vmatprep.subr.bf16.mxu0 %v8689_v56  ;;  %4374 = vmatprep.subr.bf16.mxu1 %v8690_v60  ;;  %v8700_v56 = vld [vmem:[#allocation63_spill] sm:$0xff]  ;;  %v8701_v60 = vld [vmem:[#allocation64_spill] sm:$0xff] }
 0x2d8   :  { %4312 = vmatpush1.bf16.msra.mxu0 %v8691_v3  ;;  %4376 = vmatpush1.bf16.msra.mxu1 %v8692_v9  ;;  %v8702_v3 = vld [vmem:[#allocation65_spill] sm:$0xff]  ;;  %v8703_v9 = vld [vmem:[#allocation66_spill] sm:$0xff] }
 0x2d9   :  { %4314 = vmatprep.subr.bf16.mxu0 %v8693_v11  ;;  %4378 = vmatprep.subr.bf16.mxu1 %v8694_v16  ;;  %v8704_v11 = vld [vmem:[#allocation67_spill] sm:$0xff]  ;;  %v8705_v16 = vld [vmem:[#allocation68_spill] sm:$0xff] }
 0x2dc   :  { %4316 = vmatpush1.bf16.msra.mxu0 %v8695_v23  ;;  %4380 = vmatpush1.bf16.msra.mxu1 %v8696_v24  ;;  %v8706_v23 = vld [vmem:[#allocation69_spill] sm:$0xff]  ;;  %v8707_v24 = vld [vmem:[#allocation70_spill] sm:$0xff] }
 0x2dd   :  { %4318 = vmatprep.subr.bf16.mxu0 %v8697_v29  ;;  %4382 = vmatprep.subr.bf16.mxu1 %v8698_v37  ;;  %v8708_v29 = vld [vmem:[#allocation71_spill] sm:$0xff]  ;;  %v8709_v37 = vld [vmem:[#allocation72_spill] sm:$0xff] }
 0x2e0   :  { %4320 = vmatpush1.bf16.msra.mxu0 %v8699_v2  ;;  %4384 = vmatpush1.bf16.msra.mxu1 %v8700_v56  ;;  %v8710_v2 = vld [vmem:[#allocation73_spill] sm:$0xff] }
 0x2e1   :  { %4322 = vmatprep.subr.bf16.mxu0 %v8701_v60  ;;  %4386 = vmatprep.subr.bf16.mxu1 %v8702_v3 }
 0x2e4   :  { %4324 = vmatpush1.bf16.msra.mxu0 %v8703_v9  ;;  %4388 = vmatpush1.bf16.msra.mxu1 %v8704_v11 }
 0x2e5   :  { %4326 = vmatprep.subr.bf16.mxu0 %v8705_v16  ;;  %4390 = vmatprep.subr.bf16.mxu1 %v8706_v23  ;;  %v8713_v23 = vld [vmem:[#allocation143_spill] sm:$0xff] }
 0x2e8   :  { %4328 = vmatpush1.bf16.msra.mxu0 %v8707_v24  ;;  %4392 = vmatpush1.bf16.msra.mxu1 %v8708_v29  ;;  %v8714_v29 = vld [vmem:[#allocation144_spill] sm:$0xff] }
 0x2e9   :  { %4394 = vmatprep.subr.bf16.mxu0 %v8709_v37  ;;  %4458 = vmatprep.subr.bf16.mxu1 %v8710_v2 }
 0x33e   :  { %v1083_v56 = vpop.f32.mrb[6].mxu0  ;;  %v1154_v60 = vpop.f32.mrb[6].mxu1 }
 0x33f   :  { %v1301_v3 = vadd.f32 %v1083_v56, %v8711_v55  ;;  %v1085_v51 = vpop.f32.mrb[7].mxu0  ;;  %v1156_v9 = vpop.f32.mrb[7].mxu1  ;;  %v1303_v33 = vadd.f32 %v1154_v60, %v8714_v29 }
 0x340   :  { %v1302_v11 = vadd.f32 %v1085_v51, %v8712_v46  ;;  %v1304_v24 = vadd.f32 %v1156_v9, %v8713_v23 }
 0x341   :  { %v3541_v41 = vmul.f32 -1.442695, %v1301_v3 }
 0x342   :  { %v3542_v16 = vmul.f32 -1.442695, %v1302_v11  ;;  %v3543_v43 = vmul.f32 -1.442695, %v1304_v24 }
 0x343   :  { %5854 = vpow2.f32 %v3541_v41 }
 0x344   :  { %5856 = vpow2.f32 %v3542_v16  ;;  %v8715_v16 = vld [vmem:[#allocation145_spill] sm:$0xff] }
 0x345   :  { %5858 = vpow2.f32 %v3543_v43 }
 0x346   :  { %5860 = vtanh.f32 %v1303_v33 }
 0x34d   :  { %v5855_v37 = vpop.eup %5854 }
 0x34e   :  { %v5857_v42 = vpop.eup %5856  ;;  %v1308_v2 = vadd.f32 1.0, %v5855_v37 }
 0x34f   :  { %v1314_v31 = vadd.f32 1.0, %v5857_v42  ;;  %v5859_v56 = vpop.eup %5858  ;;  %v8718_v42 = vld [vmem:[#allocation75_spill] sm:$0xff] }
 0x350   :  { %5862 = vrcp.f32 %v1308_v2  ;;  %v5861_v55 = vpop.eup %5860  ;;  %v1321_v41 = vadd.f32 1.0, %v5859_v56  ;;  %v8719_v56 = vld [vmem:[#allocation76_spill] sm:$0xff] }
 0x351   :  { %5864 = vrcp.f32 %v1314_v31 }
 0x352   :  { %5866 = vrcp.f32 %v1321_v41 }
 0x35a   :  { %v5863_v51 = vpop.eup %5862 }
 0x35b   :  { %v5865_v3 = vpop.eup %5864  ;;  %v1325_v11 = vmul.f32 %v5863_v51, %v5861_v55 }
 0x35c   :  { %v1324_v46 = vmul.f32 %v5865_v3, %v8715_v16  ;;  %v5867_v60 = vpop.eup %5866 }
 0x35e   :  { %v6941_v9 = vadd.f32 %v1325_v11, %v1324_v46 }
 0x360   :  { %8716 = vst [vmem:[#allocation77_spill] sm:$0xff] %v6941_v9  ;;  %5868 = vtanh.f32 %v6941_v9 }
 0x36a   :  { %v5869_v24 = vpop.eup %5868 }
 0x36b   :  { %v6944_v43 = vmul.f32 %v5869_v24, %v5867_v60 }
 0x36d   :  { %8717 = vst [vmem:[#allocation78_spill] sm:$0xff] %v6944_v43  ;;  %1421 = vmatprep.mubr.f32.mxu0 %v6944_v43  ;;  %1492 = vmatprep.mubr.f32.mxu1 %v6944_v43 }
 0x37e   :  { %v1225_v31 = vpop.f32.mrb[8].mxu0  ;;  %v1296_v33 = vpop.f32.mrb[8].mxu1 }
 0x37f   :  { %v1329_v55 = vadd.f32 %v1225_v31, %v8718_v42  ;;  %v1227_v37 = vpop.f32.mrb[9].mxu0  ;;  %v1298_v2 = vpop.f32.mrb[9].mxu1  ;;  %v1331_v16 = vadd.f32 %v1296_v33, %v8625_v40 }
 0x380   :  { %v1330_v46 = vadd.f32 %v1227_v37, %v8719_v56  ;;  %v1332_v11 = vadd.f32 %v1298_v2, %v8624_v44 }
 0x381   :  { %v3544_v51 = vmul.f32 -1.442695, %v1329_v55 }
 0x382   :  { %v3545_v3 = vmul.f32 -1.442695, %v1330_v46  ;;  %v3546_v41 = vmul.f32 -1.442695, %v1332_v11 }
 0x383   :  { %5870 = vpow2.f32 %v3544_v51 }
 0x384   :  { %5872 = vpow2.f32 %v3545_v3 }
 0x385   :  { %5874 = vpow2.f32 %v3546_v41 }
 0x386   :  { %5876 = vtanh.f32 %v1331_v16  ;;  %v8724_v16 = vld [vmem:[#allocation89_spill] sm:$0xff] }
 0x38d   :  { %v5871_v60 = vpop.eup %5870 }
 0x38e   :  { %v5873_v24 = vpop.eup %5872  ;;  %v1336_v9 = vadd.f32 1.0, %v5871_v60  ;;  %v8725_v60 = vld [vmem:[#allocation90_spill] sm:$0xff] }
 0x38f   :  { %v1342_v29 = vadd.f32 1.0, %v5873_v24  ;;  %v5875_v31 = vpop.eup %5874  ;;  %v8726_v24 = vld [vmem:[#allocation91_spill] sm:$0xff] }
 0x390   :  { %5878 = vrcp.f32 %v1336_v9  ;;  %v5877_v42 = vpop.eup %5876  ;;  %v1349_v51 = vadd.f32 1.0, %v5875_v31  ;;  %v8722_v9 = vld [vmem:[#allocation87_spill] sm:$0xff]  ;;  %v8727_v31 = vld [vmem:[#allocation92_spill] sm:$0xff] }
 0x391   :  { %5880 = vrcp.f32 %v1342_v29  ;;  %v8720_v29 = vld [vmem:[#allocation85_spill] sm:$0xff] }
 0x392   :  { %5882 = vrcp.f32 %v1349_v51  ;;  %v8731_v51 = vld [vmem:[#allocation96_spill] sm:$0xff] }
 0x39a   :  { %v5879_v37 = vpop.eup %5878 }
 0x39b   :  { %v5881_v55 = vpop.eup %5880  ;;  %v1353_v46 = vmul.f32 %v5879_v37, %v5877_v42  ;;  %v8723_v42 = vld [vmem:[#allocation88_spill] sm:$0xff]  ;;  %v8728_v37 = vld [vmem:[#allocation93_spill] sm:$0xff] }
 0x39c   :  { %v1352_v3 = vmul.f32 %v5881_v55, %v6797_v12  ;;  %v5883_v33 = vpop.eup %5882  ;;  %v8721_v12 = vld [vmem:[#allocation86_spill] sm:$0xff] }
 0x39d   :  { %v8729_v55 = vld [vmem:[#allocation94_spill] sm:$0xff] }
 0x39e   :  { %v6953_v2 = vadd.f32 %v1353_v46, %v1352_v3  ;;  %v8730_v46 = vld [vmem:[#allocation95_spill] sm:$0xff]  ;;  %v8732_v3 = vld [vmem:[#allocation97_spill] sm:$0xff] }
 0x3a0   :  { %5884 = vtanh.f32 %v6953_v2 }
 0x3aa   :  { %v5885_v11 = vpop.eup %5884 }
 0x3ab   :  { %v6956_v41 = vmul.f32 %v5885_v11, %v5883_v33  ;;  %v8733_v33 = vld [vmem:[#allocation98_spill] sm:$0xff]  ;;  %v8734_v11 = vld [vmem:[#allocation99_spill] sm:$0xff] }
 0x3ad   :  { %1422 = vmatmul.mubr.f32.vlgmr.msra.gmra.mrb[10].mxu0 %v6956_v41  ;;  %1493 = vmatmul.mubr.f32.vlgmr.msra.gmra.mrb[10].mxu1 %v6956_v41 }
 0x3ae   :  { %4396 = vmatpush1.bf16.msra.mxu0 %v8627_v38  ;;  %4460 = vmatpush1.bf16.msra.mxu1 %v8628_v59 }
 0x3af   :  { %1563 = vmatprep.mubr.f32.mxu0 %v6944_v43  ;;  %1634 = vmatprep.mubr.f32.mxu1 %v6944_v43  ;;  %v8735_v43 = vld [vmem:[#allocation100_spill] sm:$0xff] }
 0x3b0   :  { %4398 = vmatprep.subr.bf16.mxu0 %v8629_v53  ;;  %4462 = vmatprep.subr.bf16.mxu1 %v8630_v35 }
 0x3b2   :  { %4400 = vmatpush1.bf16.msra.mxu0 %v8631_v21  ;;  %4464 = vmatpush1.bf16.msra.mxu1 %v8720_v29 }
 0x3b3   :  { %4402 = vmatprep.subr.bf16.mxu0 %v8721_v12  ;;  %4466 = vmatprep.subr.bf16.mxu1 %v8722_v9 }
 0x3b6   :  { %4404 = vmatpush1.bf16.msra.mxu0 %v8723_v42  ;;  %4468 = vmatpush1.bf16.msra.mxu1 %v8724_v16 }
 0x3b7   :  { %4406 = vmatprep.subr.bf16.mxu0 %v8725_v60  ;;  %4470 = vmatprep.subr.bf16.mxu1 %v8726_v24  ;;  %v8736_v60 = vld [vmem:[#allocation101_spill] sm:$0xff]  ;;  %v8737_v24 = vld [vmem:[#allocation102_spill] sm:$0xff] }
 0x3ba   :  { %4408 = vmatpush1.bf16.msra.mxu0 %v8727_v31  ;;  %4472 = vmatpush1.bf16.msra.mxu1 %v8728_v37  ;;  %v8738_v31 = vld [vmem:[#allocation103_spill] sm:$0xff]  ;;  %v8739_v37 = vld [vmem:[#allocation104_spill] sm:$0xff] }
 0x3bb   :  { %4410 = vmatprep.subr.bf16.mxu0 %v8729_v55  ;;  %4474 = vmatprep.subr.bf16.mxu1 %v8730_v46  ;;  %v8740_v55 = vld [vmem:[#allocation105_spill] sm:$0xff]  ;;  %v8741_v46 = vld [vmem:[#allocation106_spill] sm:$0xff] }
 0x3be   :  { %4412 = vmatpush1.bf16.msra.mxu0 %v8731_v51  ;;  %4476 = vmatpush1.bf16.msra.mxu1 %v8732_v3  ;;  %v8742_v51 = vld [vmem:[#allocation107_spill] sm:$0xff]  ;;  %v8743_v3 = vld [vmem:[#allocation108_spill] sm:$0xff] }
 0x3bf   :  { %4414 = vmatprep.subr.bf16.mxu0 %v8733_v33  ;;  %4478 = vmatprep.subr.bf16.mxu1 %v8734_v11  ;;  %v8744_v33 = vld [vmem:[#allocation109_spill] sm:$0xff]  ;;  %v8745_v11 = vld [vmem:[#allocation110_spill] sm:$0xff] }
 0x3c2   :  { %4416 = vmatpush1.bf16.msra.mxu0 %v8735_v43  ;;  %4480 = vmatpush1.bf16.msra.mxu1 %v8736_v60  ;;  %v8746_v43 = vld [vmem:[#allocation111_spill] sm:$0xff]  ;;  %v8747_v60 = vld [vmem:[#allocation112_spill] sm:$0xff] }
 0x3c3   :  { %4418 = vmatprep.subr.bf16.mxu0 %v8737_v24  ;;  %4482 = vmatprep.subr.bf16.mxu1 %v8738_v31  ;;  %v8748_v24 = vld [vmem:[#allocation113_spill] sm:$0xff]  ;;  %v8749_v31 = vld [vmem:[#allocation114_spill] sm:$0xff] }
 0x3c6   :  { %4420 = vmatpush1.bf16.msra.mxu0 %v8739_v37  ;;  %4484 = vmatpush1.bf16.msra.mxu1 %v8740_v55  ;;  %v8750_v37 = vld [vmem:[#allocation115_spill] sm:$0xff]  ;;  %v8751_v55 = vld [vmem:[#allocation116_spill] sm:$0xff] }
 0x3c7   :  { %4422 = vmatprep.subr.bf16.mxu0 %v8741_v46  ;;  %4486 = vmatprep.subr.bf16.mxu1 %v8742_v51  ;;  %v8752_v46 = vld [vmem:[#allocation117_spill] sm:$0xff]  ;;  %v8753_v51 = vld [vmem:[#allocation118_spill] sm:$0xff] }
 0x3ca   :  { %4424 = vmatpush1.bf16.msra.mxu0 %v8743_v3  ;;  %4488 = vmatpush1.bf16.msra.mxu1 %v8744_v33 }
 0x3cb   :  { %4426 = vmatprep.subr.bf16.mxu0 %v8745_v11  ;;  %4490 = vmatprep.subr.bf16.mxu1 %v8746_v43 }
 0x3ce   :  { %4428 = vmatpush1.bf16.msra.mxu0 %v8747_v60  ;;  %4492 = vmatpush1.bf16.msra.mxu1 %v8748_v24 }
 0x3cf   :  { %4430 = vmatprep.subr.bf16.mxu0 %v8749_v31  ;;  %4494 = vmatprep.subr.bf16.mxu1 %v8750_v37 }
 0x3d2   :  { %4432 = vmatpush1.bf16.msra.mxu0 %v8751_v55  ;;  %4496 = vmatpush1.bf16.msra.mxu1 %v8752_v46 }
 0x3d3   :  { %4434 = vmatprep.subr.bf16.mxu0 %v8753_v51  ;;  %4498 = vmatprep.subr.bf16.mxu1 %v8666_v0 }
 0x3d6   :  { %4436 = vmatpush1.bf16.msra.mxu0 %v8667_v45  ;;  %4500 = vmatpush1.bf16.msra.mxu1 %v8668_v27 }
 0x3d7   :  { %4438 = vmatprep.subr.bf16.mxu0 %v8669_v50  ;;  %4502 = vmatprep.subr.bf16.mxu1 %v8670_v26 }
 0x3da   :  { %4440 = vmatpush1.bf16.msra.mxu0 %v8671_v62  ;;  %4504 = vmatpush1.bf16.msra.mxu1 %v8672_v5 }
 0x3db   :  { %4442 = vmatprep.subr.bf16.mxu0 %v8673_v52  ;;  %4506 = vmatprep.subr.bf16.mxu1 %v8674_v39 }
 0x3de   :  { %4444 = vmatpush1.bf16.msra.mxu0 %v8675_v49  ;;  %4508 = vmatpush1.bf16.msra.mxu1 %v8676_v15 }
 0x3df   :  { %4446 = vmatprep.subr.bf16.mxu0 %v6656_v30  ;;  %4510 = vmatprep.subr.bf16.mxu1 %v6658_v6 }
 0x3e2   :  { %4448 = vmatpush1.bf16.msra.mxu0 %v6662_v28  ;;  %4512 = vmatpush1.bf16.msra.mxu1 %v6664_v4 }
 0x3e3   :  { %4450 = vmatprep.subr.bf16.mxu0 %v6668_v14  ;;  %4514 = vmatprep.subr.bf16.mxu1 %v6670_v18 }
 0x3e6   :  { %4452 = vmatpush1.bf16.msra.mxu0 %v6674_v47  ;;  %4516 = vmatpush1.bf16.msra.mxu1 %v6676_v57 }
 0x3e7   :  { %4454 = vmatprep.subr.bf16.mxu0 %v6680_v63  ;;  %4518 = vmatprep.subr.bf16.mxu1 %v6682_v17 }
 0x3ea   :  { %4456 = vmatpush1.bf16.msra.mxu0 %v6686_v54  ;;  %4520 = vmatpush1.bf16.msra.mxu1 %v6688_v34 }
 0x3eb   :  { %4522 = vmatprep.subr.bf16.mxu0 %v6262_v48  ;;  %4586 = vmatprep.subr.bf16.mxu1 %v6275_v1  ;;  %v8807_v1 = vld [vmem:[#allocation142_spill] sm:$0xff] }
 0x3ed   :  { %1564 = vmatmul.mubr.f32.vlgmr.msra.gmra.mrb[12].mxu0 %v6956_v41  ;;  %1635 = vmatmul.mubr.f32.vlgmr.msra.gmra.mrb[12].mxu1 %v6956_v41  ;;  %v8754_v41 = vld [vmem:[#allocation20_spill] sm:$0xff] }
 0x3ee   :  { %4524 = vmatpush1.bf16.msra.mxu0 %v6270_v58  ;;  %4588 = vmatpush1.bf16.msra.mxu1 %v6282_v8  ;;  %v8806_v8 = vld [vmem:[#allocation74_spill] sm:$0xff] }
 0x3ef   :  { %4526 = vmatprep.subr.bf16.mxu0 %v6273_v61  ;;  %4590 = vmatprep.subr.bf16.mxu1 %v6288_v13  ;;  %v8755_v61 = vld [vmem:[#allocation25_spill] sm:$0xff]  ;;  %v8756_v13 = vld [vmem:[#allocation22_spill] sm:$0xff] }
 0x3f2   :  { %4528 = vmatpush1.bf16.msra.mxu0 %v6279_v7  ;;  %4592 = vmatpush1.bf16.msra.mxu1 %v6295_v20  ;;  %v8757_v7 = vld [vmem:[#allocation26_spill] sm:$0xff]  ;;  %v8758_v20 = vld [vmem:[#allocation24_spill] sm:$0xff] }
 0x3f3   :  { %4530 = vmatprep.subr.bf16.mxu0 %v6285_v10  ;;  %4594 = vmatprep.subr.bf16.mxu1 %v6301_v25  ;;  %v8759_v10 = vld [vmem:[#allocation27_spill] sm:$0xff]  ;;  %v8760_v25 = vld [vmem:[#allocation28_spill] sm:$0xff] }
 0x3f6   :  { %4532 = vmatpush1.bf16.msra.mxu0 %v6292_v19  ;;  %4596 = vmatpush1.bf16.msra.mxu1 %v6308_v32  ;;  %v8761_v19 = vld [vmem:[#allocation29_spill] sm:$0xff]  ;;  %v8762_v32 = vld [vmem:[#allocation30_spill] sm:$0xff] }
 0x3f7   :  { %4534 = vmatprep.subr.bf16.mxu0 %v6298_v22  ;;  %4598 = vmatprep.subr.bf16.mxu1 %v6314_v36  ;;  %v8763_v22 = vld [vmem:[#allocation31_spill] sm:$0xff]  ;;  %v8764_v36 = vld [vmem:[#allocation32_spill] sm:$0xff] }
 0x3fa   :  { %4536 = vmatpush1.bf16.msra.mxu0 %v8754_v41  ;;  %4600 = vmatpush1.bf16.msra.mxu1 %v8755_v61  ;;  %v8765_v41 = vld [vmem:[#allocation33_spill] sm:$0xff]  ;;  %v8766_v61 = vld [vmem:[#allocation34_spill] sm:$0xff] }
 0x3fb   :  { %4538 = vmatprep.subr.bf16.mxu0 %v8756_v13  ;;  %4602 = vmatprep.subr.bf16.mxu1 %v8757_v7  ;;  %v8767_v13 = vld [vmem:[#allocation35_spill] sm:$0xff]  ;;  %v8768_v7 = vld [vmem:[#allocation36_spill] sm:$0xff] }
 0x3fe   :  { %4540 = vmatpush1.bf16.msra.mxu0 %v8758_v20  ;;  %4604 = vmatpush1.bf16.msra.mxu1 %v8759_v10  ;;  %v8769_v20 = vld [vmem:[#allocation37_spill] sm:$0xff]  ;;  %v8770_v10 = vld [vmem:[#allocation38_spill] sm:$0xff] }
 0x3ff   :  { %4542 = vmatprep.subr.bf16.mxu0 %v8760_v25  ;;  %4606 = vmatprep.subr.bf16.mxu1 %v8761_v19  ;;  %v8771_v25 = vld [vmem:[#allocation39_spill] sm:$0xff]  ;;  %v8772_v19 = vld [vmem:[#allocation40_spill] sm:$0xff] }
 0x402   :  { %4544 = vmatpush1.bf16.msra.mxu0 %v8762_v32  ;;  %4608 = vmatpush1.bf16.msra.mxu1 %v8763_v22  ;;  %v8773_v32 = vld [vmem:[#allocation41_spill] sm:$0xff]  ;;  %v8774_v22 = vld [vmem:[#allocation42_spill] sm:$0xff] }
 0x403   :  { %4546 = vmatprep.subr.bf16.mxu0 %v8764_v36  ;;  %4610 = vmatprep.subr.bf16.mxu1 %v8765_v41  ;;  %v8775_v36 = vld [vmem:[#allocation43_spill] sm:$0xff]  ;;  %v8776_v41 = vld [vmem:[#allocation44_spill] sm:$0xff] }
 0x406   :  { %4548 = vmatpush1.bf16.msra.mxu0 %v8766_v61  ;;  %4612 = vmatpush1.bf16.msra.mxu1 %v8767_v13  ;;  %v8777_v61 = vld [vmem:[#allocation45_spill] sm:$0xff]  ;;  %v8778_v13 = vld [vmem:[#allocation46_spill] sm:$0xff] }
 0x407   :  { %4550 = vmatprep.subr.bf16.mxu0 %v8768_v7  ;;  %4614 = vmatprep.subr.bf16.mxu1 %v8769_v20  ;;  %v8779_v7 = vld [vmem:[#allocation47_spill] sm:$0xff]  ;;  %v8780_v20 = vld [vmem:[#allocation48_spill] sm:$0xff] }
 0x40a   :  { %4552 = vmatpush1.bf16.msra.mxu0 %v8770_v10  ;;  %4616 = vmatpush1.bf16.msra.mxu1 %v8771_v25  ;;  %v8781_v10 = vld [vmem:[#allocation49_spill] sm:$0xff]  ;;  %v8782_v25 = vld [vmem:[#allocation50_spill] sm:$0xff] }
 0x40b   :  { %4554 = vmatprep.subr.bf16.mxu0 %v8772_v19  ;;  %4618 = vmatprep.subr.bf16.mxu1 %v8773_v32  ;;  %v8783_v19 = vld [vmem:[#allocation51_spill] sm:$0xff]  ;;  %v8784_v32 = vld [vmem:[#allocation52_spill] sm:$0xff] }
 0x40e   :  { %4556 = vmatpush1.bf16.msra.mxu0 %v8774_v22  ;;  %4620 = vmatpush1.bf16.msra.mxu1 %v8775_v36  ;;  %v8785_v22 = vld [vmem:[#allocation53_spill] sm:$0xff]  ;;  %v8786_v36 = vld [vmem:[#allocation54_spill] sm:$0xff] }
 0x40f   :  { %4558 = vmatprep.subr.bf16.mxu0 %v8776_v41  ;;  %4622 = vmatprep.subr.bf16.mxu1 %v8777_v61  ;;  %v8787_v41 = vld [vmem:[#allocation55_spill] sm:$0xff]  ;;  %v8788_v61 = vld [vmem:[#allocation56_spill] sm:$0xff] }
 0x412   :  { %4560 = vmatpush1.bf16.msra.mxu0 %v8778_v13  ;;  %4624 = vmatpush1.bf16.msra.mxu1 %v8779_v7  ;;  %v8789_v13 = vld [vmem:[#allocation57_spill] sm:$0xff]  ;;  %v8790_v7 = vld [vmem:[#allocation58_spill] sm:$0xff] }
 0x413   :  { %4562 = vmatprep.subr.bf16.mxu0 %v8780_v20  ;;  %4626 = vmatprep.subr.bf16.mxu1 %v8781_v10  ;;  %v8791_v20 = vld [vmem:[#allocation59_spill] sm:$0xff]  ;;  %v8792_v10 = vld [vmem:[#allocation60_spill] sm:$0xff] }
 0x416   :  { %4564 = vmatpush1.bf16.msra.mxu0 %v8782_v25  ;;  %4628 = vmatpush1.bf16.msra.mxu1 %v8783_v19  ;;  %v8793_v25 = vld [vmem:[#allocation61_spill] sm:$0xff]  ;;  %v8794_v19 = vld [vmem:[#allocation62_spill] sm:$0xff] }
 0x417   :  { %4566 = vmatprep.subr.bf16.mxu0 %v8784_v32  ;;  %4630 = vmatprep.subr.bf16.mxu1 %v8785_v22  ;;  %v8795_v32 = vld [vmem:[#allocation63_spill] sm:$0xff]  ;;  %v8796_v22 = vld [vmem:[#allocation64_spill] sm:$0xff] }
 0x41a   :  { %4568 = vmatpush1.bf16.msra.mxu0 %v8786_v36  ;;  %4632 = vmatpush1.bf16.msra.mxu1 %v8787_v41  ;;  %v8797_v36 = vld [vmem:[#allocation65_spill] sm:$0xff]  ;;  %v8798_v41 = vld [vmem:[#allocation66_spill] sm:$0xff] }
 0x41b   :  { %4570 = vmatprep.subr.bf16.mxu0 %v8788_v61  ;;  %4634 = vmatprep.subr.bf16.mxu1 %v8789_v13  ;;  %v8799_v61 = vld [vmem:[#allocation67_spill] sm:$0xff]  ;;  %v8800_v13 = vld [vmem:[#allocation68_spill] sm:$0xff] }
 0x41e   :  { %4572 = vmatpush1.bf16.msra.mxu0 %v8790_v7  ;;  %4636 = vmatpush1.bf16.msra.mxu1 %v8791_v20  ;;  %v8801_v7 = vld [vmem:[#allocation69_spill] sm:$0xff]  ;;  %v8802_v20 = vld [vmem:[#allocation70_spill] sm:$0xff] }
 0x41f   :  { %4574 = vmatprep.subr.bf16.mxu0 %v8792_v10  ;;  %4638 = vmatprep.subr.bf16.mxu1 %v8793_v25  ;;  %v8803_v10 = vld [vmem:[#allocation71_spill] sm:$0xff]  ;;  %v8804_v25 = vld [vmem:[#allocation72_spill] sm:$0xff] }
 0x422   :  { %4576 = vmatpush1.bf16.msra.mxu0 %v8794_v19  ;;  %4640 = vmatpush1.bf16.msra.mxu1 %v8795_v32  ;;  %v8805_v19 = vld [vmem:[#allocation73_spill] sm:$0xff] }
 0x423   :  { %4578 = vmatprep.subr.bf16.mxu0 %v8796_v22  ;;  %4642 = vmatprep.subr.bf16.mxu1 %v8797_v36 }
 0x426   :  { %4580 = vmatpush1.bf16.msra.mxu0 %v8798_v41  ;;  %4644 = vmatpush1.bf16.msra.mxu1 %v8799_v61 }
 0x427   :  { %4582 = vmatprep.subr.bf16.mxu0 %v8800_v13  ;;  %4646 = vmatprep.subr.bf16.mxu1 %v8801_v7 }
 0x42a   :  { %4584 = vmatpush1.bf16.msra.mxu0 %v8802_v20  ;;  %4648 = vmatpush1.bf16.msra.mxu1 %v8803_v10  ;;  %v8808_v10 = vld [vmem:[#allocation144_spill] sm:$0xff] }
 0x42b   :  { %4650 = vmatprep.subr.bf16.mxu0 %v8804_v25  ;;  %4714 = vmatprep.subr.bf16.mxu1 %v8805_v19 }
 0x480   :  { %v1423_v32 = vpop.f32.mrb[10].mxu0  ;;  %v1494_v22 = vpop.f32.mrb[10].mxu1 }
 0x481   :  { %v1641_v36 = vadd.f32 %v1423_v32, %v8806_v8  ;;  %v1425_v58 = vpop.f32.mrb[11].mxu0  ;;  %v1496_v41 = vpop.f32.mrb[11].mxu1  ;;  %v1643_v34 = vadd.f32 %v1494_v22, %v8808_v10 }
 0x482   :  { %v1642_v61 = vadd.f32 %v1425_v58, %v8807_v1  ;;  %v1644_v20 = vadd.f32 %v1496_v41, %v8713_v23 }
 0x483   :  { %v3547_v48 = vmul.f32 -1.442695, %v1641_v36 }
 0x484   :  { %v3548_v13 = vmul.f32 -1.442695, %v1642_v61  ;;  %v3549_v7 = vmul.f32 -1.442695, %v1644_v20 }
 0x485   :  { %5886 = vpow2.f32 %v3547_v48 }
 0x486   :  { %5888 = vpow2.f32 %v3548_v13  ;;  %v8809_v13 = vld [vmem:[#allocation77_spill] sm:$0xff] }
 0x487   :  { %5890 = vpow2.f32 %v3549_v7 }
 0x488   :  { %5892 = vtanh.f32 %v1643_v34 }
 0x48f   :  { %v5887_v25 = vpop.eup %5886 }
 0x490   :  { %v5889_v54 = vpop.eup %5888  ;;  %v1648_v19 = vadd.f32 1.0, %v5887_v25 }
 0x491   :  { %v1654_v17 = vadd.f32 1.0, %v5889_v54  ;;  %v5891_v32 = vpop.eup %5890 }
 0x492   :  { %5894 = vrcp.f32 %v1648_v19  ;;  %v5893_v8 = vpop.eup %5892  ;;  %v1661_v48 = vadd.f32 1.0, %v5891_v32 }
 0x493   :  { %5896 = vrcp.f32 %v1654_v17  ;;  %v8812_v17 = vld [vmem:[#allocation75_spill] sm:$0xff] }
 0x494   :  { %5898 = vrcp.f32 %v1661_v48 }
 0x49c   :  { %v5895_v58 = vpop.eup %5894 }
 0x49d   :  { %v5897_v36 = vpop.eup %5896  ;;  %v1665_v61 = vmul.f32 %v5895_v58, %v5893_v8 }
 0x49e   :  { %v1664_v1 = vmul.f32 %v5897_v36, %v8809_v13  ;;  %v5899_v20 = vpop.eup %5898 }
 0x4a0   :  { %v7097_v41 = vadd.f32 %v1665_v61, %v1664_v1 }
 0x4a2   :  { %8810 = vst [vmem:[#allocation79_spill] sm:$0xff] %v7097_v41  ;;  %5900 = vtanh.f32 %v7097_v41 }
 0x4ac   :  { %v5901_v22 = vpop.eup %5900 }
 0x4ad   :  { %v7100_v7 = vmul.f32 %v5901_v22, %v5899_v20 }
 0x4af   :  { %8811 = vst [vmem:[#allocation80_spill] sm:$0xff] %v7100_v7  ;;  %1761 = vmatprep.mubr.f32.mxu0 %v7100_v7  ;;  %1832 = vmatprep.mubr.f32.mxu1 %v7100_v7 }
 0x4c0   :  { %v1565_v19 = vpop.f32.mrb[12].mxu0  ;;  %v1636_v25 = vpop.f32.mrb[12].mxu1 }
 0x4c1   :  { %v1669_v8 = vadd.f32 %v1565_v19, %v8812_v17  ;;  %v1567_v54 = vpop.f32.mrb[13].mxu0  ;;  %v1638_v34 = vpop.f32.mrb[13].mxu1  ;;  %v1671_v48 = vadd.f32 %v1636_v25, %v8625_v40 }
 0x4c2   :  { %v1670_v1 = vadd.f32 %v1567_v54, %v8719_v56  ;;  %v1672_v36 = vadd.f32 %v1638_v34, %v8624_v44 }
 0x4c3   :  { %v3550_v32 = vmul.f32 -1.442695, %v1669_v8 }
 0x4c4   :  { %v3551_v58 = vmul.f32 -1.442695, %v1670_v1  ;;  %v3552_v61 = vmul.f32 -1.442695, %v1672_v36 }
 0x4c5   :  { %5902 = vpow2.f32 %v3550_v32 }
 0x4c6   :  { %5904 = vpow2.f32 %v3551_v58 }
 0x4c7   :  { %5906 = vpow2.f32 %v3552_v61 }
 0x4c8   :  { %5908 = vtanh.f32 %v1671_v48  ;;  %v8816_v48 = vld [vmem:[#allocation93_spill] sm:$0xff] }
 0x4cf   :  { %v5903_v13 = vpop.eup %5902 }
 0x4d0   :  { %v5905_v20 = vpop.eup %5904  ;;  %v1676_v22 = vadd.f32 1.0, %v5903_v13  ;;  %v8817_v13 = vld [vmem:[#allocation94_spill] sm:$0xff] }
 0x4d1   :  { %v1682_v41 = vadd.f32 1.0, %v5905_v20  ;;  %v5907_v19 = vpop.eup %5906  ;;  %v8818_v20 = vld [vmem:[#allocation95_spill] sm:$0xff] }
 0x4d2   :  { %5910 = vrcp.f32 %v1676_v22  ;;  %v5909_v17 = vpop.eup %5908  ;;  %v1689_v32 = vadd.f32 1.0, %v5907_v19  ;;  %v8819_v22 = vld [vmem:[#allocation96_spill] sm:$0xff]  ;;  %v8820_v19 = vld [vmem:[#allocation97_spill] sm:$0xff] }
 0x4d3   :  { %5912 = vrcp.f32 %v1682_v41  ;;  %v8814_v41 = vld [vmem:[#allocation91_spill] sm:$0xff] }
 0x4d4   :  { %5914 = vrcp.f32 %v1689_v32  ;;  %v8824_v32 = vld [vmem:[#allocation101_spill] sm:$0xff] }
 0x4dc   :  { %v5911_v54 = vpop.eup %5910 }
 0x4dd   :  { %v5913_v8 = vpop.eup %5912  ;;  %v1693_v1 = vmul.f32 %v5911_v54, %v5909_v17  ;;  %v8815_v17 = vld [vmem:[#allocation92_spill] sm:$0xff]  ;;  %v8821_v54 = vld [vmem:[#allocation98_spill] sm:$0xff] }
 0x4de   :  { %v1692_v58 = vmul.f32 %v5913_v8, %v6953_v2  ;;  %v5915_v25 = vpop.eup %5914  ;;  %v8813_v2 = vld [vmem:[#allocation90_spill] sm:$0xff]  ;;  %v8822_v8 = vld [vmem:[#allocation99_spill] sm:$0xff] }
 0x4e0   :  { %v7109_v34 = vadd.f32 %v1693_v1, %v1692_v58  ;;  %v8823_v1 = vld [vmem:[#allocation100_spill] sm:$0xff]  ;;  %v8825_v58 = vld [vmem:[#allocation102_spill] sm:$0xff] }
 0x4e2   :  { %5916 = vtanh.f32 %v7109_v34 }
 0x4ec   :  { %v5917_v36 = vpop.eup %5916 }
 0x4ed   :  { %v7112_v61 = vmul.f32 %v5917_v36, %v5915_v25  ;;  %v8826_v25 = vld [vmem:[#allocation103_spill] sm:$0xff]  ;;  %v8827_v36 = vld [vmem:[#allocation104_spill] sm:$0xff] }
 0x4ef   :  { %1762 = vmatmul.mubr.f32.vlgmr.msra.gmra.mrb[14].mxu0 %v7112_v61  ;;  %1833 = vmatmul.mubr.f32.vlgmr.msra.gmra.mrb[14].mxu1 %v7112_v61 }
 0x4f0   :  { %4652 = vmatpush1.bf16.msra.mxu0 %v8627_v38  ;;  %4716 = vmatpush1.bf16.msra.mxu1 %v8628_v59 }
 0x4f1   :  { %1903 = vmatprep.mubr.f32.mxu0 %v7100_v7  ;;  %1974 = vmatprep.mubr.f32.mxu1 %v7100_v7  ;;  %v8828_v7 = vld [vmem:[#allocation105_spill] sm:$0xff] }
 0x4f2   :  { %4654 = vmatprep.subr.bf16.mxu0 %v8629_v53  ;;  %4718 = vmatprep.subr.bf16.mxu1 %v8630_v35 }
 0x4f4   :  { %4656 = vmatpush1.bf16.msra.mxu0 %v8631_v21  ;;  %4720 = vmatpush1.bf16.msra.mxu1 %v8720_v29 }
 0x4f5   :  { %4658 = vmatprep.subr.bf16.mxu0 %v8721_v12  ;;  %4722 = vmatprep.subr.bf16.mxu1 %v8722_v9 }
 0x4f8   :  { %4660 = vmatpush1.bf16.msra.mxu0 %v8723_v42  ;;  %4724 = vmatpush1.bf16.msra.mxu1 %v8724_v16 }
 0x4f9   :  { %4662 = vmatprep.subr.bf16.mxu0 %v8813_v2  ;;  %4726 = vmatprep.subr.bf16.mxu1 %v8814_v41 }
 0x4fc   :  { %4664 = vmatpush1.bf16.msra.mxu0 %v8815_v17  ;;  %4728 = vmatpush1.bf16.msra.mxu1 %v8816_v48 }
 0x4fd   :  { %4666 = vmatprep.subr.bf16.mxu0 %v8817_v13  ;;  %4730 = vmatprep.subr.bf16.mxu1 %v8818_v20  ;;  %v8829_v20 = vld [vmem:[#allocation106_spill] sm:$0xff] }
 0x500   :  { %4668 = vmatpush1.bf16.msra.mxu0 %v8819_v22  ;;  %4732 = vmatpush1.bf16.msra.mxu1 %v8820_v19  ;;  %v8830_v22 = vld [vmem:[#allocation107_spill] sm:$0xff] }
 0x501   :  { %4670 = vmatprep.subr.bf16.mxu0 %v8821_v54  ;;  %4734 = vmatprep.subr.bf16.mxu1 %v8822_v8 }
 0x504   :  { %4672 = vmatpush1.bf16.msra.mxu0 %v8823_v1  ;;  %4736 = vmatpush1.bf16.msra.mxu1 %v8824_v32 }
 0x505   :  { %4674 = vmatprep.subr.bf16.mxu0 %v8825_v58  ;;  %4738 = vmatprep.subr.bf16.mxu1 %v8826_v25 }
 0x508   :  { %4676 = vmatpush1.bf16.msra.mxu0 %v8827_v36  ;;  %4740 = vmatpush1.bf16.msra.mxu1 %v8828_v7 }
 0x509   :  { %4678 = vmatprep.subr.bf16.mxu0 %v8829_v20  ;;  %4742 = vmatprep.subr.bf16.mxu1 %v8830_v22 }
 0x50c   :  { %4680 = vmatpush1.bf16.msra.mxu0 %v8743_v3  ;;  %4744 = vmatpush1.bf16.msra.mxu1 %v8744_v33 }
 0x50d   :  { %4682 = vmatprep.subr.bf16.mxu0 %v8745_v11  ;;  %4746 = vmatprep.subr.bf16.mxu1 %v8746_v43 }
 0x510   :  { %4684 = vmatpush1.bf16.msra.mxu0 %v8747_v60  ;;  %4748 = vmatpush1.bf16.msra.mxu1 %v8748_v24 }
 0x511   :  { %4686 = vmatprep.subr.bf16.mxu0 %v8749_v31  ;;  %4750 = vmatprep.subr.bf16.mxu1 %v8750_v37 }
 0x514   :  { %4688 = vmatpush1.bf16.msra.mxu0 %v8751_v55  ;;  %4752 = vmatpush1.bf16.msra.mxu1 %v8752_v46 }
 0x515   :  { %4690 = vmatprep.subr.bf16.mxu0 %v8753_v51  ;;  %4754 = vmatprep.subr.bf16.mxu1 %v8666_v0 }
 0x518   :  { %4692 = vmatpush1.bf16.msra.mxu0 %v8667_v45  ;;  %4756 = vmatpush1.bf16.msra.mxu1 %v8668_v27 }
 0x519   :  { %4694 = vmatprep.subr.bf16.mxu0 %v8669_v50  ;;  %4758 = vmatprep.subr.bf16.mxu1 %v8670_v26 }
 0x51c   :  { %4696 = vmatpush1.bf16.msra.mxu0 %v8671_v62  ;;  %4760 = vmatpush1.bf16.msra.mxu1 %v8672_v5 }
 0x51d   :  { %4698 = vmatprep.subr.bf16.mxu0 %v8673_v52  ;;  %4762 = vmatprep.subr.bf16.mxu1 %v8674_v39  ;;  %v8901_v52 = vld [vmem:[#allocation142_spill] sm:$0xff] }
 0x520   :  { %4700 = vmatpush1.bf16.msra.mxu0 %v8675_v49  ;;  %4764 = vmatpush1.bf16.msra.mxu1 %v8676_v15  ;;  %v8831_v49 = vld [vmem:[#allocation139_spill] sm:$0xff]  ;;  %v8832_v15 = vld [vmem:[#allocation140_spill] sm:$0xff] }
 0x521   :  { %4702 = vmatprep.subr.bf16.mxu0 %v6656_v30  ;;  %4766 = vmatprep.subr.bf16.mxu1 %v6658_v6  ;;  %v8833_v30 = vld [vmem:[#allocation141_spill] sm:$0xff]  ;;  %v8834_v6 = vld [vmem:[#allocation8_spill] sm:$0xff] }
 0x524   :  { %4704 = vmatpush1.bf16.msra.mxu0 %v6662_v28  ;;  %4768 = vmatpush1.bf16.msra.mxu1 %v6664_v4  ;;  %v8835_v28 = vld [vmem:[#allocation11_spill] sm:$0xff]  ;;  %v8900_v4 = vld [vmem:[#allocation74_spill] sm:$0xff] }
 0x525   :  { %4706 = vmatprep.subr.bf16.mxu0 %v6668_v14  ;;  %4770 = vmatprep.subr.bf16.mxu1 %v6670_v18  ;;  %v8836_v18 = vld [vmem:[#allocation9_spill] sm:$0xff] }
 0x526   :  { %v8845_v14 = vld [vmem:[#allocation21_spill] sm:$0xff] }
 0x528   :  { %4708 = vmatpush1.bf16.msra.mxu0 %v6674_v47  ;;  %4772 = vmatpush1.bf16.msra.mxu1 %v6676_v57  ;;  %v8837_v47 = vld [vmem:[#allocation13_spill] sm:$0xff]  ;;  %v8838_v57 = vld [vmem:[#allocation10_spill] sm:$0xff] }
 0x529   :  { %4710 = vmatprep.subr.bf16.mxu0 %v6680_v63  ;;  %4774 = vmatprep.subr.bf16.mxu1 %v8831_v49  ;;  %v8839_v63 = vld [vmem:[#allocation15_spill] sm:$0xff]  ;;  %v8840_v49 = vld [vmem:[#allocation12_spill] sm:$0xff] }
 0x52c   :  { %4712 = vmatpush1.bf16.msra.mxu0 %v8832_v15  ;;  %4776 = vmatpush1.bf16.msra.mxu1 %v8833_v30  ;;  %v8841_v15 = vld [vmem:[#allocation17_spill] sm:$0xff]  ;;  %v8842_v30 = vld [vmem:[#allocation14_spill] sm:$0xff] }
 0x52d   :  { %4778 = vmatprep.subr.bf16.mxu0 %v8834_v6  ;;  %4842 = vmatprep.subr.bf16.mxu1 %v8835_v28  ;;  %v8843_v6 = vld [vmem:[#allocation19_spill] sm:$0xff]  ;;  %v8844_v28 = vld [vmem:[#allocation16_spill] sm:$0xff] }
 0x52f   :  { %1904 = vmatmul.mubr.f32.vlgmr.msra.gmra.mrb[16].mxu0 %v7112_v61  ;;  %1975 = vmatmul.mubr.f32.vlgmr.msra.gmra.mrb[16].mxu1 %v7112_v61  ;;  %v8846_v61 = vld [vmem:[#allocation18_spill] sm:$0xff] }
 0x530   :  { %4780 = vmatpush1.bf16.msra.mxu0 %v8836_v18  ;;  %4844 = vmatpush1.bf16.msra.mxu1 %v8837_v47  ;;  %v8847_v18 = vld [vmem:[#allocation23_spill] sm:$0xff]  ;;  %v8848_v47 = vld [vmem:[#allocation20_spill] sm:$0xff] }
 0x531   :  { %4782 = vmatprep.subr.bf16.mxu0 %v8838_v57  ;;  %4846 = vmatprep.subr.bf16.mxu1 %v8839_v63  ;;  %v8849_v57 = vld [vmem:[#allocation25_spill] sm:$0xff]  ;;  %v8850_v63 = vld [vmem:[#allocation22_spill] sm:$0xff] }
 0x534   :  { %4784 = vmatpush1.bf16.msra.mxu0 %v8840_v49  ;;  %4848 = vmatpush1.bf16.msra.mxu1 %v8841_v15  ;;  %v8851_v49 = vld [vmem:[#allocation26_spill] sm:$0xff]  ;;  %v8852_v15 = vld [vmem:[#allocation24_spill] sm:$0xff] }
 0x535   :  { %4786 = vmatprep.subr.bf16.mxu0 %v8842_v30  ;;  %4850 = vmatprep.subr.bf16.mxu1 %v8843_v6  ;;  %v8853_v30 = vld [vmem:[#allocation27_spill] sm:$0xff]  ;;  %v8854_v6 = vld [vmem:[#allocation28_spill] sm:$0xff] }
 0x538   :  { %4788 = vmatpush1.bf16.msra.mxu0 %v8844_v28  ;;  %4852 = vmatpush1.bf16.msra.mxu1 %v8845_v14  ;;  %v8855_v28 = vld [vmem:[#allocation29_spill] sm:$0xff]  ;;  %v8856_v14 = vld [vmem:[#allocation30_spill] sm:$0xff] }
 0x539   :  { %4790 = vmatprep.subr.bf16.mxu0 %v8846_v61  ;;  %4854 = vmatprep.subr.bf16.mxu1 %v8847_v18  ;;  %v8857_v61 = vld [vmem:[#allocation31_spill] sm:$0xff]  ;;  %v8858_v18 = vld [vmem:[#allocation32_spill] sm:$0xff] }
 0x53c   :  { %4792 = vmatpush1.bf16.msra.mxu0 %v8848_v47  ;;  %4856 = vmatpush1.bf16.msra.mxu1 %v8849_v57  ;;  %v8859_v47 = vld [vmem:[#allocation33_spill] sm:$0xff]  ;;  %v8860_v57 = vld [vmem:[#allocation34_spill] sm:$0xff] }
 0x53d   :  { %4794 = vmatprep.subr.bf16.mxu0 %v8850_v63  ;;  %4858 = vmatprep.subr.bf16.mxu1 %v8851_v49  ;;  %v8861_v63 = vld [vmem:[#allocation35_spill] sm:$0xff]  ;;  %v8862_v49 = vld [vmem:[#allocation36_spill] sm:$0xff] }
 0x540   :  { %4796 = vmatpush1.bf16.msra.mxu0 %v8852_v15  ;;  %4860 = vmatpush1.bf16.msra.mxu1 %v8853_v30  ;;  %v8863_v15 = vld [vmem:[#allocation37_spill] sm:$0xff]  ;;  %v8864_v30 = vld [vmem:[#allocation38_spill] sm:$0xff] }
 0x541   :  { %4798 = vmatprep.subr.bf16.mxu0 %v8854_v6  ;;  %4862 = vmatprep.subr.bf16.mxu1 %v8855_v28  ;;  %v8865_v6 = vld [vmem:[#allocation39_spill] sm:$0xff]  ;;  %v8866_v28 = vld [vmem:[#allocation40_spill] sm:$0xff] }
 0x544   :  { %4800 = vmatpush1.bf16.msra.mxu0 %v8856_v14  ;;  %4864 = vmatpush1.bf16.msra.mxu1 %v8857_v61  ;;  %v8867_v14 = vld [vmem:[#allocation41_spill] sm:$0xff]  ;;  %v8868_v61 = vld [vmem:[#allocation42_spill] sm:$0xff] }
 0x545   :  { %4802 = vmatprep.subr.bf16.mxu0 %v8858_v18  ;;  %4866 = vmatprep.subr.bf16.mxu1 %v8859_v47  ;;  %v8869_v18 = vld [vmem:[#allocation43_spill] sm:$0xff]  ;;  %v8870_v47 = vld [vmem:[#allocation44_spill] sm:$0xff] }
 0x548   :  { %4804 = vmatpush1.bf16.msra.mxu0 %v8860_v57  ;;  %4868 = vmatpush1.bf16.msra.mxu1 %v8861_v63  ;;  %v8871_v57 = vld [vmem:[#allocation45_spill] sm:$0xff]  ;;  %v8872_v63 = vld [vmem:[#allocation46_spill] sm:$0xff] }
 0x549   :  { %4806 = vmatprep.subr.bf16.mxu0 %v8862_v49  ;;  %4870 = vmatprep.subr.bf16.mxu1 %v8863_v15  ;;  %v8873_v49 = vld [vmem:[#allocation47_spill] sm:$0xff]  ;;  %v8874_v15 = vld [vmem:[#allocation48_spill] sm:$0xff] }
 0x54c   :  { %4808 = vmatpush1.bf16.msra.mxu0 %v8864_v30  ;;  %4872 = vmatpush1.bf16.msra.mxu1 %v8865_v6  ;;  %v8875_v30 = vld [vmem:[#allocation49_spill] sm:$0xff]  ;;  %v8876_v6 = vld [vmem:[#allocation50_spill] sm:$0xff] }
 0x54d   :  { %4810 = vmatprep.subr.bf16.mxu0 %v8866_v28  ;;  %4874 = vmatprep.subr.bf16.mxu1 %v8867_v14  ;;  %v8877_v28 = vld [vmem:[#allocation51_spill] sm:$0xff]  ;;  %v8878_v14 = vld [vmem:[#allocation52_spill] sm:$0xff] }
 0x550   :  { %4812 = vmatpush1.bf16.msra.mxu0 %v8868_v61  ;;  %4876 = vmatpush1.bf16.msra.mxu1 %v8869_v18  ;;  %v8879_v61 = vld [vmem:[#allocation53_spill] sm:$0xff]  ;;  %v8880_v18 = vld [vmem:[#allocation54_spill] sm:$0xff] }
 0x551   :  { %4814 = vmatprep.subr.bf16.mxu0 %v8870_v47  ;;  %4878 = vmatprep.subr.bf16.mxu1 %v8871_v57  ;;  %v8881_v47 = vld [vmem:[#allocation55_spill] sm:$0xff]  ;;  %v8882_v57 = vld [vmem:[#allocation56_spill] sm:$0xff] }
 0x554   :  { %4816 = vmatpush1.bf16.msra.mxu0 %v8872_v63  ;;  %4880 = vmatpush1.bf16.msra.mxu1 %v8873_v49  ;;  %v8883_v63 = vld [vmem:[#allocation57_spill] sm:$0xff]  ;;  %v8884_v49 = vld [vmem:[#allocation58_spill] sm:$0xff] }
 0x555   :  { %4818 = vmatprep.subr.bf16.mxu0 %v8874_v15  ;;  %4882 = vmatprep.subr.bf16.mxu1 %v8875_v30  ;;  %v8885_v15 = vld [vmem:[#allocation59_spill] sm:$0xff]  ;;  %v8886_v30 = vld [vmem:[#allocation60_spill] sm:$0xff] }
 0x558   :  { %4820 = vmatpush1.bf16.msra.mxu0 %v8876_v6  ;;  %4884 = vmatpush1.bf16.msra.mxu1 %v8877_v28  ;;  %v8887_v6 = vld [vmem:[#allocation61_spill] sm:$0xff]  ;;  %v8888_v28 = vld [vmem:[#allocation62_spill] sm:$0xff] }
 0x559   :  { %4822 = vmatprep.subr.bf16.mxu0 %v8878_v14  ;;  %4886 = vmatprep.subr.bf16.mxu1 %v8879_v61  ;;  %v8889_v14 = vld [vmem:[#allocation63_spill] sm:$0xff]  ;;  %v8890_v61 = vld [vmem:[#allocation64_spill] sm:$0xff] }
 0x55c   :  { %4824 = vmatpush1.bf16.msra.mxu0 %v8880_v18  ;;  %4888 = vmatpush1.bf16.msra.mxu1 %v8881_v47  ;;  %v8891_v18 = vld [vmem:[#allocation65_spill] sm:$0xff]  ;;  %v8892_v47 = vld [vmem:[#allocation66_spill] sm:$0xff] }
 0x55d   :  { %4826 = vmatprep.subr.bf16.mxu0 %v8882_v57  ;;  %4890 = vmatprep.subr.bf16.mxu1 %v8883_v63  ;;  %v8893_v57 = vld [vmem:[#allocation67_spill] sm:$0xff]  ;;  %v8894_v63 = vld [vmem:[#allocation68_spill] sm:$0xff] }
 0x560   :  { %4828 = vmatpush1.bf16.msra.mxu0 %v8884_v49  ;;  %4892 = vmatpush1.bf16.msra.mxu1 %v8885_v15  ;;  %v8895_v49 = vld [vmem:[#allocation69_spill] sm:$0xff]  ;;  %v8896_v15 = vld [vmem:[#allocation70_spill] sm:$0xff] }
 0x561   :  { %4830 = vmatprep.subr.bf16.mxu0 %v8886_v30  ;;  %4894 = vmatprep.subr.bf16.mxu1 %v8887_v6  ;;  %v8897_v30 = vld [vmem:[#allocation71_spill] sm:$0xff]  ;;  %v8898_v6 = vld [vmem:[#allocation72_spill] sm:$0xff] }
 0x564   :  { %4832 = vmatpush1.bf16.msra.mxu0 %v8888_v28  ;;  %4896 = vmatpush1.bf16.msra.mxu1 %v8889_v14  ;;  %v8899_v28 = vld [vmem:[#allocation73_spill] sm:$0xff] }
 0x565   :  { %4834 = vmatprep.subr.bf16.mxu0 %v8890_v61  ;;  %4898 = vmatprep.subr.bf16.mxu1 %v8891_v18 }
 0x568   :  { %4836 = vmatpush1.bf16.msra.mxu0 %v8892_v47  ;;  %4900 = vmatpush1.bf16.msra.mxu1 %v8893_v57 }
 0x569   :  { %4838 = vmatprep.subr.bf16.mxu0 %v8894_v63  ;;  %4902 = vmatprep.subr.bf16.mxu1 %v8895_v49 }
 0x56c   :  { %4840 = vmatpush1.bf16.msra.mxu0 %v8896_v15  ;;  %4904 = vmatpush1.bf16.msra.mxu1 %v8897_v30 }
 0x56d   :  { %4906 = vmatprep.subr.bf16.mxu0 %v8898_v6  ;;  %4970 = vmatprep.subr.bf16.mxu1 %v8899_v28 }
 0x5c2   :  { %v1763_v14 = vpop.f32.mrb[14].mxu0  ;;  %v1834_v61 = vpop.f32.mrb[14].mxu1 }
 0x5c3   :  { %v1981_v18 = vadd.f32 %v1763_v14, %v8900_v4  ;;  %v1765_v39 = vpop.f32.mrb[15].mxu0  ;;  %v1836_v47 = vpop.f32.mrb[15].mxu1  ;;  %v1983_v30 = vadd.f32 %v1834_v61, %v8808_v10 }
 0x5c4   :  { %v1982_v57 = vadd.f32 %v1765_v39, %v8901_v52  ;;  %v1984_v15 = vadd.f32 %v1836_v47, %v8713_v23 }
 0x5c5   :  { %v3553_v5 = vmul.f32 -1.442695, %v1981_v18 }
 0x5c6   :  { %v3554_v63 = vmul.f32 -1.442695, %v1982_v57  ;;  %v3555_v49 = vmul.f32 -1.442695, %v1984_v15 }
 0x5c7   :  { %5918 = vpow2.f32 %v3553_v5 }
 0x5c8   :  { %5920 = vpow2.f32 %v3554_v63  ;;  %v8902_v63 = vld [vmem:[#allocation79_spill] sm:$0xff] }
 0x5c9   :  { %5922 = vpow2.f32 %v3555_v49 }
 0x5ca   :  { %5924 = vtanh.f32 %v1983_v30 }
 0x5d1   :  { %v5919_v6 = vpop.eup %5918 }
 0x5d2   :  { %v5921_v62 = vpop.eup %5920  ;;  %v1988_v28 = vadd.f32 1.0, %v5919_v6 }
 0x5d3   :  { %v1994_v26 = vadd.f32 1.0, %v5921_v62  ;;  %v5923_v14 = vpop.eup %5922 }
 0x5d4   :  { %5926 = vrcp.f32 %v1988_v28  ;;  %v5925_v4 = vpop.eup %5924  ;;  %v2001_v5 = vadd.f32 1.0, %v5923_v14 }
 0x5d5   :  { %5928 = vrcp.f32 %v1994_v26  ;;  %v8905_v26 = vld [vmem:[#allocation75_spill] sm:$0xff] }
 0x5d6   :  { %5930 = vrcp.f32 %v2001_v5 }
 0x5de   :  { %v5927_v39 = vpop.eup %5926 }
 0x5df   :  { %v5929_v18 = vpop.eup %5928  ;;  %v2005_v57 = vmul.f32 %v5927_v39, %v5925_v4 }
 0x5e0   :  { %v2004_v52 = vmul.f32 %v5929_v18, %v8902_v63  ;;  %v5931_v15 = vpop.eup %5930 }
 0x5e2   :  { %v7253_v47 = vadd.f32 %v2005_v57, %v2004_v52 }
 0x5e4   :  { %8903 = vst [vmem:[#allocation81_spill] sm:$0xff] %v7253_v47  ;;  %5932 = vtanh.f32 %v7253_v47 }
 0x5ee   :  { %v5933_v6 = vpop.eup %5932 }
 0x5ef   :  { %v7256_v49 = vmul.f32 %v5933_v6, %v5931_v15 }
 0x5f1   :  { %8904 = vst [vmem:[#allocation82_spill] sm:$0xff] %v7256_v49  ;;  %2101 = vmatprep.mubr.f32.mxu0 %v7256_v49  ;;  %2172 = vmatprep.mubr.f32.mxu1 %v7256_v49 }
 0x602   :  { %v1905_v30 = vpop.f32.mrb[16].mxu0  ;;  %v1976_v28 = vpop.f32.mrb[16].mxu1 }
 0x603   :  { %v2009_v4 = vadd.f32 %v1905_v30, %v8905_v26  ;;  %v1907_v62 = vpop.f32.mrb[17].mxu0  ;;  %v1978_v61 = vpop.f32.mrb[17].mxu1  ;;  %v2011_v5 = vadd.f32 %v1976_v28, %v8625_v40 }
 0x604   :  { %v2010_v52 = vadd.f32 %v1907_v62, %v8719_v56  ;;  %v2012_v18 = vadd.f32 %v1978_v61, %v8624_v44 }
 0x605   :  { %v3556_v14 = vmul.f32 -1.442695, %v2009_v4 }
 0x606   :  { %v3557_v39 = vmul.f32 -1.442695, %v2010_v52  ;;  %v3558_v57 = vmul.f32 -1.442695, %v2012_v18 }
 0x607   :  { %5934 = vpow2.f32 %v3556_v14 }
 0x608   :  { %5936 = vpow2.f32 %v3557_v39 }
 0x609   :  { %5938 = vpow2.f32 %v3558_v57 }
 0x60a   :  { %5940 = vtanh.f32 %v2011_v5  ;;  %v8909_v5 = vld [vmem:[#allocation124_spill] sm:$0xff] }
 0x611   :  { %v5935_v63 = vpop.eup %5934 }
 0x612   :  { %v5937_v15 = vpop.eup %5936  ;;  %v2016_v6 = vadd.f32 1.0, %v5935_v63  ;;  %v8910_v63 = vld [vmem:[#allocation125_spill] sm:$0xff] }
 0x613   :  { %v2022_v47 = vadd.f32 1.0, %v5937_v15  ;;  %v5939_v30 = vpop.eup %5938  ;;  %v8911_v15 = vld [vmem:[#allocation126_spill] sm:$0xff] }
 0x614   :  { %5942 = vrcp.f32 %v2016_v6  ;;  %v5941_v26 = vpop.eup %5940  ;;  %v2029_v14 = vadd.f32 1.0, %v5939_v30  ;;  %v8912_v6 = vld [vmem:[#allocation127_spill] sm:$0xff]  ;;  %v8913_v30 = vld [vmem:[#allocation128_spill] sm:$0xff] }
 0x615   :  { %5944 = vrcp.f32 %v2022_v47  ;;  %v8907_v47 = vld [vmem:[#allocation96_spill] sm:$0xff] }
 0x616   :  { %5946 = vrcp.f32 %v2029_v14  ;;  %v8917_v14 = vld [vmem:[#allocation132_spill] sm:$0xff] }
 0x61e   :  { %v5943_v62 = vpop.eup %5942 }
 0x61f   :  { %v5945_v4 = vpop.eup %5944  ;;  %v2033_v52 = vmul.f32 %v5943_v62, %v5941_v26  ;;  %v8908_v26 = vld [vmem:[#allocation123_spill] sm:$0xff]  ;;  %v8914_v62 = vld [vmem:[#allocation129_spill] sm:$0xff] }
 0x620   :  { %v2032_v39 = vmul.f32 %v5945_v4, %v7109_v34  ;;  %v5947_v28 = vpop.eup %5946  ;;  %v8906_v34 = vld [vmem:[#allocation95_spill] sm:$0xff]  ;;  %v8915_v4 = vld [vmem:[#allocation130_spill] sm:$0xff] }
 0x622   :  { %v7265_v61 = vadd.f32 %v2033_v52, %v2032_v39  ;;  %v8916_v52 = vld [vmem:[#allocation131_spill] sm:$0xff]  ;;  %v8918_v39 = vld [vmem:[#allocation133_spill] sm:$0xff] }
 0x624   :  { %5948 = vtanh.f32 %v7265_v61 }
 0x62e   :  { %v5949_v18 = vpop.eup %5948 }
 0x62f   :  { %v7268_v57 = vmul.f32 %v5949_v18, %v5947_v28  ;;  %v8919_v28 = vld [vmem:[#allocation134_spill] sm:$0xff]  ;;  %v8920_v18 = vld [vmem:[#allocation135_spill] sm:$0xff] }
 0x631   :  { %2102 = vmatmul.mubr.f32.vlgmr.msra.gmra.mrb[18].mxu0 %v7268_v57  ;;  %2173 = vmatmul.mubr.f32.vlgmr.msra.gmra.mrb[18].mxu1 %v7268_v57 }
 0x632   :  { %4908 = vmatpush1.bf16.msra.mxu0 %v8627_v38  ;;  %4972 = vmatpush1.bf16.msra.mxu1 %v8628_v59 }
 0x633   :  { %2243 = vmatprep.mubr.f32.mxu0 %v7256_v49  ;;  %2314 = vmatprep.mubr.f32.mxu1 %v7256_v49  ;;  %v8921_v49 = vld [vmem:[#allocation136_spill] sm:$0xff] }
 0x634   :  { %4910 = vmatprep.subr.bf16.mxu0 %v8629_v53  ;;  %4974 = vmatprep.subr.bf16.mxu1 %v8630_v35 }
 0x636   :  { %4912 = vmatpush1.bf16.msra.mxu0 %v8631_v21  ;;  %4976 = vmatpush1.bf16.msra.mxu1 %v8720_v29 }
 0x637   :  { %4914 = vmatprep.subr.bf16.mxu0 %v8721_v12  ;;  %4978 = vmatprep.subr.bf16.mxu1 %v8722_v9 }
 0x63a   :  { %4916 = vmatpush1.bf16.msra.mxu0 %v8723_v42  ;;  %4980 = vmatpush1.bf16.msra.mxu1 %v8724_v16 }
 0x63b   :  { %4918 = vmatprep.subr.bf16.mxu0 %v8813_v2  ;;  %4982 = vmatprep.subr.bf16.mxu1 %v8814_v41 }
 0x63e   :  { %4920 = vmatpush1.bf16.msra.mxu0 %v8815_v17  ;;  %4984 = vmatpush1.bf16.msra.mxu1 %v8816_v48 }
 0x63f   :  { %4922 = vmatprep.subr.bf16.mxu0 %v8817_v13  ;;  %4986 = vmatprep.subr.bf16.mxu1 %v8906_v34 }
 0x642   :  { %4924 = vmatpush1.bf16.msra.mxu0 %v8907_v47  ;;  %4988 = vmatpush1.bf16.msra.mxu1 %v8820_v19 }
 0x643   :  { %4926 = vmatprep.subr.bf16.mxu0 %v8821_v54  ;;  %4990 = vmatprep.subr.bf16.mxu1 %v8822_v8 }
 0x646   :  { %4928 = vmatpush1.bf16.msra.mxu0 %v8823_v1  ;;  %4992 = vmatpush1.bf16.msra.mxu1 %v8824_v32 }
 0x647   :  { %4930 = vmatprep.subr.bf16.mxu0 %v8825_v58  ;;  %4994 = vmatprep.subr.bf16.mxu1 %v8826_v25 }
 0x64a   :  { %4932 = vmatpush1.bf16.msra.mxu0 %v8827_v36  ;;  %4996 = vmatpush1.bf16.msra.mxu1 %v8828_v7 }
 0x64b   :  { %4934 = vmatprep.subr.bf16.mxu0 %v8829_v20  ;;  %4998 = vmatprep.subr.bf16.mxu1 %v8830_v22 }
 0x64e   :  { %4936 = vmatpush1.bf16.msra.mxu0 %v8743_v3  ;;  %5000 = vmatpush1.bf16.msra.mxu1 %v8744_v33 }
 0x64f   :  { %4938 = vmatprep.subr.bf16.mxu0 %v8745_v11  ;;  %5002 = vmatprep.subr.bf16.mxu1 %v8746_v43 }
 0x652   :  { %4940 = vmatpush1.bf16.msra.mxu0 %v8747_v60  ;;  %5004 = vmatpush1.bf16.msra.mxu1 %v8748_v24 }
 0x653   :  { %4942 = vmatprep.subr.bf16.mxu0 %v8749_v31  ;;  %5006 = vmatprep.subr.bf16.mxu1 %v8750_v37 }
 0x656   :  { %4944 = vmatpush1.bf16.msra.mxu0 %v8751_v55  ;;  %5008 = vmatpush1.bf16.msra.mxu1 %v8752_v46 }
 0x657   :  { %4946 = vmatprep.subr.bf16.mxu0 %v8753_v51  ;;  %5010 = vmatprep.subr.bf16.mxu1 %v8666_v0 }
 0x65a   :  { %4948 = vmatpush1.bf16.msra.mxu0 %v8667_v45  ;;  %5012 = vmatpush1.bf16.msra.mxu1 %v8668_v27 }
 0x65b   :  { %4950 = vmatprep.subr.bf16.mxu0 %v8669_v50  ;;  %5014 = vmatprep.subr.bf16.mxu1 %v8908_v26 }
 0x65e   :  { %4952 = vmatpush1.bf16.msra.mxu0 %v8909_v5  ;;  %5016 = vmatpush1.bf16.msra.mxu1 %v8910_v63  ;;  %v8994_v5 = vld [vmem:[#allocation142_spill] sm:$0xff] }
 0x65f   :  { %4954 = vmatprep.subr.bf16.mxu0 %v8911_v15  ;;  %5018 = vmatprep.subr.bf16.mxu1 %v8912_v6  ;;  %v8922_v15 = vld [vmem:[#allocation137_spill] sm:$0xff]  ;;  %v8923_v6 = vld [vmem:[#allocation138_spill] sm:$0xff] }
 0x662   :  { %4956 = vmatpush1.bf16.msra.mxu0 %v8913_v30  ;;  %5020 = vmatpush1.bf16.msra.mxu1 %v8914_v62  ;;  %v8924_v30 = vld [vmem:[#allocation139_spill] sm:$0xff]  ;;  %v8925_v62 = vld [vmem:[#allocation140_spill] sm:$0xff] }
 0x663   :  { %4958 = vmatprep.subr.bf16.mxu0 %v8915_v4  ;;  %5022 = vmatprep.subr.bf16.mxu1 %v8916_v52  ;;  %v8926_v4 = vld [vmem:[#allocation141_spill] sm:$0xff]  ;;  %v8927_v52 = vld [vmem:[#allocation8_spill] sm:$0xff] }
 0x666   :  { %4960 = vmatpush1.bf16.msra.mxu0 %v8917_v14  ;;  %5024 = vmatpush1.bf16.msra.mxu1 %v8918_v39  ;;  %v8928_v14 = vld [vmem:[#allocation11_spill] sm:$0xff]  ;;  %v8993_v39 = vld [vmem:[#allocation74_spill] sm:$0xff] }
 0x667   :  { %4962 = vmatprep.subr.bf16.mxu0 %v8919_v28  ;;  %5026 = vmatprep.subr.bf16.mxu1 %v8920_v18  ;;  %v8929_v18 = vld [vmem:[#allocation9_spill] sm:$0xff] }
 0x668   :  { %v8938_v28 = vld [vmem:[#allocation21_spill] sm:$0xff] }
 0x66a   :  { %4964 = vmatpush1.bf16.msra.mxu0 %v8921_v49  ;;  %5028 = vmatpush1.bf16.msra.mxu1 %v8922_v15  ;;  %v8930_v49 = vld [vmem:[#allocation13_spill] sm:$0xff]  ;;  %v8931_v15 = vld [vmem:[#allocation10_spill] sm:$0xff] }
 0x66b   :  { %4966 = vmatprep.subr.bf16.mxu0 %v8923_v6  ;;  %5030 = vmatprep.subr.bf16.mxu1 %v8924_v30  ;;  %v8932_v6 = vld [vmem:[#allocation15_spill] sm:$0xff]  ;;  %v8933_v30 = vld [vmem:[#allocation12_spill] sm:$0xff] }
 0x66e   :  { %4968 = vmatpush1.bf16.msra.mxu0 %v8925_v62  ;;  %5032 = vmatpush1.bf16.msra.mxu1 %v8926_v4  ;;  %v8934_v62 = vld [vmem:[#allocation17_spill] sm:$0xff]  ;;  %v8935_v4 = vld [vmem:[#allocation14_spill] sm:$0xff] }
 0x66f   :  { %5034 = vmatprep.subr.bf16.mxu0 %v8927_v52  ;;  %5098 = vmatprep.subr.bf16.mxu1 %v8928_v14  ;;  %v8936_v52 = vld [vmem:[#allocation19_spill] sm:$0xff]  ;;  %v8937_v14 = vld [vmem:[#allocation16_spill] sm:$0xff] }
 0x671   :  { %2244 = vmatmul.mubr.f32.vlgmr.msra.gmra.mrb[20].mxu0 %v7268_v57  ;;  %2315 = vmatmul.mubr.f32.vlgmr.msra.gmra.mrb[20].mxu1 %v7268_v57  ;;  %v8939_v57 = vld [vmem:[#allocation18_spill] sm:$0xff] }
 0x672   :  { %5036 = vmatpush1.bf16.msra.mxu0 %v8929_v18  ;;  %5100 = vmatpush1.bf16.msra.mxu1 %v8930_v49  ;;  %v8940_v18 = vld [vmem:[#allocation23_spill] sm:$0xff]  ;;  %v8941_v49 = vld [vmem:[#allocation20_spill] sm:$0xff] }
 0x673   :  { %5038 = vmatprep.subr.bf16.mxu0 %v8931_v15  ;;  %5102 = vmatprep.subr.bf16.mxu1 %v8932_v6  ;;  %v8942_v15 = vld [vmem:[#allocation25_spill] sm:$0xff]  ;;  %v8943_v6 = vld [vmem:[#allocation22_spill] sm:$0xff] }
 0x676   :  { %5040 = vmatpush1.bf16.msra.mxu0 %v8933_v30  ;;  %5104 = vmatpush1.bf16.msra.mxu1 %v8934_v62  ;;  %v8944_v30 = vld [vmem:[#allocation26_spill] sm:$0xff]  ;;  %v8945_v62 = vld [vmem:[#allocation24_spill] sm:$0xff] }
 0x677   :  { %5042 = vmatprep.subr.bf16.mxu0 %v8935_v4  ;;  %5106 = vmatprep.subr.bf16.mxu1 %v8936_v52  ;;  %v8946_v4 = vld [vmem:[#allocation27_spill] sm:$0xff]  ;;  %v8947_v52 = vld [vmem:[#allocation28_spill] sm:$0xff] }
 0x67a   :  { %5044 = vmatpush1.bf16.msra.mxu0 %v8937_v14  ;;  %5108 = vmatpush1.bf16.msra.mxu1 %v8938_v28  ;;  %v8948_v14 = vld [vmem:[#allocation29_spill] sm:$0xff]  ;;  %v8949_v28 = vld [vmem:[#allocation30_spill] sm:$0xff] }
 0x67b   :  { %5046 = vmatprep.subr.bf16.mxu0 %v8939_v57  ;;  %5110 = vmatprep.subr.bf16.mxu1 %v8940_v18  ;;  %v8950_v57 = vld [vmem:[#allocation31_spill] sm:$0xff]  ;;  %v8951_v18 = vld [vmem:[#allocation32_spill] sm:$0xff] }
 0x67e   :  { %5048 = vmatpush1.bf16.msra.mxu0 %v8941_v49  ;;  %5112 = vmatpush1.bf16.msra.mxu1 %v8942_v15  ;;  %v8952_v49 = vld [vmem:[#allocation33_spill] sm:$0xff]  ;;  %v8953_v15 = vld [vmem:[#allocation34_spill] sm:$0xff] }
 0x67f   :  { %5050 = vmatprep.subr.bf16.mxu0 %v8943_v6  ;;  %5114 = vmatprep.subr.bf16.mxu1 %v8944_v30  ;;  %v8954_v6 = vld [vmem:[#allocation35_spill] sm:$0xff]  ;;  %v8955_v30 = vld [vmem:[#allocation36_spill] sm:$0xff] }
 0x682   :  { %5052 = vmatpush1.bf16.msra.mxu0 %v8945_v62  ;;  %5116 = vmatpush1.bf16.msra.mxu1 %v8946_v4  ;;  %v8956_v62 = vld [vmem:[#allocation37_spill] sm:$0xff]  ;;  %v8957_v4 = vld [vmem:[#allocation38_spill] sm:$0xff] }
 0x683   :  { %5054 = vmatprep.subr.bf16.mxu0 %v8947_v52  ;;  %5118 = vmatprep.subr.bf16.mxu1 %v8948_v14  ;;  %v8958_v52 = vld [vmem:[#allocation39_spill] sm:$0xff]  ;;  %v8959_v14 = vld [vmem:[#allocation40_spill] sm:$0xff] }
 0x686   :  { %5056 = vmatpush1.bf16.msra.mxu0 %v8949_v28  ;;  %5120 = vmatpush1.bf16.msra.mxu1 %v8950_v57  ;;  %v8960_v28 = vld [vmem:[#allocation41_spill] sm:$0xff]  ;;  %v8961_v57 = vld [vmem:[#allocation42_spill] sm:$0xff] }
 0x687   :  { %5058 = vmatprep.subr.bf16.mxu0 %v8951_v18  ;;  %5122 = vmatprep.subr.bf16.mxu1 %v8952_v49  ;;  %v8962_v18 = vld [vmem:[#allocation43_spill] sm:$0xff]  ;;  %v8963_v49 = vld [vmem:[#allocation44_spill] sm:$0xff] }
 0x68a   :  { %5060 = vmatpush1.bf16.msra.mxu0 %v8953_v15  ;;  %5124 = vmatpush1.bf16.msra.mxu1 %v8954_v6  ;;  %v8964_v15 = vld [vmem:[#allocation45_spill] sm:$0xff]  ;;  %v8965_v6 = vld [vmem:[#allocation46_spill] sm:$0xff] }
 0x68b   :  { %5062 = vmatprep.subr.bf16.mxu0 %v8955_v30  ;;  %5126 = vmatprep.subr.bf16.mxu1 %v8956_v62  ;;  %v8966_v30 = vld [vmem:[#allocation47_spill] sm:$0xff]  ;;  %v8967_v62 = vld [vmem:[#allocation48_spill] sm:$0xff] }
 0x68e   :  { %5064 = vmatpush1.bf16.msra.mxu0 %v8957_v4  ;;  %5128 = vmatpush1.bf16.msra.mxu1 %v8958_v52  ;;  %v8968_v4 = vld [vmem:[#allocation49_spill] sm:$0xff]  ;;  %v8969_v52 = vld [vmem:[#allocation50_spill] sm:$0xff] }
 0x68f   :  { %5066 = vmatprep.subr.bf16.mxu0 %v8959_v14  ;;  %5130 = vmatprep.subr.bf16.mxu1 %v8960_v28  ;;  %v8970_v14 = vld [vmem:[#allocation51_spill] sm:$0xff]  ;;  %v8971_v28 = vld [vmem:[#allocation52_spill] sm:$0xff] }
 0x692   :  { %5068 = vmatpush1.bf16.msra.mxu0 %v8961_v57  ;;  %5132 = vmatpush1.bf16.msra.mxu1 %v8962_v18  ;;  %v8972_v57 = vld [vmem:[#allocation53_spill] sm:$0xff]  ;;  %v8973_v18 = vld [vmem:[#allocation54_spill] sm:$0xff] }
 0x693   :  { %5070 = vmatprep.subr.bf16.mxu0 %v8963_v49  ;;  %5134 = vmatprep.subr.bf16.mxu1 %v8964_v15  ;;  %v8974_v49 = vld [vmem:[#allocation55_spill] sm:$0xff]  ;;  %v8975_v15 = vld [vmem:[#allocation56_spill] sm:$0xff] }
 0x696   :  { %5072 = vmatpush1.bf16.msra.mxu0 %v8965_v6  ;;  %5136 = vmatpush1.bf16.msra.mxu1 %v8966_v30  ;;  %v8976_v6 = vld [vmem:[#allocation57_spill] sm:$0xff]  ;;  %v8977_v30 = vld [vmem:[#allocation58_spill] sm:$0xff] }
 0x697   :  { %5074 = vmatprep.subr.bf16.mxu0 %v8967_v62  ;;  %5138 = vmatprep.subr.bf16.mxu1 %v8968_v4  ;;  %v8978_v62 = vld [vmem:[#allocation59_spill] sm:$0xff]  ;;  %v8979_v4 = vld [vmem:[#allocation60_spill] sm:$0xff] }
 0x69a   :  { %5076 = vmatpush1.bf16.msra.mxu0 %v8969_v52  ;;  %5140 = vmatpush1.bf16.msra.mxu1 %v8970_v14  ;;  %v8980_v52 = vld [vmem:[#allocation61_spill] sm:$0xff]  ;;  %v8981_v14 = vld [vmem:[#allocation62_spill] sm:$0xff] }
 0x69b   :  { %5078 = vmatprep.subr.bf16.mxu0 %v8971_v28  ;;  %5142 = vmatprep.subr.bf16.mxu1 %v8972_v57  ;;  %v8982_v28 = vld [vmem:[#allocation63_spill] sm:$0xff]  ;;  %v8983_v57 = vld [vmem:[#allocation64_spill] sm:$0xff] }
 0x69e   :  { %5080 = vmatpush1.bf16.msra.mxu0 %v8973_v18  ;;  %5144 = vmatpush1.bf16.msra.mxu1 %v8974_v49  ;;  %v8984_v18 = vld [vmem:[#allocation65_spill] sm:$0xff]  ;;  %v8985_v49 = vld [vmem:[#allocation66_spill] sm:$0xff] }
 0x69f   :  { %5082 = vmatprep.subr.bf16.mxu0 %v8975_v15  ;;  %5146 = vmatprep.subr.bf16.mxu1 %v8976_v6  ;;  %v8986_v15 = vld [vmem:[#allocation67_spill] sm:$0xff]  ;;  %v8987_v6 = vld [vmem:[#allocation68_spill] sm:$0xff] }
 0x6a2   :  { %5084 = vmatpush1.bf16.msra.mxu0 %v8977_v30  ;;  %5148 = vmatpush1.bf16.msra.mxu1 %v8978_v62  ;;  %v8988_v30 = vld [vmem:[#allocation69_spill] sm:$0xff]  ;;  %v8989_v62 = vld [vmem:[#allocation70_spill] sm:$0xff] }
 0x6a3   :  { %5086 = vmatprep.subr.bf16.mxu0 %v8979_v4  ;;  %5150 = vmatprep.subr.bf16.mxu1 %v8980_v52  ;;  %v8990_v4 = vld [vmem:[#allocation71_spill] sm:$0xff]  ;;  %v8991_v52 = vld [vmem:[#allocation72_spill] sm:$0xff] }
 0x6a6   :  { %5088 = vmatpush1.bf16.msra.mxu0 %v8981_v14  ;;  %5152 = vmatpush1.bf16.msra.mxu1 %v8982_v28  ;;  %v8992_v14 = vld [vmem:[#allocation73_spill] sm:$0xff] }
 0x6a7   :  { %5090 = vmatprep.subr.bf16.mxu0 %v8983_v57  ;;  %5154 = vmatprep.subr.bf16.mxu1 %v8984_v18 }
 0x6aa   :  { %5092 = vmatpush1.bf16.msra.mxu0 %v8985_v49  ;;  %5156 = vmatpush1.bf16.msra.mxu1 %v8986_v15 }
 0x6ab   :  { %5094 = vmatprep.subr.bf16.mxu0 %v8987_v6  ;;  %5158 = vmatprep.subr.bf16.mxu1 %v8988_v30 }
 0x6ae   :  { %5096 = vmatpush1.bf16.msra.mxu0 %v8989_v62  ;;  %5160 = vmatpush1.bf16.msra.mxu1 %v8990_v4 }
 0x6af   :  { %5162 = vmatprep.subr.bf16.mxu0 %v8991_v52  ;;  %5226 = vmatprep.subr.bf16.mxu1 %v8992_v14 }
 0x704   :  { %v2103_v28 = vpop.f32.mrb[18].mxu0  ;;  %v2174_v57 = vpop.f32.mrb[18].mxu1 }
 0x705   :  { %v2321_v18 = vadd.f32 %v2103_v28, %v8993_v39  ;;  %v2105_v63 = vpop.f32.mrb[19].mxu0  ;;  %v2176_v49 = vpop.f32.mrb[19].mxu1  ;;  %v2323_v4 = vadd.f32 %v2174_v57, %v8808_v10 }
 0x706   :  { %v2322_v15 = vadd.f32 %v2105_v63, %v8994_v5  ;;  %v2324_v62 = vadd.f32 %v2176_v49, %v8713_v23 }
 0x707   :  { %v3559_v26 = vmul.f32 -1.442695, %v2321_v18 }
 0x708   :  { %v3560_v6 = vmul.f32 -1.442695, %v2322_v15  ;;  %v3561_v30 = vmul.f32 -1.442695, %v2324_v62 }
 0x709   :  { %5950 = vpow2.f32 %v3559_v26 }
 0x70a   :  { %5952 = vpow2.f32 %v3560_v6  ;;  %v8995_v6 = vld [vmem:[#allocation81_spill] sm:$0xff] }
 0x70b   :  { %5954 = vpow2.f32 %v3561_v30 }
 0x70c   :  { %5956 = vtanh.f32 %v2323_v4  ;;  %v8998_v4 = vld [vmem:[#allocation75_spill] sm:$0xff] }
 0x713   :  { %v5951_v52 = vpop.eup %5950 }
 0x714   :  { %v5953_v50 = vpop.eup %5952  ;;  %v2328_v14 = vadd.f32 1.0, %v5951_v52 }
 0x715   :  { %v2334_v27 = vadd.f32 1.0, %v5953_v50  ;;  %v5955_v28 = vpop.eup %5954 }
 0x716   :  { %5958 = vrcp.f32 %v2328_v14  ;;  %v5957_v39 = vpop.eup %5956  ;;  %v2341_v26 = vadd.f32 1.0, %v5955_v28 }
 0x717   :  { %5960 = vrcp.f32 %v2334_v27 }
 0x718   :  { %5962 = vrcp.f32 %v2341_v26 }
 0x720   :  { %v5959_v63 = vpop.eup %5958 }
 0x721   :  { %v5961_v18 = vpop.eup %5960  ;;  %v2345_v15 = vmul.f32 %v5959_v63, %v5957_v39 }
 0x722   :  { %v2344_v5 = vmul.f32 %v5961_v18, %v8995_v6  ;;  %v5963_v62 = vpop.eup %5962 }
 0x724   :  { %v7409_v49 = vadd.f32 %v2345_v15, %v2344_v5 }
 0x726   :  { %8996 = vst [vmem:[#allocation83_spill] sm:$0xff] %v7409_v49  ;;  %5964 = vtanh.f32 %v7409_v49 }
 0x730   :  { %v5965_v52 = vpop.eup %5964 }
 0x731   :  { %v7412_v30 = vmul.f32 %v5965_v52, %v5963_v62 }
 0x733   :  { %8997 = vst [vmem:[#allocation84_spill] sm:$0xff] %v7412_v30  ;;  %2441 = vmatprep.mubr.f32.mxu0 %v7412_v30  ;;  %2512 = vmatprep.mubr.f32.mxu1 %v7412_v30 }
 0x744   :  { %v2245_v27 = vpop.f32.mrb[20].mxu0  ;;  %v2316_v50 = vpop.f32.mrb[20].mxu1 }
 0x745   :  { %v2349_v14 = vadd.f32 %v2245_v27, %v8998_v4  ;;  %v2247_v39 = vpop.f32.mrb[21].mxu0  ;;  %v2318_v57 = vpop.f32.mrb[21].mxu1  ;;  %v2351_v26 = vadd.f32 %v2316_v50, %v8625_v40 }
 0x746   :  { %v2350_v5 = vadd.f32 %v2247_v39, %v8719_v56  ;;  %v2352_v18 = vadd.f32 %v2318_v57, %v8624_v44 }
 0x747   :  { %v3562_v28 = vmul.f32 -1.442695, %v2349_v14 }
 0x748   :  { %v3563_v63 = vmul.f32 -1.442695, %v2350_v5  ;;  %v3564_v15 = vmul.f32 -1.442695, %v2352_v18 }
 0x749   :  { %5966 = vpow2.f32 %v3562_v28 }
 0x74a   :  { %5968 = vpow2.f32 %v3563_v63 }
 0x74b   :  { %5970 = vpow2.f32 %v3564_v15 }
 0x74c   :  { %5972 = vtanh.f32 %v2351_v26  ;;  %v9002_v26 = vld [vmem:[#allocation124_spill] sm:$0xff] }
 0x753   :  { %v5967_v6 = vpop.eup %5966 }
 0x754   :  { %v5969_v62 = vpop.eup %5968  ;;  %v2356_v52 = vadd.f32 1.0, %v5967_v6  ;;  %v9003_v6 = vld [vmem:[#allocation125_spill] sm:$0xff] }
 0x755   :  { %v2362_v49 = vadd.f32 1.0, %v5969_v62  ;;  %v5971_v27 = vpop.eup %5970  ;;  %v9004_v62 = vld [vmem:[#allocation126_spill] sm:$0xff] }
 0x756   :  { %5974 = vrcp.f32 %v2356_v52  ;;  %v5973_v4 = vpop.eup %5972  ;;  %v2369_v28 = vadd.f32 1.0, %v5971_v27  ;;  %v9005_v52 = vld [vmem:[#allocation127_spill] sm:$0xff]  ;;  %v9006_v27 = vld [vmem:[#allocation128_spill] sm:$0xff] }
 0x757   :  { %5976 = vrcp.f32 %v2362_v49  ;;  %v9000_v49 = vld [vmem:[#allocation122_spill] sm:$0xff] }
 0x758   :  { %5978 = vrcp.f32 %v2369_v28  ;;  %v9010_v28 = vld [vmem:[#allocation132_spill] sm:$0xff] }
 0x760   :  { %v5975_v39 = vpop.eup %5974 }
 0x761   :  { %v5977_v14 = vpop.eup %5976  ;;  %v2373_v5 = vmul.f32 %v5975_v39, %v5973_v4  ;;  %v9001_v4 = vld [vmem:[#allocation123_spill] sm:$0xff]  ;;  %v9007_v39 = vld [vmem:[#allocation129_spill] sm:$0xff] }
 0x762   :  { %v2372_v63 = vmul.f32 %v5977_v14, %v7265_v61  ;;  %v5979_v50 = vpop.eup %5978  ;;  %v8999_v61 = vld [vmem:[#allocation121_spill] sm:$0xff]  ;;  %v9008_v14 = vld [vmem:[#allocation130_spill] sm:$0xff] }
 0x764   :  { %v7421_v57 = vadd.f32 %v2373_v5, %v2372_v63  ;;  %v9009_v5 = vld [vmem:[#allocation131_spill] sm:$0xff]  ;;  %v9011_v63 = vld [vmem:[#allocation133_spill] sm:$0xff] }
 0x766   :  { %5980 = vtanh.f32 %v7421_v57 }
 0x770   :  { %v5981_v18 = vpop.eup %5980 }
 0x771   :  { %v7424_v15 = vmul.f32 %v5981_v18, %v5979_v50  ;;  %v9012_v50 = vld [vmem:[#allocation134_spill] sm:$0xff]  ;;  %v9013_v18 = vld [vmem:[#allocation135_spill] sm:$0xff] }
 0x773   :  { %2442 = vmatmul.mubr.f32.vlgmr.msra.gmra.mrb[22].mxu0 %v7424_v15  ;;  %2513 = vmatmul.mubr.f32.vlgmr.msra.gmra.mrb[22].mxu1 %v7424_v15 }
 0x774   :  { %5164 = vmatpush1.bf16.msra.mxu0 %v8627_v38  ;;  %5228 = vmatpush1.bf16.msra.mxu1 %v8628_v59 }
 0x775   :  { %2583 = vmatprep.mubr.f32.mxu0 %v7412_v30  ;;  %2654 = vmatprep.mubr.f32.mxu1 %v7412_v30  ;;  %v9014_v30 = vld [vmem:[#allocation136_spill] sm:$0xff] }
 0x776   :  { %5166 = vmatprep.subr.bf16.mxu0 %v8629_v53  ;;  %5230 = vmatprep.subr.bf16.mxu1 %v8630_v35 }
 0x778   :  { %5168 = vmatpush1.bf16.msra.mxu0 %v8631_v21  ;;  %5232 = vmatpush1.bf16.msra.mxu1 %v8720_v29 }
 0x779   :  { %5170 = vmatprep.subr.bf16.mxu0 %v8721_v12  ;;  %5234 = vmatprep.subr.bf16.mxu1 %v8722_v9 }
 0x77c   :  { %5172 = vmatpush1.bf16.msra.mxu0 %v8723_v42  ;;  %5236 = vmatpush1.bf16.msra.mxu1 %v8724_v16 }
 0x77d   :  { %5174 = vmatprep.subr.bf16.mxu0 %v8813_v2  ;;  %5238 = vmatprep.subr.bf16.mxu1 %v8814_v41 }
 0x780   :  { %5176 = vmatpush1.bf16.msra.mxu0 %v8815_v17  ;;  %5240 = vmatpush1.bf16.msra.mxu1 %v8816_v48 }
 0x781   :  { %5178 = vmatprep.subr.bf16.mxu0 %v8817_v13  ;;  %5242 = vmatprep.subr.bf16.mxu1 %v8906_v34 }
 0x784   :  { %5180 = vmatpush1.bf16.msra.mxu0 %v8907_v47  ;;  %5244 = vmatpush1.bf16.msra.mxu1 %v8820_v19 }
 0x785   :  { %5182 = vmatprep.subr.bf16.mxu0 %v8821_v54  ;;  %5246 = vmatprep.subr.bf16.mxu1 %v8822_v8 }
 0x788   :  { %5184 = vmatpush1.bf16.msra.mxu0 %v8823_v1  ;;  %5248 = vmatpush1.bf16.msra.mxu1 %v8824_v32 }
 0x789   :  { %5186 = vmatprep.subr.bf16.mxu0 %v8825_v58  ;;  %5250 = vmatprep.subr.bf16.mxu1 %v8826_v25 }
 0x78c   :  { %5188 = vmatpush1.bf16.msra.mxu0 %v8827_v36  ;;  %5252 = vmatpush1.bf16.msra.mxu1 %v8828_v7 }
 0x78d   :  { %5190 = vmatprep.subr.bf16.mxu0 %v8829_v20  ;;  %5254 = vmatprep.subr.bf16.mxu1 %v8830_v22 }
 0x790   :  { %5192 = vmatpush1.bf16.msra.mxu0 %v8743_v3  ;;  %5256 = vmatpush1.bf16.msra.mxu1 %v8744_v33 }
 0x791   :  { %5194 = vmatprep.subr.bf16.mxu0 %v8745_v11  ;;  %5258 = vmatprep.subr.bf16.mxu1 %v8746_v43 }
 0x794   :  { %5196 = vmatpush1.bf16.msra.mxu0 %v8747_v60  ;;  %5260 = vmatpush1.bf16.msra.mxu1 %v8748_v24 }
 0x795   :  { %5198 = vmatprep.subr.bf16.mxu0 %v8749_v31  ;;  %5262 = vmatprep.subr.bf16.mxu1 %v8750_v37 }
 0x798   :  { %5200 = vmatpush1.bf16.msra.mxu0 %v8751_v55  ;;  %5264 = vmatpush1.bf16.msra.mxu1 %v8752_v46 }
 0x799   :  { %5202 = vmatprep.subr.bf16.mxu0 %v8753_v51  ;;  %5266 = vmatprep.subr.bf16.mxu1 %v8666_v0 }
 0x79c   :  { %5204 = vmatpush1.bf16.msra.mxu0 %v8667_v45  ;;  %5268 = vmatpush1.bf16.msra.mxu1 %v8999_v61 }
 0x79d   :  { %5206 = vmatprep.subr.bf16.mxu0 %v9000_v49  ;;  %5270 = vmatprep.subr.bf16.mxu1 %v9001_v4 }
 0x7a0   :  { %5208 = vmatpush1.bf16.msra.mxu0 %v9002_v26  ;;  %5272 = vmatpush1.bf16.msra.mxu1 %v9003_v6  ;;  %v9087_v26 = vld [vmem:[#allocation142_spill] sm:$0xff] }
 0x7a1   :  { %5210 = vmatprep.subr.bf16.mxu0 %v9004_v62  ;;  %5274 = vmatprep.subr.bf16.mxu1 %v9005_v52  ;;  %v9015_v62 = vld [vmem:[#allocation137_spill] sm:$0xff]  ;;  %v9016_v52 = vld [vmem:[#allocation138_spill] sm:$0xff] }
 0x7a4   :  { %5212 = vmatpush1.bf16.msra.mxu0 %v9006_v27  ;;  %5276 = vmatpush1.bf16.msra.mxu1 %v9007_v39  ;;  %v9017_v27 = vld [vmem:[#allocation139_spill] sm:$0xff]  ;;  %v9018_v39 = vld [vmem:[#allocation140_spill] sm:$0xff] }
 0x7a5   :  { %5214 = vmatprep.subr.bf16.mxu0 %v9008_v14  ;;  %5278 = vmatprep.subr.bf16.mxu1 %v9009_v5  ;;  %v9019_v14 = vld [vmem:[#allocation141_spill] sm:$0xff]  ;;  %v9020_v5 = vld [vmem:[#allocation8_spill] sm:$0xff] }
 0x7a8   :  { %5216 = vmatpush1.bf16.msra.mxu0 %v9010_v28  ;;  %5280 = vmatpush1.bf16.msra.mxu1 %v9011_v63  ;;  %v9021_v28 = vld [vmem:[#allocation11_spill] sm:$0xff]  ;;  %v9086_v63 = vld [vmem:[#allocation74_spill] sm:$0xff] }
 0x7a9   :  { %5218 = vmatprep.subr.bf16.mxu0 %v9012_v50  ;;  %5282 = vmatprep.subr.bf16.mxu1 %v9013_v18  ;;  %v9022_v18 = vld [vmem:[#allocation9_spill] sm:$0xff] }
 0x7aa   :  { %v9031_v50 = vld [vmem:[#allocation21_spill] sm:$0xff] }
 0x7ac   :  { %5220 = vmatpush1.bf16.msra.mxu0 %v9014_v30  ;;  %5284 = vmatpush1.bf16.msra.mxu1 %v9015_v62  ;;  %v9023_v30 = vld [vmem:[#allocation13_spill] sm:$0xff]  ;;  %v9024_v62 = vld [vmem:[#allocation10_spill] sm:$0xff] }
 0x7ad   :  { %5222 = vmatprep.subr.bf16.mxu0 %v9016_v52  ;;  %5286 = vmatprep.subr.bf16.mxu1 %v9017_v27  ;;  %v9025_v52 = vld [vmem:[#allocation15_spill] sm:$0xff]  ;;  %v9026_v27 = vld [vmem:[#allocation12_spill] sm:$0xff] }
 0x7b0   :  { %5224 = vmatpush1.bf16.msra.mxu0 %v9018_v39  ;;  %5288 = vmatpush1.bf16.msra.mxu1 %v9019_v14  ;;  %v9027_v39 = vld [vmem:[#allocation17_spill] sm:$0xff]  ;;  %v9028_v14 = vld [vmem:[#allocation14_spill] sm:$0xff] }
 0x7b1   :  { %5290 = vmatprep.subr.bf16.mxu0 %v9020_v5  ;;  %5354 = vmatprep.subr.bf16.mxu1 %v9021_v28  ;;  %v9029_v5 = vld [vmem:[#allocation19_spill] sm:$0xff]  ;;  %v9030_v28 = vld [vmem:[#allocation16_spill] sm:$0xff] }
 0x7b3   :  { %2584 = vmatmul.mubr.f32.vlgmr.msra.gmra.mrb[24].mxu0 %v7424_v15  ;;  %2655 = vmatmul.mubr.f32.vlgmr.msra.gmra.mrb[24].mxu1 %v7424_v15  ;;  %v9032_v15 = vld [vmem:[#allocation18_spill] sm:$0xff] }
 0x7b4   :  { %5292 = vmatpush1.bf16.msra.mxu0 %v9022_v18  ;;  %5356 = vmatpush1.bf16.msra.mxu1 %v9023_v30  ;;  %v9033_v18 = vld [vmem:[#allocation23_spill] sm:$0xff]  ;;  %v9034_v30 = vld [vmem:[#allocation20_spill] sm:$0xff] }
 0x7b5   :  { %5294 = vmatprep.subr.bf16.mxu0 %v9024_v62  ;;  %5358 = vmatprep.subr.bf16.mxu1 %v9025_v52  ;;  %v9035_v62 = vld [vmem:[#allocation25_spill] sm:$0xff]  ;;  %v9036_v52 = vld [vmem:[#allocation22_spill] sm:$0xff] }
 0x7b8   :  { %5296 = vmatpush1.bf16.msra.mxu0 %v9026_v27  ;;  %5360 = vmatpush1.bf16.msra.mxu1 %v9027_v39  ;;  %v9037_v27 = vld [vmem:[#allocation26_spill] sm:$0xff]  ;;  %v9038_v39 = vld [vmem:[#allocation24_spill] sm:$0xff] }
 0x7b9   :  { %5298 = vmatprep.subr.bf16.mxu0 %v9028_v14  ;;  %5362 = vmatprep.subr.bf16.mxu1 %v9029_v5  ;;  %v9039_v14 = vld [vmem:[#allocation27_spill] sm:$0xff]  ;;  %v9040_v5 = vld [vmem:[#allocation28_spill] sm:$0xff] }
 0x7bc   :  { %5300 = vmatpush1.bf16.msra.mxu0 %v9030_v28  ;;  %5364 = vmatpush1.bf16.msra.mxu1 %v9031_v50  ;;  %v9041_v28 = vld [vmem:[#allocation29_spill] sm:$0xff]  ;;  %v9042_v50 = vld [vmem:[#allocation30_spill] sm:$0xff] }
 0x7bd   :  { %5302 = vmatprep.subr.bf16.mxu0 %v9032_v15  ;;  %5366 = vmatprep.subr.bf16.mxu1 %v9033_v18  ;;  %v9043_v15 = vld [vmem:[#allocation31_spill] sm:$0xff]  ;;  %v9044_v18 = vld [vmem:[#allocation32_spill] sm:$0xff] }
 0x7c0   :  { %5304 = vmatpush1.bf16.msra.mxu0 %v9034_v30  ;;  %5368 = vmatpush1.bf16.msra.mxu1 %v9035_v62  ;;  %v9045_v30 = vld [vmem:[#allocation33_spill] sm:$0xff]  ;;  %v9046_v62 = vld [vmem:[#allocation34_spill] sm:$0xff] }
 0x7c1   :  { %5306 = vmatprep.subr.bf16.mxu0 %v9036_v52  ;;  %5370 = vmatprep.subr.bf16.mxu1 %v9037_v27  ;;  %v9047_v52 = vld [vmem:[#allocation35_spill] sm:$0xff]  ;;  %v9048_v27 = vld [vmem:[#allocation36_spill] sm:$0xff] }
 0x7c4   :  { %5308 = vmatpush1.bf16.msra.mxu0 %v9038_v39  ;;  %5372 = vmatpush1.bf16.msra.mxu1 %v9039_v14  ;;  %v9049_v39 = vld [vmem:[#allocation37_spill] sm:$0xff]  ;;  %v9050_v14 = vld [vmem:[#allocation38_spill] sm:$0xff] }
 0x7c5   :  { %5310 = vmatprep.subr.bf16.mxu0 %v9040_v5  ;;  %5374 = vmatprep.subr.bf16.mxu1 %v9041_v28  ;;  %v9051_v5 = vld [vmem:[#allocation39_spill] sm:$0xff]  ;;  %v9052_v28 = vld [vmem:[#allocation40_spill] sm:$0xff] }
 0x7c8   :  { %5312 = vmatpush1.bf16.msra.mxu0 %v9042_v50  ;;  %5376 = vmatpush1.bf16.msra.mxu1 %v9043_v15  ;;  %v9053_v50 = vld [vmem:[#allocation41_spill] sm:$0xff]  ;;  %v9054_v15 = vld [vmem:[#allocation42_spill] sm:$0xff] }
 0x7c9   :  { %5314 = vmatprep.subr.bf16.mxu0 %v9044_v18  ;;  %5378 = vmatprep.subr.bf16.mxu1 %v9045_v30  ;;  %v9055_v18 = vld [vmem:[#allocation43_spill] sm:$0xff]  ;;  %v9056_v30 = vld [vmem:[#allocation44_spill] sm:$0xff] }
 0x7cc   :  { %5316 = vmatpush1.bf16.msra.mxu0 %v9046_v62  ;;  %5380 = vmatpush1.bf16.msra.mxu1 %v9047_v52  ;;  %v9057_v62 = vld [vmem:[#allocation45_spill] sm:$0xff]  ;;  %v9058_v52 = vld [vmem:[#allocation46_spill] sm:$0xff] }
 0x7cd   :  { %5318 = vmatprep.subr.bf16.mxu0 %v9048_v27  ;;  %5382 = vmatprep.subr.bf16.mxu1 %v9049_v39  ;;  %v9059_v27 = vld [vmem:[#allocation47_spill] sm:$0xff]  ;;  %v9060_v39 = vld [vmem:[#allocation48_spill] sm:$0xff] }
 0x7d0   :  { %5320 = vmatpush1.bf16.msra.mxu0 %v9050_v14  ;;  %5384 = vmatpush1.bf16.msra.mxu1 %v9051_v5  ;;  %v9061_v14 = vld [vmem:[#allocation49_spill] sm:$0xff]  ;;  %v9062_v5 = vld [vmem:[#allocation50_spill] sm:$0xff] }
 0x7d1   :  { %5322 = vmatprep.subr.bf16.mxu0 %v9052_v28  ;;  %5386 = vmatprep.subr.bf16.mxu1 %v9053_v50  ;;  %v9063_v28 = vld [vmem:[#allocation51_spill] sm:$0xff]  ;;  %v9064_v50 = vld [vmem:[#allocation52_spill] sm:$0xff] }
 0x7d4   :  { %5324 = vmatpush1.bf16.msra.mxu0 %v9054_v15  ;;  %5388 = vmatpush1.bf16.msra.mxu1 %v9055_v18  ;;  %v9065_v15 = vld [vmem:[#allocation53_spill] sm:$0xff]  ;;  %v9066_v18 = vld [vmem:[#allocation54_spill] sm:$0xff] }
 0x7d5   :  { %5326 = vmatprep.subr.bf16.mxu0 %v9056_v30  ;;  %5390 = vmatprep.subr.bf16.mxu1 %v9057_v62  ;;  %v9067_v30 = vld [vmem:[#allocation55_spill] sm:$0xff]  ;;  %v9068_v62 = vld [vmem:[#allocation56_spill] sm:$0xff] }
 0x7d8   :  { %5328 = vmatpush1.bf16.msra.mxu0 %v9058_v52  ;;  %5392 = vmatpush1.bf16.msra.mxu1 %v9059_v27  ;;  %v9069_v52 = vld [vmem:[#allocation57_spill] sm:$0xff]  ;;  %v9070_v27 = vld [vmem:[#allocation58_spill] sm:$0xff] }
 0x7d9   :  { %5330 = vmatprep.subr.bf16.mxu0 %v9060_v39  ;;  %5394 = vmatprep.subr.bf16.mxu1 %v9061_v14  ;;  %v9071_v39 = vld [vmem:[#allocation59_spill] sm:$0xff]  ;;  %v9072_v14 = vld [vmem:[#allocation60_spill] sm:$0xff] }
 0x7dc   :  { %5332 = vmatpush1.bf16.msra.mxu0 %v9062_v5  ;;  %5396 = vmatpush1.bf16.msra.mxu1 %v9063_v28  ;;  %v9073_v5 = vld [vmem:[#allocation61_spill] sm:$0xff]  ;;  %v9074_v28 = vld [vmem:[#allocation62_spill] sm:$0xff] }
 0x7dd   :  { %5334 = vmatprep.subr.bf16.mxu0 %v9064_v50  ;;  %5398 = vmatprep.subr.bf16.mxu1 %v9065_v15  ;;  %v9075_v50 = vld [vmem:[#allocation63_spill] sm:$0xff]  ;;  %v9076_v15 = vld [vmem:[#allocation64_spill] sm:$0xff] }
 0x7e0   :  { %5336 = vmatpush1.bf16.msra.mxu0 %v9066_v18  ;;  %5400 = vmatpush1.bf16.msra.mxu1 %v9067_v30  ;;  %v9077_v18 = vld [vmem:[#allocation65_spill] sm:$0xff]  ;;  %v9078_v30 = vld [vmem:[#allocation66_spill] sm:$0xff] }
 0x7e1   :  { %5338 = vmatprep.subr.bf16.mxu0 %v9068_v62  ;;  %5402 = vmatprep.subr.bf16.mxu1 %v9069_v52  ;;  %v9079_v62 = vld [vmem:[#allocation67_spill] sm:$0xff]  ;;  %v9080_v52 = vld [vmem:[#allocation68_spill] sm:$0xff] }
 0x7e4   :  { %5340 = vmatpush1.bf16.msra.mxu0 %v9070_v27  ;;  %5404 = vmatpush1.bf16.msra.mxu1 %v9071_v39  ;;  %v9081_v27 = vld [vmem:[#allocation69_spill] sm:$0xff]  ;;  %v9082_v39 = vld [vmem:[#allocation70_spill] sm:$0xff] }
 0x7e5   :  { %5342 = vmatprep.subr.bf16.mxu0 %v9072_v14  ;;  %5406 = vmatprep.subr.bf16.mxu1 %v9073_v5  ;;  %v9083_v14 = vld [vmem:[#allocation71_spill] sm:$0xff]  ;;  %v9084_v5 = vld [vmem:[#allocation72_spill] sm:$0xff] }
 0x7e8   :  { %5344 = vmatpush1.bf16.msra.mxu0 %v9074_v28  ;;  %5408 = vmatpush1.bf16.msra.mxu1 %v9075_v50  ;;  %v9085_v28 = vld [vmem:[#allocation73_spill] sm:$0xff] }
 0x7e9   :  { %5346 = vmatprep.subr.bf16.mxu0 %v9076_v15  ;;  %5410 = vmatprep.subr.bf16.mxu1 %v9077_v18 }
 0x7ec   :  { %5348 = vmatpush1.bf16.msra.mxu0 %v9078_v30  ;;  %5412 = vmatpush1.bf16.msra.mxu1 %v9079_v62 }
 0x7ed   :  { %5350 = vmatprep.subr.bf16.mxu0 %v9080_v52  ;;  %5414 = vmatprep.subr.bf16.mxu1 %v9081_v27 }
 0x7f0   :  { %5352 = vmatpush1.bf16.msra.mxu0 %v9082_v39  ;;  %5416 = vmatpush1.bf16.msra.mxu1 %v9083_v14 }
 0x7f1   :  { %5418 = vmatprep.subr.bf16.mxu0 %v9084_v5  ;;  %5482 = vmatprep.subr.bf16.mxu1 %v9085_v28 }
 0x846   :  { %v2443_v50 = vpop.f32.mrb[22].mxu0  ;;  %v2514_v15 = vpop.f32.mrb[22].mxu1 }
 0x847   :  { %v2661_v18 = vadd.f32 %v2443_v50, %v9086_v63  ;;  %v2445_v6 = vpop.f32.mrb[23].mxu0  ;;  %v2516_v30 = vpop.f32.mrb[23].mxu1  ;;  %v2663_v14 = vadd.f32 %v2514_v15, %v8808_v10 }
 0x848   :  { %v2662_v62 = vadd.f32 %v2445_v6, %v9087_v26  ;;  %v2664_v39 = vadd.f32 %v2516_v30, %v8713_v23 }
 0x849   :  { %v3565_v4 = vmul.f32 -1.442695, %v2661_v18 }
 0x84a   :  { %v3566_v52 = vmul.f32 -1.442695, %v2662_v62  ;;  %v3567_v27 = vmul.f32 -1.442695, %v2664_v39 }
 0x84b   :  { %5982 = vpow2.f32 %v3565_v4 }
 0x84c   :  { %5984 = vpow2.f32 %v3566_v52  ;;  %v9088_v52 = vld [vmem:[#allocation83_spill] sm:$0xff] }
 0x84d   :  { %5986 = vpow2.f32 %v3567_v27 }
 0x84e   :  { %5988 = vtanh.f32 %v2663_v14  ;;  %v9090_v14 = vld [vmem:[#allocation75_spill] sm:$0xff] }
 0x855   :  { %v5983_v5 = vpop.eup %5982 }
 0x856   :  { %v5985_v49 = vpop.eup %5984  ;;  %v2668_v28 = vadd.f32 1.0, %v5983_v5 }
 0x857   :  { %v2674_v61 = vadd.f32 1.0, %v5985_v49  ;;  %v5987_v50 = vpop.eup %5986 }
 0x858   :  { %5990 = vrcp.f32 %v2668_v28  ;;  %v5989_v63 = vpop.eup %5988  ;;  %v2681_v4 = vadd.f32 1.0, %v5987_v50 }
 0x859   :  { %5992 = vrcp.f32 %v2674_v61 }
 0x85a   :  { %5994 = vrcp.f32 %v2681_v4 }
 0x862   :  { %v5991_v6 = vpop.eup %5990 }
 0x863   :  { %v5993_v18 = vpop.eup %5992  ;;  %v2685_v62 = vmul.f32 %v5991_v6, %v5989_v63 }
 0x864   :  { %v2684_v26 = vmul.f32 %v5993_v18, %v9088_v52  ;;  %v5995_v39 = vpop.eup %5994 }
 0x866   :  { %v7565_v30 = vadd.f32 %v2685_v62, %v2684_v26 }
 0x868   :  { %9089 = vst [vmem:[#allocation119_spill] sm:$0xff] %v7565_v30  ;;  %5996 = vtanh.f32 %v7565_v30 }
 0x872   :  { %v5997_v15 = vpop.eup %5996 }
 0x873   :  { %v7568_v27 = vmul.f32 %v5997_v15, %v5995_v39 }
 0x875   :  { %2781 = vmatprep.mubr.f32.mxu0 %v7568_v27  ;;  %2852 = vmatprep.mubr.f32.mxu1 %v7568_v27 }
 0x886   :  { %v2585_v61 = vpop.f32.mrb[24].mxu0  ;;  %v2656_v49 = vpop.f32.mrb[24].mxu1 }
 0x887   :  { %v2689_v63 = vadd.f32 %v2585_v61, %v9090_v14  ;;  %v2587_v5 = vpop.f32.mrb[25].mxu0  ;;  %v2658_v28 = vpop.f32.mrb[25].mxu1  ;;  %v2691_v4 = vadd.f32 %v2656_v49, %v8625_v40 }
 0x888   :  { %v2690_v26 = vadd.f32 %v2587_v5, %v8719_v56  ;;  %v2692_v18 = vadd.f32 %v2658_v28, %v8624_v44 }
 0x889   :  { %v3568_v50 = vmul.f32 -1.442695, %v2689_v63 }
 0x88a   :  { %v3569_v6 = vmul.f32 -1.442695, %v2690_v26  ;;  %v3570_v62 = vmul.f32 -1.442695, %v2692_v18 }
 0x88b   :  { %5998 = vpow2.f32 %v3568_v50 }
 0x88c   :  { %6000 = vpow2.f32 %v3569_v6 }
 0x88d   :  { %6002 = vpow2.f32 %v3570_v62 }
 0x88e   :  { %6004 = vtanh.f32 %v2691_v4  ;;  %v9135_v4 = vld [vmem:[#allocation31_spill] sm:$0xff] }
 0x895   :  { %v5999_v52 = vpop.eup %5998 }
 0x896   :  { %v6001_v39 = vpop.eup %6000  ;;  %v2696_v15 = vadd.f32 1.0, %v5999_v52  ;;  %v9136_v52 = vld [vmem:[#allocation32_spill] sm:$0xff] }
 0x897   :  { %v2702_v30 = vadd.f32 1.0, %v6001_v39  ;;  %v6003_v61 = vpop.eup %6002  ;;  %v9137_v39 = vld [vmem:[#allocation33_spill] sm:$0xff] }
 0x898   :  { %6006 = vrcp.f32 %v2696_v15  ;;  %v6005_v14 = vpop.eup %6004  ;;  %v2709_v50 = vadd.f32 1.0, %v6003_v61  ;;  %v9138_v15 = vld [vmem:[#allocation34_spill] sm:$0xff]  ;;  %v9139_v61 = vld [vmem:[#allocation35_spill] sm:$0xff] }
 0x899   :  { %6008 = vrcp.f32 %v2702_v30  ;;  %v9133_v30 = vld [vmem:[#allocation29_spill] sm:$0xff] }
 0x89a   :  { %6010 = vrcp.f32 %v2709_v50  ;;  %v9143_v50 = vld [vmem:[#allocation39_spill] sm:$0xff] }
 0x8a2   :  { %v6007_v5 = vpop.eup %6006 }
 0x8a3   :  { %v6009_v63 = vpop.eup %6008  ;;  %v2713_v26 = vmul.f32 %v6007_v5, %v6005_v14  ;;  %v9134_v14 = vld [vmem:[#allocation30_spill] sm:$0xff]  ;;  %v9140_v5 = vld [vmem:[#allocation36_spill] sm:$0xff] }
 0x8a4   :  { %v2712_v6 = vmul.f32 %v6009_v63, %v7421_v57  ;;  %v6011_v49 = vpop.eup %6010  ;;  %v9132_v57 = vld [vmem:[#allocation28_spill] sm:$0xff]  ;;  %v9141_v63 = vld [vmem:[#allocation37_spill] sm:$0xff] }
 0x8a6   :  { %v7577_v28 = vadd.f32 %v2713_v26, %v2712_v6  ;;  %v9142_v26 = vld [vmem:[#allocation38_spill] sm:$0xff]  ;;  %v9144_v6 = vld [vmem:[#allocation40_spill] sm:$0xff] }
 0x8a8   :  { %6012 = vtanh.f32 %v7577_v28 }
 0x8b2   :  { %v6013_v18 = vpop.eup %6012 }
 0x8b3   :  { %v7580_v62 = vmul.f32 %v6013_v18, %v6011_v49  ;;  %v9145_v49 = vld [vmem:[#allocation41_spill] sm:$0xff]  ;;  %v9146_v18 = vld [vmem:[#allocation42_spill] sm:$0xff] }
 0x8b5   :  { %2782 = vmatmul.mubr.f32.vlgmr.msra.gmra.mrb[26].mxu0 %v7580_v62  ;;  %2853 = vmatmul.mubr.f32.vlgmr.msra.gmra.mrb[26].mxu1 %v7580_v62 }
 0x8b6   :  { %5420 = vmatpush1.bf16.msra.mxu0 %v8627_v38  ;;  %5484 = vmatpush1.bf16.msra.mxu1 %v8628_v59  ;;  %v9091_v38 = vld [vmem:[#allocation121_spill] sm:$0xff]  ;;  %v9092_v59 = vld [vmem:[#allocation122_spill] sm:$0xff] }
 0x8b7   :  { %2923 = vmatprep.mubr.f32.mxu0 %v7568_v27  ;;  %2994 = vmatprep.mubr.f32.mxu1 %v7568_v27 }
 0x8b8   :  { %5422 = vmatprep.subr.bf16.mxu0 %v8629_v53  ;;  %5486 = vmatprep.subr.bf16.mxu1 %v8630_v35  ;;  %v9093_v53 = vld [vmem:[#allocation123_spill] sm:$0xff]  ;;  %v9094_v35 = vld [vmem:[#allocation124_spill] sm:$0xff] }
 0x8ba   :  { %5424 = vmatpush1.bf16.msra.mxu0 %v8631_v21  ;;  %5488 = vmatpush1.bf16.msra.mxu1 %v8720_v29  ;;  %v9095_v21 = vld [vmem:[#allocation125_spill] sm:$0xff]  ;;  %v9097_v29 = vld [vmem:[#allocation127_spill] sm:$0xff] }
 0x8bb   :  { %5426 = vmatprep.subr.bf16.mxu0 %v8721_v12  ;;  %5490 = vmatprep.subr.bf16.mxu1 %v8722_v9  ;;  %v9098_v12 = vld [vmem:[#allocation128_spill] sm:$0xff]  ;;  %v9099_v9 = vld [vmem:[#allocation129_spill] sm:$0xff] }
 0x8be   :  { %5428 = vmatpush1.bf16.msra.mxu0 %v8723_v42  ;;  %5492 = vmatpush1.bf16.msra.mxu1 %v8724_v16  ;;  %v9102_v42 = vld [vmem:[#allocation132_spill] sm:$0xff]  ;;  %v9103_v16 = vld [vmem:[#allocation133_spill] sm:$0xff] }
 0x8bf   :  { %5430 = vmatprep.subr.bf16.mxu0 %v8813_v2  ;;  %5494 = vmatprep.subr.bf16.mxu1 %v8814_v41  ;;  %v9115_v2 = vld [vmem:[#allocation13_spill] sm:$0xff]  ;;  %v9116_v41 = vld [vmem:[#allocation10_spill] sm:$0xff] }
 0x8c2   :  { %5432 = vmatpush1.bf16.msra.mxu0 %v8815_v17  ;;  %5496 = vmatpush1.bf16.msra.mxu1 %v8816_v48  ;;  %v9117_v17 = vld [vmem:[#allocation15_spill] sm:$0xff]  ;;  %v9118_v48 = vld [vmem:[#allocation12_spill] sm:$0xff] }
 0x8c3   :  { %5434 = vmatprep.subr.bf16.mxu0 %v8817_v13  ;;  %5498 = vmatprep.subr.bf16.mxu1 %v8906_v34  ;;  %v9119_v13 = vld [vmem:[#allocation17_spill] sm:$0xff]  ;;  %v9130_v34 = vld [vmem:[#allocation24_spill] sm:$0xff] }
 0x8c6   :  { %5436 = vmatpush1.bf16.msra.mxu0 %v8907_v47  ;;  %5500 = vmatpush1.bf16.msra.mxu1 %v8820_v19  ;;  %v9122_v19 = vld [vmem:[#allocation16_spill] sm:$0xff]  ;;  %v9131_v47 = vld [vmem:[#allocation27_spill] sm:$0xff] }
 0x8c7   :  { %5438 = vmatprep.subr.bf16.mxu0 %v8821_v54  ;;  %5502 = vmatprep.subr.bf16.mxu1 %v8822_v8  ;;  %v9123_v54 = vld [vmem:[#allocation21_spill] sm:$0xff]  ;;  %v9124_v8 = vld [vmem:[#allocation18_spill] sm:$0xff] }
 0x8ca   :  { %5440 = vmatpush1.bf16.msra.mxu0 %v8823_v1  ;;  %5504 = vmatpush1.bf16.msra.mxu1 %v8824_v32  ;;  %v9125_v1 = vld [vmem:[#allocation23_spill] sm:$0xff]  ;;  %v9126_v32 = vld [vmem:[#allocation20_spill] sm:$0xff] }
 0x8cb   :  { %5442 = vmatprep.subr.bf16.mxu0 %v8825_v58  ;;  %5506 = vmatprep.subr.bf16.mxu1 %v8826_v25  ;;  %v9127_v58 = vld [vmem:[#allocation25_spill] sm:$0xff]  ;;  %v9128_v25 = vld [vmem:[#allocation22_spill] sm:$0xff] }
 0x8ce   :  { %5444 = vmatpush1.bf16.msra.mxu0 %v8827_v36  ;;  %5508 = vmatpush1.bf16.msra.mxu1 %v8828_v7  ;;  %v9114_v7 = vld [vmem:[#allocation9_spill] sm:$0xff]  ;;  %v9129_v36 = vld [vmem:[#allocation26_spill] sm:$0xff] }
 0x8cf   :  { %5446 = vmatprep.subr.bf16.mxu0 %v8829_v20  ;;  %5510 = vmatprep.subr.bf16.mxu1 %v8830_v22  ;;  %v9120_v20 = vld [vmem:[#allocation14_spill] sm:$0xff]  ;;  %v9121_v22 = vld [vmem:[#allocation19_spill] sm:$0xff] }
 0x8d2   :  { %5448 = vmatpush1.bf16.msra.mxu0 %v8743_v3  ;;  %5512 = vmatpush1.bf16.msra.mxu1 %v8744_v33  ;;  %v9111_v3 = vld [vmem:[#allocation141_spill] sm:$0xff]  ;;  %v9112_v33 = vld [vmem:[#allocation8_spill] sm:$0xff] }
 0x8d3   :  { %5450 = vmatprep.subr.bf16.mxu0 %v8745_v11  ;;  %5514 = vmatprep.subr.bf16.mxu1 %v8746_v43  ;;  %v9096_v43 = vld [vmem:[#allocation126_spill] sm:$0xff]  ;;  %v9113_v11 = vld [vmem:[#allocation11_spill] sm:$0xff] }
 0x8d6   :  { %5452 = vmatpush1.bf16.msra.mxu0 %v8747_v60  ;;  %5516 = vmatpush1.bf16.msra.mxu1 %v8748_v24  ;;  %v9104_v60 = vld [vmem:[#allocation134_spill] sm:$0xff]  ;;  %v9105_v24 = vld [vmem:[#allocation135_spill] sm:$0xff] }
 0x8d7   :  { %5454 = vmatprep.subr.bf16.mxu0 %v8749_v31  ;;  %5518 = vmatprep.subr.bf16.mxu1 %v8750_v37  ;;  %v9106_v31 = vld [vmem:[#allocation136_spill] sm:$0xff]  ;;  %v9107_v37 = vld [vmem:[#allocation137_spill] sm:$0xff] }
 0x8da   :  { %5456 = vmatpush1.bf16.msra.mxu0 %v8751_v55  ;;  %5520 = vmatpush1.bf16.msra.mxu1 %v8752_v46  ;;  %v9108_v55 = vld [vmem:[#allocation138_spill] sm:$0xff]  ;;  %v9109_v46 = vld [vmem:[#allocation139_spill] sm:$0xff] }
 0x8db   :  { %5458 = vmatprep.subr.bf16.mxu0 %v8753_v51  ;;  %5522 = vmatprep.subr.bf16.mxu1 %v8666_v0  ;;  %v9100_v0 = vld [vmem:[#allocation130_spill] sm:$0xff]  ;;  %v9110_v51 = vld [vmem:[#allocation140_spill] sm:$0xff] }
 0x8de   :  { %5460 = vmatpush1.bf16.msra.mxu0 %v8667_v45  ;;  %5524 = vmatpush1.bf16.msra.mxu1 %v9091_v38  ;;  %v9101_v45 = vld [vmem:[#allocation131_spill] sm:$0xff]  ;;  %v9148_v38 = vld [vmem:[#allocation44_spill] sm:$0xff] }
 0x8df   :  { %5462 = vmatprep.subr.bf16.mxu0 %v9092_v59  ;;  %5526 = vmatprep.subr.bf16.mxu1 %v9093_v53  ;;  %v9149_v59 = vld [vmem:[#allocation45_spill] sm:$0xff]  ;;  %v9150_v53 = vld [vmem:[#allocation46_spill] sm:$0xff] }
 0x8e2   :  { %5464 = vmatpush1.bf16.msra.mxu0 %v9094_v35  ;;  %5528 = vmatpush1.bf16.msra.mxu1 %v9095_v21  ;;  %v9151_v35 = vld [vmem:[#allocation47_spill] sm:$0xff]  ;;  %v9152_v21 = vld [vmem:[#allocation48_spill] sm:$0xff] }
 0x8e3   :  { %5466 = vmatprep.subr.bf16.mxu0 %v9096_v43  ;;  %5530 = vmatprep.subr.bf16.mxu1 %v9097_v29  ;;  %v9153_v43 = vld [vmem:[#allocation49_spill] sm:$0xff]  ;;  %v9154_v29 = vld [vmem:[#allocation50_spill] sm:$0xff] }
 0x8e6   :  { %5468 = vmatpush1.bf16.msra.mxu0 %v9098_v12  ;;  %5532 = vmatpush1.bf16.msra.mxu1 %v9099_v9  ;;  %v9155_v12 = vld [vmem:[#allocation51_spill] sm:$0xff]  ;;  %v9156_v9 = vld [vmem:[#allocation52_spill] sm:$0xff] }
 0x8e7   :  { %5470 = vmatprep.subr.bf16.mxu0 %v9100_v0  ;;  %5534 = vmatprep.subr.bf16.mxu1 %v9101_v45  ;;  %v9157_v0 = vld [vmem:[#allocation53_spill] sm:$0xff]  ;;  %v9158_v45 = vld [vmem:[#allocation54_spill] sm:$0xff] }
 0x8ea   :  { %5472 = vmatpush1.bf16.msra.mxu0 %v9102_v42  ;;  %5536 = vmatpush1.bf16.msra.mxu1 %v9103_v16  ;;  %v9159_v42 = vld [vmem:[#allocation55_spill] sm:$0xff]  ;;  %v9160_v16 = vld [vmem:[#allocation56_spill] sm:$0xff] }
 0x8eb   :  { %5474 = vmatprep.subr.bf16.mxu0 %v9104_v60  ;;  %5538 = vmatprep.subr.bf16.mxu1 %v9105_v24  ;;  %v9161_v60 = vld [vmem:[#allocation57_spill] sm:$0xff]  ;;  %v9162_v24 = vld [vmem:[#allocation58_spill] sm:$0xff] }
 0x8ee   :  { %5476 = vmatpush1.bf16.msra.mxu0 %v9106_v31  ;;  %5540 = vmatpush1.bf16.msra.mxu1 %v9107_v37  ;;  %v9163_v31 = vld [vmem:[#allocation59_spill] sm:$0xff]  ;;  %v9164_v37 = vld [vmem:[#allocation60_spill] sm:$0xff] }
 0x8ef   :  { %5478 = vmatprep.subr.bf16.mxu0 %v9108_v55  ;;  %5542 = vmatprep.subr.bf16.mxu1 %v9109_v46  ;;  %v9165_v55 = vld [vmem:[#allocation61_spill] sm:$0xff]  ;;  %v9166_v46 = vld [vmem:[#allocation62_spill] sm:$0xff] }
 0x8f2   :  { %5480 = vmatpush1.bf16.msra.mxu0 %v9110_v51  ;;  %5544 = vmatpush1.bf16.msra.mxu1 %v9111_v3  ;;  %v9167_v51 = vld [vmem:[#allocation63_spill] sm:$0xff]  ;;  %v9168_v3 = vld [vmem:[#allocation64_spill] sm:$0xff] }
 0x8f3   :  { %5546 = vmatprep.subr.bf16.mxu0 %v9112_v33  ;;  %5610 = vmatprep.subr.bf16.mxu1 %v9113_v11  ;;  %v9169_v33 = vld [vmem:[#allocation65_spill] sm:$0xff]  ;;  %v9170_v11 = vld [vmem:[#allocation66_spill] sm:$0xff] }
 0x8f5   :  { %2924 = vmatmul.mubr.f32.vlgmr.msra.gmra.mrb[28].mxu0 %v7580_v62  ;;  %2995 = vmatmul.mubr.f32.vlgmr.msra.gmra.mrb[28].mxu1 %v7580_v62  ;;  %v9147_v62 = vld [vmem:[#allocation43_spill] sm:$0xff] }
 0x8f6   :  { %5548 = vmatpush1.bf16.msra.mxu0 %v9114_v7  ;;  %5612 = vmatpush1.bf16.msra.mxu1 %v9115_v2  ;;  %v9171_v7 = vld [vmem:[#allocation67_spill] sm:$0xff]  ;;  %v9172_v2 = vld [vmem:[#allocation68_spill] sm:$0xff] }
 0x8f7   :  { %5550 = vmatprep.subr.bf16.mxu0 %v9116_v41  ;;  %5614 = vmatprep.subr.bf16.mxu1 %v9117_v17  ;;  %v9173_v41 = vld [vmem:[#allocation69_spill] sm:$0xff]  ;;  %v9174_v17 = vld [vmem:[#allocation70_spill] sm:$0xff] }
 0x8fa   :  { %5552 = vmatpush1.bf16.msra.mxu0 %v9118_v48  ;;  %5616 = vmatpush1.bf16.msra.mxu1 %v9119_v13  ;;  %v9175_v48 = vld [vmem:[#allocation71_spill] sm:$0xff] }
 0x8fb   :  { %5554 = vmatprep.subr.bf16.mxu0 %v9120_v20  ;;  %5618 = vmatprep.subr.bf16.mxu1 %v9121_v22  ;;  %v348_v13 = vld [vmem:[%s8147_s5 + $0x80] sm:$0xff]  ;;  %v349_v20 = vld [vmem:[%s8147_s5 + $0x88] sm:$0xff] }
 0x8fc   :  { %v380_v22 = vld [vmem:[%s8147_s5 + $0x180] sm:$0xff] }
 0x8fe   :  { %5556 = vmatpush1.bf16.msra.mxu0 %v9122_v19  ;;  %5620 = vmatpush1.bf16.msra.mxu1 %v9123_v54  ;;  %v5673_v19 = vpack.c.bf16 %v349_v20, %v348_v13  ;;  %v381_v54 = vld [vmem:[%s8147_s5 + $0x188] sm:$0xff]  ;;  %v364_v20 = vld [vmem:[%s8147_s5 + $0x100] sm:$0xff] }
 0x8ff   :  { %5558 = vmatprep.subr.bf16.mxu0 %v9124_v8  ;;  %5622 = vmatprep.subr.bf16.mxu1 %v9125_v1  ;;  %v5705_v8 = vpack.c.bf16 %v381_v54, %v380_v22  ;;  %v333_v13 = vld [vmem:[%s8147_s5 + $0x8] sm:$0xff]  ;;  %v351_v54 = vld [vmem:[%s8147_s5 + $0x98] sm:$0xff] }
 0x900   :  { %v365_v22 = vld [vmem:[%s8147_s5 + $0x108] sm:$0xff] }
 0x902   :  { %5560 = vmatpush1.bf16.msra.mxu0 %v9126_v32  ;;  %5624 = vmatpush1.bf16.msra.mxu1 %v9127_v58  ;;  %v9176_v58 = vld [vmem:[#allocation74_spill] sm:$0xff] }
 0x903   :  { %5562 = vmatprep.subr.bf16.mxu0 %v9128_v25  ;;  %5626 = vmatprep.subr.bf16.mxu1 %v9129_v36 }
 0x906   :  { %5564 = vmatpush1.bf16.msra.mxu0 %v9130_v34  ;;  %5628 = vmatpush1.bf16.msra.mxu1 %v9131_v47  ;;  %v9177_v47 = vld [vmem:[#allocation142_spill] sm:$0xff] }
 0x907   :  { %5566 = vmatprep.subr.bf16.mxu0 %v9132_v57  ;;  %5630 = vmatprep.subr.bf16.mxu1 %v9133_v30 }
 0x90a   :  { %5568 = vmatpush1.bf16.msra.mxu0 %v9134_v14  ;;  %5632 = vmatpush1.bf16.msra.mxu1 %v9135_v4 }
 0x90b   :  { %5570 = vmatprep.subr.bf16.mxu0 %v9136_v52  ;;  %5634 = vmatprep.subr.bf16.mxu1 %v9137_v39 }
 0x90e   :  { %5572 = vmatpush1.bf16.msra.mxu0 %v9138_v15  ;;  %5636 = vmatpush1.bf16.msra.mxu1 %v9139_v61 }
 0x90f   :  { %5574 = vmatprep.subr.bf16.mxu0 %v9140_v5  ;;  %5638 = vmatprep.subr.bf16.mxu1 %v9141_v63 }
 0x912   :  { %5576 = vmatpush1.bf16.msra.mxu0 %v9142_v26  ;;  %5640 = vmatpush1.bf16.msra.mxu1 %v9143_v50 }
 0x913   :  { %5578 = vmatprep.subr.bf16.mxu0 %v9144_v6  ;;  %5642 = vmatprep.subr.bf16.mxu1 %v9145_v49 }
 0x916   :  { %5580 = vmatpush1.bf16.msra.mxu0 %v9146_v18  ;;  %5644 = vmatpush1.bf16.msra.mxu1 %v9147_v62 }
 0x917   :  { %5582 = vmatprep.subr.bf16.mxu0 %v9148_v38  ;;  %5646 = vmatprep.subr.bf16.mxu1 %v9149_v59  ;;  %v9178_v38 = vld [vmem:[#allocation119_spill] sm:$0xff] }
 0x91a   :  { %5584 = vmatpush1.bf16.msra.mxu0 %v9150_v53  ;;  %5648 = vmatpush1.bf16.msra.mxu1 %v9151_v35 }
 0x91b   :  { %5586 = vmatprep.subr.bf16.mxu0 %v9152_v21  ;;  %5650 = vmatprep.subr.bf16.mxu1 %v9153_v43 }
 0x91e   :  { %5588 = vmatpush1.bf16.msra.mxu0 %v9154_v29  ;;  %5652 = vmatpush1.bf16.msra.mxu1 %v9155_v12 }
 0x91f   :  { %5590 = vmatprep.subr.bf16.mxu0 %v9156_v9  ;;  %5654 = vmatprep.subr.bf16.mxu1 %v9157_v0  ;;  %v9179_v9 = vld [vmem:[#allocation75_spill] sm:$0xff] }
 0x922   :  { %5592 = vmatpush1.bf16.msra.mxu0 %v9158_v45  ;;  %5656 = vmatpush1.bf16.msra.mxu1 %v9159_v42 }
 0x923   :  { %5594 = vmatprep.subr.bf16.mxu0 %v9160_v16  ;;  %5658 = vmatprep.subr.bf16.mxu1 %v9161_v60 }
 0x926   :  { %5596 = vmatpush1.bf16.msra.mxu0 %v9162_v24  ;;  %5660 = vmatpush1.bf16.msra.mxu1 %v9163_v31 }
 0x927   :  { %5598 = vmatprep.subr.bf16.mxu0 %v9164_v37  ;;  %5662 = vmatprep.subr.bf16.mxu1 %v9165_v55 }
 0x92a   :  { %5600 = vmatpush1.bf16.msra.mxu0 %v9166_v46  ;;  %5664 = vmatpush1.bf16.msra.mxu1 %v9167_v51 }
 0x92b   :  { %5602 = vmatprep.subr.bf16.mxu0 %v9168_v3  ;;  %5666 = vmatprep.subr.bf16.mxu1 %v9169_v33 }
 0x92e   :  { %5604 = vmatpush1.bf16.msra.mxu0 %v9170_v11  ;;  %5668 = vmatpush1.bf16.msra.mxu1 %v9171_v7 }
 0x92f   :  { %5606 = vmatprep.subr.bf16.mxu0 %v9172_v2  ;;  %5670 = vmatprep.subr.bf16.mxu1 %v9173_v41 }
 0x932   :  { %5608 = vmatpush1.bf16.msra.mxu0 %v9174_v17  ;;  %5672 = vmatpush1.bf16.msra.mxu1 %v9175_v48 }
 0x933   :  { %5674 = vmatprep.subr.bf16.mxu0 %v5673_v19  ;;  %5706 = vmatprep.subr.bf16.mxu1 %v5705_v8  ;;  %v382_v8 = vld [vmem:[%s8147_s5 + $0x190] sm:$0xff] }
 0x988   :  { %v2783_v1 = vpop.f32.mrb[26].mxu0  ;;  %v2854_v32 = vpop.f32.mrb[26].mxu1 }
 0x989   :  { %v3001_v25 = vadd.f32 %v2783_v1, %v9176_v58  ;;  %v2785_v36 = vpop.f32.mrb[27].mxu0  ;;  %v2856_v34 = vpop.f32.mrb[27].mxu1  ;;  %v3003_v39 = vadd.f32 %v2854_v32, %v8808_v10  ;;  %v383_v1 = vld [vmem:[%s8147_s5 + $0x198] sm:$0xff] }
 0x98a   :  { %v3002_v57 = vadd.f32 %v2785_v36, %v9177_v47  ;;  %v3004_v4 = vadd.f32 %v2856_v34, %v8713_v23  ;;  %v5707_v36 = vpack.c.bf16 %v365_v22, %v364_v20  ;;  %v334_v34 = vld [vmem:[%s8147_s5 + $0x10] sm:$0xff]  ;;  %v391_v22 = vld [vmem:[%s8147_s5 + $0x1d8] sm:$0xff] }
 0x98b   :  { %v3571_v30 = vmul.f32 -1.442695, %v3001_v25  ;;  %v390_v20 = vld [vmem:[%s8147_s5 + $0x1d0] sm:$0xff] }
 0x98c   :  { %v3572_v14 = vmul.f32 -1.442695, %v3002_v57  ;;  %v3573_v52 = vmul.f32 -1.442695, %v3004_v4  ;;  %v335_v57 = vld [vmem:[%s8147_s5 + $0x18] sm:$0xff] }
 0x98d   :  { %6014 = vpow2.f32 %v3571_v30  ;;  %v367_v4 = vld [vmem:[%s8147_s5 + $0x118] sm:$0xff] }
 0x98e   :  { %6016 = vpow2.f32 %v3572_v14  ;;  %v366_v14 = vld [vmem:[%s8147_s5 + $0x110] sm:$0xff] }
 0x98f   :  { %6018 = vpow2.f32 %v3573_v52  ;;  %v352_v52 = vld [vmem:[%s8147_s5 + $0xa0] sm:$0xff] }
 0x990   :  { %6020 = vtanh.f32 %v3003_v39 }
 0x997   :  { %v6015_v15 = vpop.eup %6014 }
 0x998   :  { %v6017_v61 = vpop.eup %6016  ;;  %v3008_v5 = vadd.f32 1.0, %v6015_v15  ;;  %v5709_v15 = vpack.c.bf16 %v383_v1, %v382_v8  ;;  %v343_v8 = vld [vmem:[%s8147_s5 + $0x58] sm:$0xff] }
 0x999   :  { %v3014_v63 = vadd.f32 1.0, %v6017_v61  ;;  %v6019_v26 = vpop.eup %6018  ;;  %v353_v61 = vld [vmem:[%s8147_s5 + $0xa8] sm:$0xff] }
 0x99a   :  { %6022 = vrcp.f32 %v3008_v5  ;;  %v6021_v50 = vpop.eup %6020  ;;  %v3021_v62 = vadd.f32 1.0, %v6019_v26  ;;  %v384_v5 = vld [vmem:[%s8147_s5 + $0x1a0] sm:$0xff]  ;;  %v5679_v26 = vpack.c.bf16 %v335_v57, %v334_v34  ;;  %v361_v57 = vld [vmem:[%s8147_s5 + $0xe8] sm:$0xff] }
 0x99b   :  { %6024 = vrcp.f32 %v3014_v63  ;;  %v385_v63 = vld [vmem:[%s8147_s5 + $0x1a8] sm:$0xff]  ;;  %v360_v34 = vld [vmem:[%s8147_s5 + $0xe0] sm:$0xff] }
 0x99c   :  { %6026 = vrcp.f32 %v3021_v62  ;;  %v9181_v62 = vld [vmem:[#allocation82_spill] sm:$0xff] }
 0x9a4   :  { %v6023_v6 = vpop.eup %6022 }
 0x9a5   :  { %v6025_v49 = vpop.eup %6024  ;;  %v3025_v18 = vmul.f32 %v6023_v6, %v6021_v50  ;;  %v5711_v50 = vpack.c.bf16 %v367_v4, %v366_v14  ;;  %v336_v6 = vld [vmem:[%s8147_s5 + $0x20] sm:$0xff]  ;;  %v393_v14 = vld [vmem:[%s8147_s5 + $0x1e8] sm:$0xff] }
 0x9a6   :  { %v3024_v59 = vmul.f32 %v6025_v49, %v9178_v38  ;;  %v6027_v35 = vpop.eup %6026  ;;  %v337_v49 = vld [vmem:[%s8147_s5 + $0x28] sm:$0xff]  ;;  %v5681_v38 = vpack.c.bf16 %v353_v61, %v352_v52  ;;  %v5697_v61 = vpack.c.bf16 %v361_v57, %v360_v34  ;;  %v423_v34 = vld [vmem:[%s8147_s5 + $0x2d8] sm:$0xff] }
 0x9a8   :  { %v7731_v53 = vadd.f32 %v3025_v18, %v3024_v59  ;;  %v9180_v18 = vld [vmem:[#allocation78_spill] sm:$0xff]  ;;  %v5713_v59 = vpack.c.bf16 %v385_v63, %v384_v5 }
 0x9a9   :  { %v376_v63 = vld [vmem:[%s8147_s5 + $0x160] sm:$0xff] }
 0x9aa   :  { %6028 = vtanh.f32 %v7731_v53 }
 0x9b4   :  { %v6029_v21 = vpop.eup %6028 }
 0x9b5   :  { %v7734_v43 = vmul.f32 %v6029_v21, %v6027_v35  ;;  %v368_v35 = vld [vmem:[%s8147_s5 + $0x120] sm:$0xff]  ;;  %v369_v21 = vld [vmem:[%s8147_s5 + $0x128] sm:$0xff] }
 0x9b7   :  { %3121 = vmatprep.mubr.f32.mxu0 %v7734_v43  ;;  %3192 = vmatprep.mubr.f32.mxu1 %v7734_v43 }
 0x9c8   :  { %v2925_v29 = vpop.f32.mrb[28].mxu0  ;;  %v2996_v12 = vpop.f32.mrb[28].mxu1 }
 0x9c9   :  { %v3029_v0 = vadd.f32 %v2925_v29, %v9179_v9  ;;  %v2927_v45 = vpop.f32.mrb[29].mxu0  ;;  %v2998_v42 = vpop.f32.mrb[29].mxu1  ;;  %v3031_v55 = vadd.f32 %v2996_v12, %v8625_v40  ;;  %v332_v40 = vld [vmem:[%s8147_s5] sm:$0xff]  ;;  %v354_v29 = vld [vmem:[%s8147_s5 + $0xb0] sm:$0xff]  ;;  %v355_v12 = vld [vmem:[%s8147_s5 + $0xb8] sm:$0xff] }
 0x9ca   :  { %v3030_v16 = vadd.f32 %v2927_v45, %v8719_v56  ;;  %v3032_v31 = vadd.f32 %v2998_v42, %v8624_v44  ;;  %v5675_v25 = vpack.c.bf16 %v333_v13, %v332_v40  ;;  %v386_v9 = vld [vmem:[%s8147_s5 + $0x1b0] sm:$0xff]  ;;  %v5683_v45 = vpack.c.bf16 %v337_v49, %v336_v6  ;;  %v359_v13 = vld [vmem:[%s8147_s5 + $0xd8] sm:$0xff] }
 0x9cb   :  { %v3574_v60 = vmul.f32 -1.442695, %v3029_v0  ;;  %v387_v0 = vld [vmem:[%s8147_s5 + $0x1b8] sm:$0xff]  ;;  %v5715_v42 = vpack.c.bf16 %v369_v21, %v368_v35  ;;  %v358_v40 = vld [vmem:[%s8147_s5 + $0xd0] sm:$0xff] }
 0x9cc   :  { %v3575_v24 = vmul.f32 -1.442695, %v3030_v16  ;;  %v3576_v37 = vmul.f32 -1.442695, %v3032_v31  ;;  %v338_v16 = vld [vmem:[%s8147_s5 + $0x30] sm:$0xff]  ;;  %v5717_v31 = vpack.c.bf16 %v387_v0, %v386_v9  ;;  %v5693_v1 = vpack.c.bf16 %v359_v13, %v358_v40  ;;  %v363_v6 = vld [vmem:[%s8147_s5 + $0xf8] sm:$0xff] }
 0x9cd   :  { %6030 = vpow2.f32 %v3574_v60  ;;  %v339_v60 = vld [vmem:[%s8147_s5 + $0x38] sm:$0xff]  ;;  %v394_v49 = vld [vmem:[%s8147_s5 + $0x1f0] sm:$0xff]  ;;  %v412_v0 = vld [vmem:[%s8147_s5 + $0x280] sm:$0xff] }
 0x9ce   :  { %6032 = vpow2.f32 %v3575_v24  ;;  %v5685_v24 = vpack.c.bf16 %v355_v12, %v354_v29  ;;  %v347_v29 = vld [vmem:[%s8147_s5 + $0x78] sm:$0xff]  ;;  %v378_v12 = vld [vmem:[%s8147_s5 + $0x170] sm:$0xff] }
 0x9cf   :  { %6034 = vpow2.f32 %v3576_v37  ;;  %v370_v37 = vld [vmem:[%s8147_s5 + $0x130] sm:$0xff]  ;;  %v379_v9 = vld [vmem:[%s8147_s5 + $0x178] sm:$0xff] }
 0x9d0   :  { %6036 = vtanh.f32 %v3031_v55  ;;  %v371_v55 = vld [vmem:[%s8147_s5 + $0x138] sm:$0xff]  ;;  %v418_v40 = vld [vmem:[%s8147_s5 + $0x2b0] sm:$0xff] }
 0x9d1   :  { %v419_v13 = vld [vmem:[%s8147_s5 + $0x2b8] sm:$0xff] }
 0x9d7   :  { %v6031_v46 = vpop.eup %6030 }
 0x9d8   :  { %v6033_v51 = vpop.eup %6032  ;;  %v3036_v3 = vadd.f32 1.0, %v6031_v46  ;;  %v356_v46 = vld [vmem:[%s8147_s5 + $0xc0] sm:$0xff] }
 0x9d9   :  { %v3042_v33 = vadd.f32 1.0, %v6033_v51  ;;  %v6035_v11 = vpop.eup %6034  ;;  %v357_v51 = vld [vmem:[%s8147_s5 + $0xc8] sm:$0xff] }
 0x9da   :  { %6038 = vrcp.f32 %v3036_v3  ;;  %v6037_v7 = vpop.eup %6036  ;;  %v3049_v17 = vadd.f32 1.0, %v6035_v11  ;;  %v388_v3 = vld [vmem:[%s8147_s5 + $0x1c0] sm:$0xff]  ;;  %v5687_v11 = vpack.c.bf16 %v339_v60, %v338_v16  ;;  %v5735_v16 = vpack.c.bf16 %v379_v9, %v378_v12  ;;  %v429_v9 = vld [vmem:[%s8147_s5 + $0x308] sm:$0xff] }
 0x9db   :  { %6040 = vrcp.f32 %v3042_v33  ;;  %v389_v33 = vld [vmem:[%s8147_s5 + $0x1c8] sm:$0xff]  ;;  %v428_v12 = vld [vmem:[%s8147_s5 + $0x300] sm:$0xff] }
 0x9dc   :  { %6042 = vrcp.f32 %v3049_v17  ;;  %v5721_v17 = vpack.c.bf16 %v389_v33, %v388_v3  ;;  %v398_v3 = vld [vmem:[%s8147_s5 + $0x210] sm:$0xff]  ;;  %v399_v33 = vld [vmem:[%s8147_s5 + $0x218] sm:$0xff] }
 0x9e4   :  { %v6039_v56 = vpop.eup %6038 }
 0x9e5   :  { %v6041_v2 = vpop.eup %6040  ;;  %v3053_v41 = vmul.f32 %v6039_v56, %v6037_v7  ;;  %v5719_v7 = vpack.c.bf16 %v371_v55, %v370_v37  ;;  %v340_v56 = vld [vmem:[%s8147_s5 + $0x40] sm:$0xff]  ;;  %v414_v37 = vld [vmem:[%s8147_s5 + $0x290] sm:$0xff]  ;;  %v415_v55 = vld [vmem:[%s8147_s5 + $0x298] sm:$0xff] }
 0x9e6   :  { %v3052_v48 = vmul.f32 %v6041_v2, %v7577_v28  ;;  %v350_v28 = vld [vmem:[%s8147_s5 + $0x90] sm:$0xff]  ;;  %v6043_v19 = vpop.eup %6042  ;;  %v341_v2 = vld [vmem:[%s8147_s5 + $0x48] sm:$0xff] }
 0x9e7   :  { %v5677_v39 = vpack.c.bf16 %v351_v54, %v350_v28  ;;  %v5691_v28 = vpack.c.bf16 %v341_v2, %v340_v56  ;;  %v342_v54 = vld [vmem:[%s8147_s5 + $0x50] sm:$0xff]  ;;  %v9182_v56 = vld [vmem:[#allocation146_spill] sm:$0xff] }
 0x9e8   :  { %v3054_v44 = vadd.f32 %v3053_v41, %v3052_v48  ;;  %v5689_v41 = vpack.c.bf16 %v357_v51, %v356_v46  ;;  %v372_v48 = vld [vmem:[%s8147_s5 + $0x140] sm:$0xff]  ;;  %v5695_v4 = vpack.c.bf16 %v343_v8, %v342_v54  ;;  %v5741_v51 = vpack.c.bf16 %v415_v55, %v414_v37  ;;  %v9183_v2 = vld [vmem:[#allocation80_spill] sm:$0xff] }
 0x9e9   :  { %v421_v54 = vld [vmem:[%s8147_s5 + $0x2c8] sm:$0xff]  ;;  %v448_v37 = vld [vmem:[%s8147_s5 + $0x3a0] sm:$0xff] }
 0x9ea   :  { %6044 = vtanh.f32 %v3054_v44  ;;  %v373_v44 = vld [vmem:[%s8147_s5 + $0x148] sm:$0xff] }
 0x9eb   :  { %v449_v55 = vld [vmem:[%s8147_s5 + $0x3a8] sm:$0xff] }
 0x9f4   :  { %v6045_v32 = vpop.eup %6044 }
 0x9f5   :  { %v3056_v30 = vmul.f32 %v6045_v32, %v6043_v19  ;;  %v5723_v19 = vpack.c.bf16 %v373_v44, %v372_v48  ;;  %v5725_v32 = vpack.c.bf16 %v391_v22, %v390_v20  ;;  %v400_v48 = vld [vmem:[%s8147_s5 + $0x220] sm:$0xff]  ;;  %v401_v44 = vld [vmem:[%s8147_s5 + $0x228] sm:$0xff]  ;;  %v5749_v20 = vpack.c.bf16 %v419_v13, %v418_v40  ;;  %v402_v22 = vld [vmem:[%s8147_s5 + $0x230] sm:$0xff] }
 0x9f6   :  { %v436_v13 = vld [vmem:[%s8147_s5 + $0x340] sm:$0xff] }
 0x9f7   :  { %3122 = vmatmul.mubr.f32.vlgmr.msra.gmra.mrb[30].mxu0 %v3056_v30  ;;  %3193 = vmatmul.mubr.f32.vlgmr.msra.gmra.mrb[30].mxu1 %v3056_v30  ;;  %v392_v30 = vld [vmem:[%s8147_s5 + $0x1e0] sm:$0xff] }
 0x9f8   :  { %5676 = vmatpush3.bf16.msra.mxu0 %v5675_v25  ;;  %5708 = vmatpush3.bf16.msra.mxu1 %v5707_v36  ;;  %v374_v25 = vld [vmem:[%s8147_s5 + $0x150] sm:$0xff]  ;;  %v375_v36 = vld [vmem:[%s8147_s5 + $0x158] sm:$0xff]  ;;  %v5729_v5 = vpack.c.bf16 %v393_v14, %v392_v30 }
 0x9f9   :  { %3297 = vmatprep.mubr.f32.mxu0 %v9180_v18  ;;  %3367 = vmatprep.mubr.f32.mxu1 %v9181_v62  ;;  %v5727_v52 = vpack.c.bf16 %v375_v36, %v374_v25  ;;  %v395_v18 = vld [vmem:[%s8147_s5 + $0x1f8] sm:$0xff]  ;;  %v405_v25 = vld [vmem:[%s8147_s5 + $0x248] sm:$0xff]  ;;  %v422_v36 = vld [vmem:[%s8147_s5 + $0x2d0] sm:$0xff] }
 0x9fa   :  { %5678 = vmatprep.subr.bf16.mxu0 %v5677_v39  ;;  %5710 = vmatprep.subr.bf16.mxu1 %v5709_v15  ;;  %v344_v39 = vld [vmem:[%s8147_s5 + $0x60] sm:$0xff]  ;;  %v345_v15 = vld [vmem:[%s8147_s5 + $0x68] sm:$0xff]  ;;  %v5733_v21 = vpack.c.bf16 %v395_v18, %v394_v49  ;;  %v5757_v30 = vpack.c.bf16 %v423_v34, %v422_v36  ;;  %v406_v14 = vld [vmem:[%s8147_s5 + $0x250] sm:$0xff] }
 0x9fb   :  { %v5699_v62 = vpack.c.bf16 %v345_v15, %v344_v39  ;;  %v425_v39 = vld [vmem:[%s8147_s5 + $0x2e8] sm:$0xff]  ;;  %v410_v18 = vld [vmem:[%s8147_s5 + $0x270] sm:$0xff]  ;;  %v440_v36 = vld [vmem:[%s8147_s5 + $0x360] sm:$0xff] }
 0x9fc   :  { %5680 = vmatpush3.bf16.msra.mxu0 %v5679_v26  ;;  %5712 = vmatpush3.bf16.msra.mxu1 %v5711_v50  ;;  %v377_v26 = vld [vmem:[%s8147_s5 + $0x168] sm:$0xff]  ;;  %v362_v50 = vld [vmem:[%s8147_s5 + $0xf0] sm:$0xff] }
 0x9fd   :  { %5682 = vmatprep.subr.bf16.mxu0 %v5681_v38  ;;  %5714 = vmatprep.subr.bf16.mxu1 %v5713_v59  ;;  %v5731_v38 = vpack.c.bf16 %v377_v26, %v376_v63  ;;  %v346_v59 = vld [vmem:[%s8147_s5 + $0x70] sm:$0xff]  ;;  %v5701_v35 = vpack.c.bf16 %v363_v6, %v362_v50  ;;  %v409_v63 = vld [vmem:[%s8147_s5 + $0x268] sm:$0xff]  ;;  %v427_v50 = vld [vmem:[%s8147_s5 + $0x2f8] sm:$0xff] }
 0x9fe   :  { %v426_v26 = vld [vmem:[%s8147_s5 + $0x2f0] sm:$0xff] }
 0x9ff   :  { %v5765_v49 = vpack.c.bf16 %v427_v50, %v426_v26 }
 0xa00   :  { %5684 = vmatpush3.bf16.msra.mxu0 %v5683_v45  ;;  %5716 = vmatpush3.bf16.msra.mxu1 %v5715_v42  ;;  %v413_v45 = vld [vmem:[%s8147_s5 + $0x288] sm:$0xff]  ;;  %v5703_v42 = vpack.c.bf16 %v347_v29, %v346_v59 }
 0xa01   :  { %5686 = vmatprep.subr.bf16.mxu0 %v5685_v24  ;;  %5718 = vmatprep.subr.bf16.mxu1 %v5717_v31  ;;  %v5737_v60 = vpack.c.bf16 %v413_v45, %v412_v0  ;;  %v396_v24 = vld [vmem:[%s8147_s5 + $0x200] sm:$0xff]  ;;  %v397_v31 = vld [vmem:[%s8147_s5 + $0x208] sm:$0xff]  ;;  %v5771_v0 = vpack.c.bf16 %v429_v9, %v428_v12  ;;  %v446_v45 = vld [vmem:[%s8147_s5 + $0x390] sm:$0xff] }
 0xa02   :  { %v5739_v46 = vpack.c.bf16 %v397_v31, %v396_v24  ;;  %v9184_v59 = vld [vmem:[#allocation84_spill] sm:$0xff]  ;;  %v431_v24 = vld [vmem:[%s8147_s5 + $0x318] sm:$0xff] }
 0xa04   :  { %5688 = vmatpush3.bf16.msra.mxu0 %v5687_v11  ;;  %5720 = vmatpush3.bf16.msra.mxu1 %v5719_v7  ;;  %v416_v11 = vld [vmem:[%s8147_s5 + $0x2a0] sm:$0xff]  ;;  %v417_v7 = vld [vmem:[%s8147_s5 + $0x2a8] sm:$0xff] }
 0xa05   :  { %5690 = vmatprep.subr.bf16.mxu0 %v5689_v41  ;;  %5722 = vmatprep.subr.bf16.mxu1 %v5721_v17  ;;  %v5743_v41 = vpack.c.bf16 %v399_v33, %v398_v3  ;;  %v5745_v17 = vpack.c.bf16 %v417_v7, %v416_v11  ;;  %v433_v3 = vld [vmem:[%s8147_s5 + $0x328] sm:$0xff]  ;;  %v450_v11 = vld [vmem:[%s8147_s5 + $0x3b0] sm:$0xff]  ;;  %v451_v7 = vld [vmem:[%s8147_s5 + $0x3b8] sm:$0xff] }
 0xa08   :  { %5692 = vmatpush3.bf16.msra.mxu0 %v5691_v28  ;;  %5724 = vmatpush3.bf16.msra.mxu1 %v5723_v19  ;;  %v403_v28 = vld [vmem:[%s8147_s5 + $0x238] sm:$0xff]  ;;  %v420_v19 = vld [vmem:[%s8147_s5 + $0x2c0] sm:$0xff] }
 0xa09   :  { %5694 = vmatprep.subr.bf16.mxu0 %v5693_v1  ;;  %5726 = vmatprep.subr.bf16.mxu1 %v5725_v32  ;;  %v5751_v8 = vpack.c.bf16 %v403_v28, %v402_v22  ;;  %v5753_v1 = vpack.c.bf16 %v421_v54, %v420_v19  ;;  %v404_v32 = vld [vmem:[%s8147_s5 + $0x240] sm:$0xff]  ;;  %v454_v22 = vld [vmem:[%s8147_s5 + $0x3d0] sm:$0xff]  ;;  %v455_v28 = vld [vmem:[%s8147_s5 + $0x3d8] sm:$0xff] }
 0xa0a   :  { %v5755_v57 = vpack.c.bf16 %v405_v25, %v404_v32  ;;  %v5789_v19 = vpack.c.bf16 %v455_v28, %v454_v22  ;;  %v438_v54 = vld [vmem:[%s8147_s5 + $0x350] sm:$0xff]  ;;  %v456_v32 = vld [vmem:[%s8147_s5 + $0x3e0] sm:$0xff]  ;;  %v457_v25 = vld [vmem:[%s8147_s5 + $0x3e8] sm:$0xff] }
 0xa0b   :  { %v5793_v34 = vpack.c.bf16 %v457_v25, %v456_v32 }
 0xa0c   :  { %5696 = vmatpush3.bf16.msra.mxu0 %v5695_v4  ;;  %5728 = vmatpush3.bf16.msra.mxu1 %v5727_v52  ;;  %v407_v4 = vld [vmem:[%s8147_s5 + $0x258] sm:$0xff]  ;;  %v424_v52 = vld [vmem:[%s8147_s5 + $0x2e0] sm:$0xff] }
 0xa0d   :  { %5698 = vmatprep.subr.bf16.mxu0 %v5697_v61  ;;  %5730 = vmatprep.subr.bf16.mxu1 %v5729_v5  ;;  %v5759_v15 = vpack.c.bf16 %v407_v4, %v406_v14  ;;  %v5761_v61 = vpack.c.bf16 %v425_v39, %v424_v52  ;;  %v408_v5 = vld [vmem:[%s8147_s5 + $0x260] sm:$0xff]  ;;  %v459_v14 = vld [vmem:[%s8147_s5 + $0x3f8] sm:$0xff]  ;;  %v442_v39 = vld [vmem:[%s8147_s5 + $0x370] sm:$0xff] }
 0xa0e   :  { %v5763_v6 = vpack.c.bf16 %v409_v63, %v408_v5 }
 0xa10   :  { %5700 = vmatpush3.bf16.msra.mxu0 %v5699_v62  ;;  %5732 = vmatpush3.bf16.msra.mxu1 %v5731_v38  ;;  %v411_v62 = vld [vmem:[%s8147_s5 + $0x278] sm:$0xff] }
 0xa11   :  { %5702 = vmatprep.subr.bf16.mxu0 %v5701_v35  ;;  %5734 = vmatprep.subr.bf16.mxu1 %v5733_v21  ;;  %v5767_v38 = vpack.c.bf16 %v411_v62, %v410_v18  ;;  %v444_v35 = vld [vmem:[%s8147_s5 + $0x380] sm:$0xff]  ;;  %v445_v21 = vld [vmem:[%s8147_s5 + $0x388] sm:$0xff] }
 0xa12   :  { %v5769_v29 = vpack.c.bf16 %v445_v21, %v444_v35 }
 0xa14   :  { %5704 = vmatpush3.bf16.msra.mxu0 %v5703_v42  ;;  %5736 = vmatpush3.bf16.msra.mxu1 %v5735_v16  ;;  %v447_v42 = vld [vmem:[%s8147_s5 + $0x398] sm:$0xff] }
 0xa15   :  { %5738 = vmatprep.subr.bf16.mxu0 %v5737_v60  ;;  %5770 = vmatprep.subr.bf16.mxu1 %v5769_v29  ;;  %v5773_v16 = vpack.c.bf16 %v447_v42, %v446_v45  ;;  %v430_v60 = vld [vmem:[%s8147_s5 + $0x310] sm:$0xff] }
 0xa16   :  { %v5775_v31 = vpack.c.bf16 %v431_v24, %v430_v60 }
 0xa17   :  { %3298 = vmatmul.mubr.f32.vlgmr.msra.gmra.mrb[32].mxu0 %v9182_v56  ;;  %3368 = vmatmul.mubr.f32.vlgmr.msra.gmra.mrb[32].mxu1 %v9183_v2  ;;  %v5781_v56 = vpack.c.bf16 %v451_v7, %v450_v11  ;;  %v434_v2 = vld [vmem:[%s8147_s5 + $0x330] sm:$0xff] }
 0xa18   :  { %5740 = vmatpush3.bf16.msra.mxu0 %v5739_v46  ;;  %3437 = vmatprep.mubr.f32.mxu0 %v7568_v27  ;;  %v5747_v27 = vpack.c.bf16 %v401_v44, %v400_v48  ;;  %v5777_v46 = vpack.c.bf16 %v449_v55, %v448_v37  ;;  %v452_v48 = vld [vmem:[%s8147_s5 + $0x3c0] sm:$0xff]  ;;  %v453_v44 = vld [vmem:[%s8147_s5 + $0x3c8] sm:$0xff] }
 0xa19   :  { %5742 = vmatprep.subr.bf16.mxu0 %v5741_v51  ;;  %5772 = vmatpush3.bf16.msra.mxu1 %v5771_v0  ;;  %v432_v51 = vld [vmem:[%s8147_s5 + $0x320] sm:$0xff]  ;;  %v5785_v40 = vpack.c.bf16 %v453_v44, %v452_v48 }
 0xa1a   :  { %5774 = vmatprep.subr.bf16.mxu1 %v5773_v16  ;;  %v5779_v33 = vpack.c.bf16 %v433_v3, %v432_v51 }
 0xa1c   :  { %5744 = vmatpush3.bf16.msra.mxu0 %v5743_v41  ;;  %v435_v41 = vld [vmem:[%s8147_s5 + $0x338] sm:$0xff] }
 0xa1d   :  { %5746 = vmatprep.subr.bf16.mxu0 %v5745_v17  ;;  %5776 = vmatpush3.bf16.msra.mxu1 %v5775_v31  ;;  %v5783_v17 = vpack.c.bf16 %v435_v41, %v434_v2 }
 0xa1e   :  { %5778 = vmatprep.subr.bf16.mxu1 %v5777_v46 }
 0xa20   :  { %5748 = vmatpush3.bf16.msra.mxu0 %v5747_v27  ;;  %v437_v27 = vld [vmem:[%s8147_s5 + $0x348] sm:$0xff] }
 0xa21   :  { %5750 = vmatprep.subr.bf16.mxu0 %v5749_v20  ;;  %5780 = vmatpush3.bf16.msra.mxu1 %v5779_v33  ;;  %v5787_v20 = vpack.c.bf16 %v437_v27, %v436_v13 }
 0xa22   :  { %5782 = vmatprep.subr.bf16.mxu1 %v5781_v56 }
 0xa24   :  { %5752 = vmatpush3.bf16.msra.mxu0 %v5751_v8  ;;  %v439_v8 = vld [vmem:[%s8147_s5 + $0x358] sm:$0xff] }
 0xa25   :  { %5754 = vmatprep.subr.bf16.mxu0 %v5753_v1  ;;  %5784 = vmatpush3.bf16.msra.mxu1 %v5783_v17  ;;  %v5791_v1 = vpack.c.bf16 %v439_v8, %v438_v54 }
 0xa26   :  { %5786 = vmatprep.subr.bf16.mxu1 %v5785_v40 }
 0xa28   :  { %5756 = vmatpush3.bf16.msra.mxu0 %v5755_v57  ;;  %v441_v57 = vld [vmem:[%s8147_s5 + $0x368] sm:$0xff] }
 0xa29   :  { %5758 = vmatprep.subr.bf16.mxu0 %v5757_v30  ;;  %5788 = vmatpush3.bf16.msra.mxu1 %v5787_v20  ;;  %v458_v30 = vld [vmem:[%s8147_s5 + $0x3f0] sm:$0xff]  ;;  %v5795_v4 = vpack.c.bf16 %v441_v57, %v440_v36 }
 0xa2a   :  { %5790 = vmatprep.subr.bf16.mxu1 %v5789_v19  ;;  %v5797_v52 = vpack.c.bf16 %v459_v14, %v458_v30 }
 0xa2c   :  { %5760 = vmatpush3.bf16.msra.mxu0 %v5759_v15  ;;  %v443_v15 = vld [vmem:[%s8147_s5 + $0x378] sm:$0xff] }
 0xa2d   :  { %5762 = vmatprep.subr.bf16.mxu0 %v5761_v61  ;;  %5792 = vmatpush3.bf16.msra.mxu1 %v5791_v1  ;;  %v5799_v61 = vpack.c.bf16 %v443_v15, %v442_v39 }
 0xa2e   :  { %5794 = vmatprep.subr.bf16.mxu1 %v5793_v34 }
 0xa30   :  { %5764 = vmatpush3.bf16.msra.mxu0 %v5763_v6 }
 0xa31   :  { %5766 = vmatprep.subr.bf16.mxu0 %v5765_v49  ;;  %5796 = vmatpush3.bf16.msra.mxu1 %v5795_v4 }
 0xa32   :  { %5798 = vmatprep.subr.bf16.mxu1 %v5797_v52 }
 0xa34   :  { %5768 = vmatpush3.bf16.msra.mxu0 %v5767_v38 }
 0xa35   :  { %5800 = vmatpush3.bf16.msra.mxu1 %v5799_v61 }
 0xa37   :  { %3438 = vmatmul.mubr.f32.vlgmr.msra.gmra.mrb[34].mxu0 %v9184_v59 }
 0xaca   :  { %v3123_v5 = vpop.f32.mrb[30].mxu0  ;;  %v3194_v63 = vpop.f32.mrb[30].mxu1 }
 0xacb   :  { %v3199_v26 = vadd.f32 %v3123_v5, %v9176_v58  ;;  %v3125_v50 = vpop.f32.mrb[31].mxu0  ;;  %v3196_v6 = vpop.f32.mrb[31].mxu1  ;;  %v3201_v35 = vadd.f32 %v3194_v63, %v8808_v10  ;;  %v3580_v10 = vld [vmem:[%s8148_s6] ss:$0 sm:$0xff]  ;;  %s6114_s6 = smov [#allocation5]  }
 0xacc   :  { %v3200_v49 = vadd.f32 %v3125_v50, %v9177_v47  ;;  %v3202_v38 = vadd.f32 %v3196_v6, %v8713_v23  ;;  %s3521_s14 = sshll.u32 %s6114_s6, 4  ;;  %s3522_s14 = int_to_ptr.vmem [resolvable:$true] %s3521_s14 }
 0xacd   :  { %v3577_v18 = vmul.f32 -1.442695, %v3199_v26  ;;  %s6084_s15 = scalar_lea.vmem %s3522_s14, 64  ;;  %p6089_p9 = scmp.lt.s32.totalorder %s3522_s14, %s3522_s14 }
 0xace   :  { %v3578_v62 = vmul.f32 -1.442695, %v3200_v49  ;;  %v3579_v59 = vmul.f32 -1.442695, %v3202_v38  ;;  %p6085_p8 = scmp.ne.s32.totalorder %s3522_s14, %s6084_s15  ;;  %p6090_p10 = scmp.lt.s32.totalorder %s6084_s15, %s6084_s15 }
 0xacf   :  { %6046 = vpow2.f32 %v3577_v18 }
 0xad0   :  { %6048 = vpow2.f32 %v3578_v62  ;;  %p6091_p11 = por %p6090_p10, %p6089_p9 }
 0xad1   :  { %6050 = vpow2.f32 %v3579_v59 }
 0xad2   :  { %6052 = vtanh.f32 %v3201_v35  ;;  %p6092_p12 = pnand %p6091_p11, %p6085_p8 }
 0xad9   :  { %v6047_v21 = vpop.eup %6046 }
 0xada   :  { %v6049_v29 = vpop.eup %6048  ;;  %v3206_v12 = vadd.f32 1.0, %v6047_v21 }
 0xadb   :  { %v3212_v9 = vadd.f32 1.0, %v6049_v29  ;;  %v6051_v58 = vpop.eup %6050 }
 0xadc   :  { %6054 = vrcp.f32 %v3206_v12  ;;  %v6053_v0 = vpop.eup %6052  ;;  %v3219_v16 = vadd.f32 1.0, %v6051_v58 }
 0xadd   :  { %6056 = vrcp.f32 %v3212_v9 }
 0xade   :  { %6058 = vrcp.f32 %v3219_v16 }
 0xae6   :  { %v6055_v47 = vpop.eup %6054 }
 0xae7   :  { %v6057_v45 = vpop.eup %6056  ;;  %v3223_v42 = vmul.f32 %v6055_v47, %v6053_v0 }
 0xae8   :  { %v3222_v60 = vmul.f32 %v6057_v45, %v7731_v53  ;;  %v6059_v11 = vpop.eup %6058 }
 0xaea   :  { %v3613_v23 = vpop.f32.mrb[32].mxu0  ;;  %v3648_v24 = vpop.f32.mrb[32].mxu1  ;;  %v3224_v31 = vadd.f32 %v3223_v42, %v3222_v60 }
 0xaeb   :  { %v3614_v37 = vpop.f32.mrb[33].mxu0  ;;  %v3649_v55 = vpop.f32.mrb[33].mxu1 }
 0xaec   :  { %v3615_v46 = vadd.f32 %v3614_v37, %v3613_v23  ;;  %v3650_v51 = vadd.f32 %v3649_v55, %v3648_v24  ;;  %6060 = vtanh.f32 %v3224_v31 }
 0xaee   :  { %v3300_v3 = vadd.f32 %v3615_v46, %v3580_v10 }
 0xaf0   :  { %v3370_v33 = vadd.f32 %v3650_v51, %v3300_v3 }
 0xaf6   :  { %v6061_v7 = vpop.eup %6060 }
 0xaf7   :  { %v3226_v56 = vmul.f32 %v6061_v7, %v6059_v11 }
 0xaf9   :  { %3507 = vmatprep.mubr.f32.mxu1 %v3226_v56 }
 0xafa   :  { %3508 = vmatmul.mubr.f32.vlgmr.msra.gmra.mrb[34].mxu1 %v7734_v43 }
 0xb0a   :  { %v3683_v53 = vpop.f32.mrb[34].mxu0 }
 0xb0b   :  { %v3684_v2 = vpop.f32.mrb[35].mxu0 }
 0xb0c   :  { %v3685_v41 = vadd.f32 %v3684_v2, %v3683_v53 }
 0xb0e   :  { %v3440_v17 = vadd.f32 %v3685_v41, %v3370_v33 }
 0xbcd   :  { %v3718_v48 = vpop.f32.mrb[34].mxu1 }
 0xbce   :  { %v3719_v44 = vpop.f32.mrb[35].mxu1 }
 0xbcf   :  { %v3720_v40 = vadd.f32 %v3719_v44, %v3718_v48 }
 0xbd1   :  { %v3510_v13 = vadd.f32 %v3720_v40, %v3440_v17 }
 0xbd3   :  { %3514 = vst.msk [vmem:[#allocation5] sm:$0xf] %vm3513_vm1, %v3510_v13 }
 0xbd4   :  { %6095 = shalt.err (!%p6092_p12)
}
 0xbd5   :  { %s6096_s18 = scalar_lea.hbm %s8149_s7, 64 }
 0xbd6   :  { %p6097_p13 = scmp.ne.s32.totalorder %s8149_s7, %s6096_s18  ;;  %p6100_p0 = scmp.lt.u32.totalorder %s6096_s18, %s8149_s7 }
 0xbd8   :  { %p6102_p1 = pnand %p6100_p0, %p6097_p13 }
 0xbda   :  { %6105 = shalt.err (!%p6102_p1)
}
 0xbdb   :  { %3524 = dma.vmem_to_hbm [thread:$0]  %s3522_s14, 64, %s8149_s7, [#allocation4]  }
 0xbdc   :  { %6108 = dma.done.wait [#allocation4], 64  }
 0xbdd   :  { %6109 = vsyncadd [#allocation4], 4294967232 }
 0xbde   :  { %3528 = vsyncpa [#allocation3], 1 }
 0xbdf   :  { %3529 = vsyncpa [#allocation4], 1 }

</bundles_post_ra>
